<compile_context>
chip_gen: v5e
topology: v5e:2x2
jax: 0.10.0
libtpu: 0.0.40
codegen_flags: <defaults>
</compile_context>

<pallas_src>
import functools
import math

import numpy as np
import jax
import jax.numpy as jnp
from jax.experimental import pallas as pl
from jax.experimental.pallas import tpu as pltpu

# ---------------- module config (small, consistent with the PyTorch module) ----------------
D_MODEL = 32
D_FFN = 64
N_HEADS = 4
N_LEVELS = 2
N_POINTS = 2
SPATIAL_SHAPES = ((8, 8), (4, 4))   # (H_l, W_l) per feature level
LN_EPS = 1e-5                       # nn.LayerNorm default eps


# ================================ in-kernel helpers ================================

def _layer_norm(x, gamma, beta):
    mu = jnp.mean(x, axis=-1, keepdims=True)
    var = jnp.mean((x - mu) ** 2, axis=-1, keepdims=True)
    return (x - mu) * jax.lax.rsqrt(var + LN_EPS) * gamma + beta


def _softmax_last(x):
    m = jnp.max(x, axis=-1, keepdims=True)
    e = jnp.exp(x - m)
    return e / jnp.sum(e, axis=-1, keepdims=True)      # exact (parity with torch softmax)


# ================================ fused decoder-layer kernel ================================
# One grid step == one batch element.  Block shapes: (1, Lq, C) / (1, Len_in, C) activations,
# full-array weight blocks with constant index_map.

def _decoder_layer_kernel(tgt_ref, qpos_ref, ref_ref, src_ref, keep_ref,
                          sa_w_ref, sa_b_ref, sa_wo_ref, sa_bo_ref,
                          ca_w_ref, ca_b_ref, vp_w_ref, vp_b_ref,
                          op_w_ref, op_b_ref,
                          l1_w_ref, l1_b_ref, l2_w_ref, l2_b_ref,
                          ln_ref, o_ref,
                          *, lq, c, n_heads, n_levels, n_points,
                          spatial_shapes, level_starts):
    dh = c // n_heads
    len_in = src_ref.shape[1]
    lp = n_levels * n_points

    tgt = tgt_ref[0]                      # (Lq, C)
    qpos = qpos_ref[0]                    # (Lq, C)
    refp = ref_ref[0]                     # (Lq, L*2)   columns: (l, xy)
    ln = ln_ref[...]                      # (6, C): ln2_g, ln2_b, ln1_g, ln1_b, ln3_g, ln3_b

    # ---------------- self attention: q = k = tgt + query_pos, v = tgt ----------------
    qk_in = tgt + qpos
    big_in = jnp.concatenate([qk_in, tgt], axis=0)                     # (2*Lq, C), tile-aligned
    qkv = jnp.dot(big_in, sa_w_ref[...],
                  preferred_element_type=jnp.float32) + sa_b_ref[...]  # (2*Lq, 3C)
    q_all = qkv[:lq, 0:c]
    k_all = qkv[:lq, c:2 * c]
    v_all = qkv[lq:2 * lq, 2 * c:3 * c]

    scale = 1.0 / math.sqrt(dh)
    sa_heads = []
    for hh in range(n_heads):
        c0, c1 = hh * dh, (hh + 1) * dh
        s = jax.lax.dot_general(q_all[:, c0:c1], k_all[:, c0:c1],
                                (((1,), (1,)), ((), ())),
                                preferred_element_type=jnp.float32) * scale
        p = _softmax_last(s)
        sa_heads.append(jnp.dot(p, v_all[:, c0:c1], preferred_element_type=jnp.float32))
    # lane-concat heads (fits in lanes 0..C-1), one out-proj dot for all heads.
    sa_cat = jnp.concatenate(sa_heads, axis=1)                          # (Lq, C)
    sa_out = jnp.dot(sa_cat, sa_wo_ref[...],
                     preferred_element_type=jnp.float32) + sa_bo_ref[...]
    tgt1 = _layer_norm(tgt + sa_out, ln[0:1, :], ln[1:2, :])            # dropout2 = identity

    # ---------------- MS-deformable cross attention ----------------
    query = tgt1 + qpos
    value = jnp.dot(src_ref[0], vp_w_ref[...],
                    preferred_element_type=jnp.float32) + vp_b_ref[...]  # (Len_in, C)
    value = value * keep_ref[0]            # masked_fill(padding, 0) after value_proj

    # fused sampling_offsets + attention_weights projection: (Lq, H*L*P*2 + H*L*P)
    r = jnp.dot(query, ca_w_ref[...],
                preferred_element_type=jnp.float32) + ca_b_ref[...]
    off_cols = n_heads * lp * 2

    # flattened-position table, built once per program
    pos = jax.lax.broadcasted_iota(jnp.int32, (1, len_in), 1).astype(jnp.float32)

    # per-level tables hoisted out of the head/point loops (they only depend on the level):
    #   px_t / py_t : local pixel coords of each flattened column (px_t carries the level mask
    #                 as a -1e9 sentinel so out-of-level columns can never match a corner)
    #   bx / by     : reference point scaled to pixels (rx*W, ry*H)
    lvl_tabs = []
    for l_ in range(n_levels):
        h_l, w_l = spatial_shapes[l_]
        start = float(level_starts[l_])
        npix = float(h_l * w_l)
        local = pos - start
        in_lvl = (local >= 0.0) & (local < npix)
        py_t = jnp.floor(local * (1.0 / w_l))
        px_t = local - py_t * w_l
        px_t = jnp.where(in_lvl, px_t, -1.0e9)
        bx = refp[:, 2 * l_:2 * l_ + 1] * float(w_l)     # (Lq, 1)
        by = refp[:, 2 * l_ + 1:2 * l_ + 2] * float(h_l)
        lvl_tabs.append((px_t, py_t, bx, by))

    ca_heads = []
    for hh in range(n_heads):
        attn = _softmax_last(r[:, off_cols + hh * lp: off_cols + (hh + 1) * lp])  # (Lq, L*P)
        g = jnp.zeros((lq, len_in), jnp.float32)    # dense bilinear mixing matrix for head hh
        for l_ in range(n_levels):
            px_t, py_t, bx, by = lvl_tabs[l_]
            for p_ in range(n_points):
                j = l_ * n_points + p_
                col = hh * lp * 2 + l_ * n_points * 2 + p_ * 2
                # grid_sample(align_corners=False): pixel = loc * size - 0.5
                # (ref + off/W)*W - 0.5 == ref*W + off - 0.5 exactly for power-of-2 sizes.
                gx = bx + r[:, col:col + 1] - 0.5
                gy = by + r[:, col + 1:col + 2] - 0.5
                x0 = jnp.floor(gx)
                y0 = jnp.floor(gy)
                wx1 = gx - x0
                wy1 = gy - y0
                # factored bilinear; OOB / other-level corners find no matching column -> 0
                fx = (jnp.where(px_t == x0, 1.0, 0.0) * (1.0 - wx1)
                      + jnp.where(px_t == x0 + 1.0, 1.0, 0.0) * wx1)
                fy = (jnp.where(py_t == y0, 1.0, 0.0) * (1.0 - wy1)
                      + jnp.where(py_t == y0 + 1.0, 1.0, 0.0) * wy1)
                g = g + (attn[:, j:j + 1] * fx) * fy
        ca_heads.append(jnp.dot(g, value[:, hh * dh:(hh + 1) * dh],
                                preferred_element_type=jnp.float32))    # (Lq, Dh)
    ca_cat = jnp.concatenate(ca_heads, axis=1)                          # (Lq, C) lane concat
    ca_out = jnp.dot(ca_cat, op_w_ref[...],
                     preferred_element_type=jnp.float32) + op_b_ref[...]
    tgt2 = _layer_norm(tgt1 + ca_out, ln[2:3, :], ln[3:4, :])           # dropout1 = identity

    # ---------------- FFN ----------------
    h1 = jnp.dot(tgt2, l1_w_ref[...], preferred_element_type=jnp.float32) + l1_b_ref[...]
    h1 = jnp.maximum(h1, 0.0)                                           # activation='relu'
    y = jnp.dot(h1, l2_w_ref[...], preferred_element_type=jnp.float32) + l2_b_ref[...]
    o_ref[0] = _layer_norm(tgt2 + y, ln[4:5, :], ln[5:6, :])            # dropout3/4 = identity


# ================================ wrapper ================================

def _pack_params(params, c):
    sa_w = jnp.concatenate([params["sa_wq"], params["sa_wk"], params["sa_wv"]], axis=1)
    sa_b = jnp.concatenate([params["sa_bq"], params["sa_bk"], params["sa_bv"]]).reshape(1, -1)
    ca_w = jnp.concatenate([params["so_w"], params["aw_w"]], axis=1)
    ca_b = jnp.concatenate([params["so_b"], params["aw_b"]]).reshape(1, -1)
    ln = jnp.stack([params["ln2_g"], params["ln2_b"],
                    params["ln1_g"], params["ln1_b"],
                    params["ln3_g"], params["ln3_b"]], axis=0)          # (6, C)
    return sa_w, sa_b, ca_w, ca_b, ln


def deformable_decoder_layer(params, tgt, query_pos, reference_points, src,
                             spatial_shapes=None, level_start_index=None,
                             src_padding_mask=None):
    n, lq, c = tgt.shape
    len_in = src.shape[1]
    shapes = SPATIAL_SHAPES  # static; must match the spatial_shapes argument
    level_starts = tuple(int(x) for x in
                         np.cumsum([0] + [hh * ww for hh, ww in shapes])[:-1])

    # best-effort check that the runtime spatial shapes match the compile-time constants
    if spatial_shapes is not None:
        try:
            rt = tuple(tuple(int(v) for v in row) for row in np.asarray(spatial_shapes))
            assert rt == tuple(tuple(s) for s in shapes), \
                "runtime spatial_shapes must match static SPATIAL_SHAPES"
        except Exception:
            pass  # traced values: cannot check at trace time

    sa_w, sa_b, ca_w, ca_b, ln = _pack_params(params, c)

    if src_padding_mask is None:
        keep = jnp.ones((n, len_in, 1), jnp.float32)
    else:
        keep = 1.0 - src_padding_mask.reshape(n, len_in, 1).astype(jnp.float32)

    refp = reference_points.reshape(n, lq, N_LEVELS * 2)

    kernel = functools.partial(
        _decoder_layer_kernel, lq=lq, c=c, n_heads=N_HEADS,
        n_levels=N_LEVELS, n_points=N_POINTS,
        spatial_shapes=shapes, level_starts=level_starts)

    batch_args = [tgt, query_pos, refp, src, keep]
    weight_args = [sa_w, sa_b, params["sa_wo"], params["sa_bo"].reshape(1, c),
                   ca_w, ca_b, params["vp_w"], params["vp_b"].reshape(1, c),
                   params["op_w"], params["op_b"].reshape(1, c),
                   params["l1_w"], params["l1_b"].reshape(1, -1),
                   params["l2_w"], params["l2_b"].reshape(1, -1),
                   ln]

    def _batched_spec(a):            # one batch element per grid step
        nd = a.ndim
        return pl.BlockSpec((1,) + tuple(a.shape[1:]),
                            lambda b, _nd=nd: (b,) + (0,) * (_nd - 1))

    def _weight_spec(a):             # full array, constant index_map (stays resident in VMEM)
        nd = a.ndim
        return pl.BlockSpec(tuple(a.shape), lambda b, _nd=nd: (0,) * _nd)

    in_specs = ([_batched_spec(a) for a in batch_args]
                + [_weight_spec(a) for a in weight_args])

    out = pl.pallas_call(
        kernel,
        grid=(n,),
        in_specs=in_specs,
        out_specs=pl.BlockSpec((1, lq, c), lambda b: (b, 0, 0)),
        out_shape=jax.ShapeDtypeStruct((n, lq, c), jnp.float32),
        compiler_params=pltpu.CompilerParams(dimension_semantics=("parallel",)),
    )(*batch_args, *weight_args)
    return out


# ================================ params ================================

def init_params(key):
    c = D_MODEL
    h, l, p = N_HEADS, N_LEVELS, N_POINTS
    keys = jax.random.split(key, 12)

    def dense(k, fan_in, fan_out):
        lim = 1.0 / math.sqrt(fan_in)
        return jax.random.uniform(k, (fan_in, fan_out), jnp.float32, -lim, lim)

    # sampling_offsets bias per MSDeformAttn._reset_parameters (directional grid)
    thetas = jnp.arange(h, dtype=jnp.float32) * (2.0 * math.pi / h)
    grid = jnp.stack([jnp.cos(thetas), jnp.sin(thetas)], -1)
    grid = grid / jnp.max(jnp.abs(grid), axis=-1, keepdims=True)
    grid = jnp.tile(grid.reshape(h, 1, 1, 2), (1, l, p, 1))
    grid = grid * jnp.arange(1, p + 1, dtype=jnp.float32).reshape(1, 1, p, 1)
    so_b = grid.reshape(-1)

    return dict(
        # self attention (nn.MultiheadAttention q/k/v + out_proj), weights stored (in, out)
        sa_wq=dense(keys[0], c, c), sa_bq=jnp.zeros((c,), jnp.float32),
        sa_wk=dense(keys[1], c, c), sa_bk=jnp.zeros((c,), jnp.float32),
        sa_wv=dense(keys[2], c, c), sa_bv=jnp.zeros((c,), jnp.float32),
        sa_wo=dense(keys[3], c, c), sa_bo=jnp.zeros((c,), jnp.float32),
        ln2_g=jnp.ones((c,), jnp.float32), ln2_b=jnp.zeros((c,), jnp.float32),
        # deformable cross attention (MSDeformAttn)
        so_w=0.05 * jax.random.normal(keys[4], (c, h * l * p * 2), jnp.float32), so_b=so_b,
        aw_w=0.05 * jax.random.normal(keys[5], (c, h * l * p), jnp.float32),
        aw_b=jnp.zeros((h * l * p,), jnp.float32),
        vp_w=dense(keys[6], c, c), vp_b=jnp.zeros((c,), jnp.float32),
        op_w=dense(keys[7], c, c), op_b=jnp.zeros((c,), jnp.float32),
        ln1_g=jnp.ones((c,), jnp.float32), ln1_b=jnp.zeros((c,), jnp.float32),
        # FFN
        l1_w=dense(keys[8], c, D_FFN), l1_b=jnp.zeros((D_FFN,), jnp.float32),
        l2_w=dense(keys[9], D_FFN, c), l2_b=jnp.zeros((c,), jnp.float32),
        ln3_g=jnp.ones((c,), jnp.float32), ln3_b=jnp.zeros((c,), jnp.float32),
    )


# ================================ demo ================================

if __name__ == "__main__":
    key = jax.random.PRNGKey(0)
    k_par, k_tgt, k_pos, k_ref, k_src = jax.random.split(key, 5)
    params = init_params(k_par)

    N, Lq, C = 2, 8, D_MODEL
    len_in = sum(hh * ww for hh, ww in SPATIAL_SHAPES)

    tgt = jax.random.normal(k_tgt, (N, Lq, C), jnp.float32)
    query_pos = jax.random.normal(k_pos, (N, Lq, C), jnp.float32)
    reference_points = jax.random.uniform(k_ref, (N, Lq, N_LEVELS, 2), jnp.float32)
    src = jax.random.normal(k_src, (N, len_in, C), jnp.float32)
    spatial_shapes = jnp.asarray(SPATIAL_SHAPES, jnp.int32)
    level_start_index = jnp.concatenate([
        jnp.zeros((1,), jnp.int32),
        jnp.cumsum(spatial_shapes[:, 0] * spatial_shapes[:, 1])[:-1].astype(jnp.int32),
    ])

    out = deformable_decoder_layer(params, tgt, query_pos, reference_points, src,
                                   spatial_shapes, level_start_index, None)
    out = jax.block_until_ready(out)
    assert out.shape == (N, Lq, C)
    assert bool(jnp.all(jnp.isfinite(out)))
    print("KERNEL_OK")
</pallas_src>

<mosaic_0001>
module attributes {stable_mosaic.version = 11 : i64} {
  func.func @_decoder_layer_kernel(%arg0: i32, %arg1: memref<1x8x32xf32, #tpu.memory_space<vmem>>, %arg2: memref<1x8x32xf32, #tpu.memory_space<vmem>>, %arg3: memref<1x8x4xf32, #tpu.memory_space<vmem>>, %arg4: memref<1x80x32xf32, #tpu.memory_space<vmem>>, %arg5: memref<1x80x1xf32, #tpu.memory_space<vmem>>, %arg6: memref<32x96xf32, #tpu.memory_space<vmem>>, %arg7: memref<1x96xf32, #tpu.memory_space<vmem>>, %arg8: memref<32x32xf32, #tpu.memory_space<vmem>>, %arg9: memref<1x32xf32, #tpu.memory_space<vmem>>, %arg10: memref<32x48xf32, #tpu.memory_space<vmem>>, %arg11: memref<1x48xf32, #tpu.memory_space<vmem>>, %arg12: memref<32x32xf32, #tpu.memory_space<vmem>>, %arg13: memref<1x32xf32, #tpu.memory_space<vmem>>, %arg14: memref<32x32xf32, #tpu.memory_space<vmem>>, %arg15: memref<1x32xf32, #tpu.memory_space<vmem>>, %arg16: memref<32x64xf32, #tpu.memory_space<vmem>>, %arg17: memref<1x64xf32, #tpu.memory_space<vmem>>, %arg18: memref<64x32xf32, #tpu.memory_space<vmem>>, %arg19: memref<1x32xf32, #tpu.memory_space<vmem>>, %arg20: memref<6x32xf32, #tpu.memory_space<vmem>>, %arg21: memref<1x8x32xf32, #tpu.memory_space<vmem>>) attributes {dimension_semantics = [#tpu.dimension_semantics<parallel>], iteration_bounds = array<i64: 2>, scalar_prefetch = 0 : i64, scratch_operands = 0 : i64, tpu.core_type = #tpu.core_type<tc>, window_params = [{transform_indices = @transform_0, window_bounds = array<i64: 1, 8, 32>}, {transform_indices = @transform_1, window_bounds = array<i64: 1, 8, 32>}, {transform_indices = @transform_2, window_bounds = array<i64: 1, 8, 4>}, {transform_indices = @transform_3, window_bounds = array<i64: 1, 80, 32>}, {transform_indices = @transform_4, window_bounds = array<i64: 1, 80, 1>}, {pipeline_mode = #tpu.pipeline_mode<synchronous>, transform_indices = @transform_5, window_bounds = array<i64: 32, 96>}, {pipeline_mode = #tpu.pipeline_mode<synchronous>, transform_indices = @transform_6, window_bounds = array<i64: 1, 96>}, {pipeline_mode = #tpu.pipeline_mode<synchronous>, transform_indices = @transform_7, window_bounds = array<i64: 32, 32>}, {pipeline_mode = #tpu.pipeline_mode<synchronous>, transform_indices = @transform_8, window_bounds = array<i64: 1, 32>}, {pipeline_mode = #tpu.pipeline_mode<synchronous>, transform_indices = @transform_9, window_bounds = array<i64: 32, 48>}, {pipeline_mode = #tpu.pipeline_mode<synchronous>, transform_indices = @transform_10, window_bounds = array<i64: 1, 48>}, {pipeline_mode = #tpu.pipeline_mode<synchronous>, transform_indices = @transform_11, window_bounds = array<i64: 32, 32>}, {pipeline_mode = #tpu.pipeline_mode<synchronous>, transform_indices = @transform_12, window_bounds = array<i64: 1, 32>}, {pipeline_mode = #tpu.pipeline_mode<synchronous>, transform_indices = @transform_13, window_bounds = array<i64: 32, 32>}, {pipeline_mode = #tpu.pipeline_mode<synchronous>, transform_indices = @transform_14, window_bounds = array<i64: 1, 32>}, {pipeline_mode = #tpu.pipeline_mode<synchronous>, transform_indices = @transform_15, window_bounds = array<i64: 32, 64>}, {pipeline_mode = #tpu.pipeline_mode<synchronous>, transform_indices = @transform_16, window_bounds = array<i64: 1, 64>}, {pipeline_mode = #tpu.pipeline_mode<synchronous>, transform_indices = @transform_17, window_bounds = array<i64: 64, 32>}, {pipeline_mode = #tpu.pipeline_mode<synchronous>, transform_indices = @transform_18, window_bounds = array<i64: 1, 32>}, {pipeline_mode = #tpu.pipeline_mode<synchronous>, transform_indices = @transform_19, window_bounds = array<i64: 6, 32>}, {transform_indices = @transform_20, window_bounds = array<i64: 1, 8, 32>}]} {
    %c0 = arith.constant 0 : index
    %c0_0 = arith.constant 0 : index
    %c0_1 = arith.constant 0 : index
    %0 = vector.load %arg1[%c0, %c0_0, %c0_1] : memref<1x8x32xf32, #tpu.memory_space<vmem>>, vector<1x8x32xf32>
    %1 = vector.shape_cast %0 : vector<1x8x32xf32> to vector<8x32xf32>
    %c0_2 = arith.constant 0 : index
    %c0_3 = arith.constant 0 : index
    %c0_4 = arith.constant 0 : index
    %2 = vector.load %arg2[%c0_2, %c0_3, %c0_4] : memref<1x8x32xf32, #tpu.memory_space<vmem>>, vector<1x8x32xf32>
    %3 = vector.shape_cast %2 : vector<1x8x32xf32> to vector<8x32xf32>
    %c0_5 = arith.constant 0 : index
    %c0_6 = arith.constant 0 : index
    %c0_7 = arith.constant 0 : index
    %4 = vector.load %arg3[%c0_5, %c0_6, %c0_7] : memref<1x8x4xf32, #tpu.memory_space<vmem>>, vector<1x8x4xf32>
    %5 = vector.shape_cast %4 : vector<1x8x4xf32> to vector<8x4xf32>
    %c0_8 = arith.constant 0 : index
    %c0_9 = arith.constant 0 : index
    %6 = vector.load %arg20[%c0_8, %c0_9] : memref<6x32xf32, #tpu.memory_space<vmem>>, vector<6x32xf32>
    %7 = arith.addf %1, %3 : vector<8x32xf32>
    %8 = tpu.concatenate %7, %1 in 0 : vector<8x32xf32>, vector<8x32xf32> -> vector<16x32xf32>
    %c0_10 = arith.constant 0 : index
    %c0_11 = arith.constant 0 : index
    %9 = vector.load %arg6[%c0_10, %c0_11] : memref<32x96xf32, #tpu.memory_space<vmem>>, vector<32x96xf32>
    %cst = arith.constant dense<0.000000e+00> : vector<16x96xf32>
    %10 = tpu.matmul %8, %9, %cst {dimension_numbers = #tpu.dot_dimension_numbers<[1], [0], [0], [1], [0, 0, 1, 1], [], []>} : vector<16x32xf32>, vector<32x96xf32>, vector<16x96xf32> -> vector<16x96xf32>
    %c0_12 = arith.constant 0 : index
    %c0_13 = arith.constant 0 : index
    %11 = vector.load %arg7[%c0_12, %c0_13] : memref<1x96xf32, #tpu.memory_space<vmem>>, vector<1x96xf32>
    %12 = vector.broadcast %11 : vector<1x96xf32> to vector<16x96xf32>
    %13 = arith.addf %10, %12 : vector<16x96xf32>
    %14 = vector.extract_strided_slice %13 {offsets = [0, 0], sizes = [8, 32], strides = [1, 1]} : vector<16x96xf32> to vector<8x32xf32>
    %15 = vector.extract_strided_slice %13 {offsets = [0, 32], sizes = [8, 32], strides = [1, 1]} : vector<16x96xf32> to vector<8x32xf32>
    %16 = vector.extract_strided_slice %13 {offsets = [8, 64], sizes = [8, 32], strides = [1, 1]} : vector<16x96xf32> to vector<8x32xf32>
    %17 = vector.extract_strided_slice %14 {offsets = [0, 0], sizes = [8, 8], strides = [1, 1]} : vector<8x32xf32> to vector<8x8xf32>
    %18 = vector.extract_strided_slice %15 {offsets = [0, 0], sizes = [8, 8], strides = [1, 1]} : vector<8x32xf32> to vector<8x8xf32>
    %cst_14 = arith.constant dense<0.000000e+00> : vector<8x8xf32>
    %19 = tpu.matmul %17, %18, %cst_14 {dimension_numbers = #tpu.dot_dimension_numbers<[1], [1], [0], [0], [0, 0, 1, 0], [], []>} : vector<8x8xf32>, vector<8x8xf32>, vector<8x8xf32> -> vector<8x8xf32>
    %cst_15 = arith.constant 0.353553385 : f32
    %20 = vector.broadcast %cst_15 : f32 to vector<8x8xf32>
    %21 = arith.mulf %19, %20 : vector<8x8xf32>
    %cst_16 = arith.constant dense<0xFF800000> : vector<8xf32>
    %22 = vector.multi_reduction <maximumf>, %21, %cst_16 [1] : vector<8x8xf32> to vector<8xf32>
    %23 = vector.shape_cast %22 : vector<8xf32> to vector<8x1xf32>
    %24 = vector.broadcast %23 : vector<8x1xf32> to vector<8x8xf32>
    %25 = arith.subf %21, %24 : vector<8x8xf32>
    %26 = math.exp %25 : vector<8x8xf32>
    %cst_17 = arith.constant dense<0.000000e+00> : vector<8xf32>
    %27 = vector.multi_reduction <add>, %26, %cst_17 [1] : vector<8x8xf32> to vector<8xf32>
    %28 = vector.shape_cast %27 : vector<8xf32> to vector<8x1xf32>
    %29 = vector.broadcast %28 : vector<8x1xf32> to vector<8x8xf32>
    %30 = arith.divf %26, %29 : vector<8x8xf32>
    %31 = vector.extract_strided_slice %16 {offsets = [0, 0], sizes = [8, 8], strides = [1, 1]} : vector<8x32xf32> to vector<8x8xf32>
    %cst_18 = arith.constant dense<0.000000e+00> : vector<8x8xf32>
    %32 = tpu.matmul %30, %31, %cst_18 {dimension_numbers = #tpu.dot_dimension_numbers<[1], [0], [0], [1], [0, 0, 1, 1], [], []>} : vector<8x8xf32>, vector<8x8xf32>, vector<8x8xf32> -> vector<8x8xf32>
    %33 = vector.extract_strided_slice %14 {offsets = [0, 8], sizes = [8, 8], strides = [1, 1]} : vector<8x32xf32> to vector<8x8xf32>
    %34 = vector.extract_strided_slice %15 {offsets = [0, 8], sizes = [8, 8], strides = [1, 1]} : vector<8x32xf32> to vector<8x8xf32>
    %cst_19 = arith.constant dense<0.000000e+00> : vector<8x8xf32>
    %35 = tpu.matmul %33, %34, %cst_19 {dimension_numbers = #tpu.dot_dimension_numbers<[1], [1], [0], [0], [0, 0, 1, 0], [], []>} : vector<8x8xf32>, vector<8x8xf32>, vector<8x8xf32> -> vector<8x8xf32>
    %cst_20 = arith.constant 0.353553385 : f32
    %36 = vector.broadcast %cst_20 : f32 to vector<8x8xf32>
    %37 = arith.mulf %35, %36 : vector<8x8xf32>
    %cst_21 = arith.constant dense<0xFF800000> : vector<8xf32>
    %38 = vector.multi_reduction <maximumf>, %37, %cst_21 [1] : vector<8x8xf32> to vector<8xf32>
    %39 = vector.shape_cast %38 : vector<8xf32> to vector<8x1xf32>
    %40 = vector.broadcast %39 : vector<8x1xf32> to vector<8x8xf32>
    %41 = arith.subf %37, %40 : vector<8x8xf32>
    %42 = math.exp %41 : vector<8x8xf32>
    %cst_22 = arith.constant dense<0.000000e+00> : vector<8xf32>
    %43 = vector.multi_reduction <add>, %42, %cst_22 [1] : vector<8x8xf32> to vector<8xf32>
    %44 = vector.shape_cast %43 : vector<8xf32> to vector<8x1xf32>
    %45 = vector.broadcast %44 : vector<8x1xf32> to vector<8x8xf32>
    %46 = arith.divf %42, %45 : vector<8x8xf32>
    %47 = vector.extract_strided_slice %16 {offsets = [0, 8], sizes = [8, 8], strides = [1, 1]} : vector<8x32xf32> to vector<8x8xf32>
    %cst_23 = arith.constant dense<0.000000e+00> : vector<8x8xf32>
    %48 = tpu.matmul %46, %47, %cst_23 {dimension_numbers = #tpu.dot_dimension_numbers<[1], [0], [0], [1], [0, 0, 1, 1], [], []>} : vector<8x8xf32>, vector<8x8xf32>, vector<8x8xf32> -> vector<8x8xf32>
    %49 = vector.extract_strided_slice %14 {offsets = [0, 16], sizes = [8, 8], strides = [1, 1]} : vector<8x32xf32> to vector<8x8xf32>
    %50 = vector.extract_strided_slice %15 {offsets = [0, 16], sizes = [8, 8], strides = [1, 1]} : vector<8x32xf32> to vector<8x8xf32>
    %cst_24 = arith.constant dense<0.000000e+00> : vector<8x8xf32>
    %51 = tpu.matmul %49, %50, %cst_24 {dimension_numbers = #tpu.dot_dimension_numbers<[1], [1], [0], [0], [0, 0, 1, 0], [], []>} : vector<8x8xf32>, vector<8x8xf32>, vector<8x8xf32> -> vector<8x8xf32>
    %cst_25 = arith.constant 0.353553385 : f32
    %52 = vector.broadcast %cst_25 : f32 to vector<8x8xf32>
    %53 = arith.mulf %51, %52 : vector<8x8xf32>
    %cst_26 = arith.constant dense<0xFF800000> : vector<8xf32>
    %54 = vector.multi_reduction <maximumf>, %53, %cst_26 [1] : vector<8x8xf32> to vector<8xf32>
    %55 = vector.shape_cast %54 : vector<8xf32> to vector<8x1xf32>
    %56 = vector.broadcast %55 : vector<8x1xf32> to vector<8x8xf32>
    %57 = arith.subf %53, %56 : vector<8x8xf32>
    %58 = math.exp %57 : vector<8x8xf32>
    %cst_27 = arith.constant dense<0.000000e+00> : vector<8xf32>
    %59 = vector.multi_reduction <add>, %58, %cst_27 [1] : vector<8x8xf32> to vector<8xf32>
    %60 = vector.shape_cast %59 : vector<8xf32> to vector<8x1xf32>
    %61 = vector.broadcast %60 : vector<8x1xf32> to vector<8x8xf32>
    %62 = arith.divf %58, %61 : vector<8x8xf32>
    %63 = vector.extract_strided_slice %16 {offsets = [0, 16], sizes = [8, 8], strides = [1, 1]} : vector<8x32xf32> to vector<8x8xf32>
    %cst_28 = arith.constant dense<0.000000e+00> : vector<8x8xf32>
    %64 = tpu.matmul %62, %63, %cst_28 {dimension_numbers = #tpu.dot_dimension_numbers<[1], [0], [0], [1], [0, 0, 1, 1], [], []>} : vector<8x8xf32>, vector<8x8xf32>, vector<8x8xf32> -> vector<8x8xf32>
    %65 = vector.extract_strided_slice %14 {offsets = [0, 24], sizes = [8, 8], strides = [1, 1]} : vector<8x32xf32> to vector<8x8xf32>
    %66 = vector.extract_strided_slice %15 {offsets = [0, 24], sizes = [8, 8], strides = [1, 1]} : vector<8x32xf32> to vector<8x8xf32>
    %cst_29 = arith.constant dense<0.000000e+00> : vector<8x8xf32>
    %67 = tpu.matmul %65, %66, %cst_29 {dimension_numbers = #tpu.dot_dimension_numbers<[1], [1], [0], [0], [0, 0, 1, 0], [], []>} : vector<8x8xf32>, vector<8x8xf32>, vector<8x8xf32> -> vector<8x8xf32>
    %cst_30 = arith.constant 0.353553385 : f32
    %68 = vector.broadcast %cst_30 : f32 to vector<8x8xf32>
    %69 = arith.mulf %67, %68 : vector<8x8xf32>
    %cst_31 = arith.constant dense<0xFF800000> : vector<8xf32>
    %70 = vector.multi_reduction <maximumf>, %69, %cst_31 [1] : vector<8x8xf32> to vector<8xf32>
    %71 = vector.shape_cast %70 : vector<8xf32> to vector<8x1xf32>
    %72 = vector.broadcast %71 : vector<8x1xf32> to vector<8x8xf32>
    %73 = arith.subf %69, %72 : vector<8x8xf32>
    %74 = math.exp %73 : vector<8x8xf32>
    %cst_32 = arith.constant dense<0.000000e+00> : vector<8xf32>
    %75 = vector.multi_reduction <add>, %74, %cst_32 [1] : vector<8x8xf32> to vector<8xf32>
    %76 = vector.shape_cast %75 : vector<8xf32> to vector<8x1xf32>
    %77 = vector.broadcast %76 : vector<8x1xf32> to vector<8x8xf32>
    %78 = arith.divf %74, %77 : vector<8x8xf32>
    %79 = vector.extract_strided_slice %16 {offsets = [0, 24], sizes = [8, 8], strides = [1, 1]} : vector<8x32xf32> to vector<8x8xf32>
    %cst_33 = arith.constant dense<0.000000e+00> : vector<8x8xf32>
    %80 = tpu.matmul %78, %79, %cst_33 {dimension_numbers = #tpu.dot_dimension_numbers<[1], [0], [0], [1], [0, 0, 1, 1], [], []>} : vector<8x8xf32>, vector<8x8xf32>, vector<8x8xf32> -> vector<8x8xf32>
    %81 = tpu.concatenate %32, %48, %64, %80 in 1 : vector<8x8xf32>, vector<8x8xf32>, vector<8x8xf32>, vector<8x8xf32> -> vector<8x32xf32>
    %c0_34 = arith.constant 0 : index
    %c0_35 = arith.constant 0 : index
    %82 = vector.load %arg8[%c0_34, %c0_35] : memref<32x32xf32, #tpu.memory_space<vmem>>, vector<32x32xf32>
    %cst_36 = arith.constant dense<0.000000e+00> : vector<8x32xf32>
    %83 = tpu.matmul %81, %82, %cst_36 {dimension_numbers = #tpu.dot_dimension_numbers<[1], [0], [0], [1], [0, 0, 1, 1], [], []>} : vector<8x32xf32>, vector<32x32xf32>, vector<8x32xf32> -> vector<8x32xf32>
    %c0_37 = arith.constant 0 : index
    %c0_38 = arith.constant 0 : index
    %84 = vector.load %arg9[%c0_37, %c0_38] : memref<1x32xf32, #tpu.memory_space<vmem>>, vector<1x32xf32>
    %85 = vector.broadcast %84 : vector<1x32xf32> to vector<8x32xf32>
    %86 = arith.addf %83, %85 : vector<8x32xf32>
    %87 = arith.addf %1, %86 : vector<8x32xf32>
    %88 = vector.extract_strided_slice %6 {offsets = [0, 0], sizes = [1, 32], strides = [1, 1]} : vector<6x32xf32> to vector<1x32xf32>
    %89 = vector.extract_strided_slice %6 {offsets = [1, 0], sizes = [1, 32], strides = [1, 1]} : vector<6x32xf32> to vector<1x32xf32>
    %cst_39 = arith.constant dense<0.000000e+00> : vector<8xf32>
    %90 = vector.multi_reduction <add>, %87, %cst_39 [1] : vector<8x32xf32> to vector<8xf32>
    %91 = vector.shape_cast %90 : vector<8xf32> to vector<8x1xf32>
    %cst_40 = arith.constant 3.200000e+01 : f32
    %92 = vector.broadcast %cst_40 : f32 to vector<8x1xf32>
    %93 = arith.divf %91, %92 : vector<8x1xf32>
    %94 = vector.broadcast %93 : vector<8x1xf32> to vector<8x32xf32>
    %95 = arith.subf %87, %94 : vector<8x32xf32>
    %96 = arith.mulf %95, %95 : vector<8x32xf32>
    %cst_41 = arith.constant dense<0.000000e+00> : vector<8xf32>
    %97 = vector.multi_reduction <add>, %96, %cst_41 [1] : vector<8x32xf32> to vector<8xf32>
    %98 = vector.shape_cast %97 : vector<8xf32> to vector<8x1xf32>
    %cst_42 = arith.constant 3.200000e+01 : f32
    %99 = vector.broadcast %cst_42 : f32 to vector<8x1xf32>
    %100 = arith.divf %98, %99 : vector<8x1xf32>
    %101 = vector.broadcast %93 : vector<8x1xf32> to vector<8x32xf32>
    %102 = arith.subf %87, %101 : vector<8x32xf32>
    %cst_43 = arith.constant 9.99999974E-6 : f32
    %103 = vector.broadcast %cst_43 : f32 to vector<8x1xf32>
    %104 = arith.addf %100, %103 : vector<8x1xf32>
    %105 = math.rsqrt %104 : vector<8x1xf32>
    %106 = vector.broadcast %105 : vector<8x1xf32> to vector<8x32xf32>
    %107 = arith.mulf %102, %106 : vector<8x32xf32>
    %108 = vector.broadcast %88 : vector<1x32xf32> to vector<8x32xf32>
    %109 = arith.mulf %107, %108 : vector<8x32xf32>
    %110 = vector.broadcast %89 : vector<1x32xf32> to vector<8x32xf32>
    %111 = arith.addf %109, %110 : vector<8x32xf32>
    %112 = arith.addf %111, %3 : vector<8x32xf32>
    %c0_44 = arith.constant 0 : index
    %c0_45 = arith.constant 0 : index
    %c0_46 = arith.constant 0 : index
    %113 = vector.load %arg4[%c0_44, %c0_45, %c0_46] : memref<1x80x32xf32, #tpu.memory_space<vmem>>, vector<1x80x32xf32>
    %114 = vector.shape_cast %113 : vector<1x80x32xf32> to vector<80x32xf32>
    %c0_47 = arith.constant 0 : index
    %c0_48 = arith.constant 0 : index
    %115 = vector.load %arg12[%c0_47, %c0_48] : memref<32x32xf32, #tpu.memory_space<vmem>>, vector<32x32xf32>
    %cst_49 = arith.constant dense<0.000000e+00> : vector<80x32xf32>
    %116 = tpu.matmul %114, %115, %cst_49 {dimension_numbers = #tpu.dot_dimension_numbers<[1], [0], [0], [1], [0, 0, 1, 1], [], []>} : vector<80x32xf32>, vector<32x32xf32>, vector<80x32xf32> -> vector<80x32xf32>
    %c0_50 = arith.constant 0 : index
    %c0_51 = arith.constant 0 : index
    %117 = vector.load %arg13[%c0_50, %c0_51] : memref<1x32xf32, #tpu.memory_space<vmem>>, vector<1x32xf32>
    %118 = vector.broadcast %117 : vector<1x32xf32> to vector<80x32xf32>
    %119 = arith.addf %116, %118 : vector<80x32xf32>
    %c0_52 = arith.constant 0 : index
    %c0_53 = arith.constant 0 : index
    %c0_54 = arith.constant 0 : index
    %120 = vector.load %arg5[%c0_52, %c0_53, %c0_54] : memref<1x80x1xf32, #tpu.memory_space<vmem>>, vector<1x80x1xf32>
    %121 = vector.shape_cast %120 : vector<1x80x1xf32> to vector<80x1xf32>
    %122 = vector.broadcast %121 : vector<80x1xf32> to vector<80x32xf32>
    %123 = arith.mulf %119, %122 : vector<80x32xf32>
    %c0_55 = arith.constant 0 : index
    %c0_56 = arith.constant 0 : index
    %124 = vector.load %arg10[%c0_55, %c0_56] : memref<32x48xf32, #tpu.memory_space<vmem>>, vector<32x48xf32>
    %cst_57 = arith.constant dense<0.000000e+00> : vector<8x48xf32>
    %125 = tpu.matmul %112, %124, %cst_57 {dimension_numbers = #tpu.dot_dimension_numbers<[1], [0], [0], [1], [0, 0, 1, 1], [], []>} : vector<8x32xf32>, vector<32x48xf32>, vector<8x48xf32> -> vector<8x48xf32>
    %c0_58 = arith.constant 0 : index
    %c0_59 = arith.constant 0 : index
    %126 = vector.load %arg11[%c0_58, %c0_59] : memref<1x48xf32, #tpu.memory_space<vmem>>, vector<1x48xf32>
    %127 = vector.broadcast %126 : vector<1x48xf32> to vector<8x48xf32>
    %128 = arith.addf %125, %127 : vector<8x48xf32>
    %129 = tpu.iota {dimensions = array<i32: 1>} : vector<1x80xi32>
    %130 = arith.sitofp %129 : vector<1x80xi32> to vector<1x80xf32>
    %cst_60 = arith.constant 0.000000e+00 : f32
    %131 = vector.broadcast %cst_60 : f32 to vector<1x80xf32>
    %132 = arith.subf %130, %131 : vector<1x80xf32>
    %cst_61 = arith.constant 0.000000e+00 : f32
    %133 = vector.broadcast %cst_61 : f32 to vector<1x80xf32>
    %134 = arith.cmpf oge, %132, %133 : vector<1x80xf32>
    %cst_62 = arith.constant 6.400000e+01 : f32
    %135 = vector.broadcast %cst_62 : f32 to vector<1x80xf32>
    %136 = arith.cmpf olt, %132, %135 : vector<1x80xf32>
    %137 = arith.andi %134, %136 : vector<1x80xi1>
    %cst_63 = arith.constant 1.250000e-01 : f32
    %138 = vector.broadcast %cst_63 : f32 to vector<1x80xf32>
    %139 = arith.mulf %132, %138 : vector<1x80xf32>
    %140 = math.floor %139 : vector<1x80xf32>
    %cst_64 = arith.constant 8.000000e+00 : f32
    %141 = vector.broadcast %cst_64 : f32 to vector<1x80xf32>
    %142 = arith.mulf %140, %141 : vector<1x80xf32>
    %143 = arith.subf %132, %142 : vector<1x80xf32>
    %cst_65 = arith.constant -1.000000e+09 : f32
    %144 = vector.broadcast %cst_65 : f32 to vector<1x80xf32>
    %145 = arith.select %137, %143, %144 : vector<1x80xi1>, vector<1x80xf32>
    %146 = vector.extract_strided_slice %5 {offsets = [0, 0], sizes = [8, 1], strides = [1, 1]} : vector<8x4xf32> to vector<8x1xf32>
    %cst_66 = arith.constant 8.000000e+00 : f32
    %147 = vector.broadcast %cst_66 : f32 to vector<8x1xf32>
    %148 = arith.mulf %146, %147 : vector<8x1xf32>
    %149 = vector.extract_strided_slice %5 {offsets = [0, 1], sizes = [8, 1], strides = [1, 1]} : vector<8x4xf32> to vector<8x1xf32>
    %cst_67 = arith.constant 8.000000e+00 : f32
    %150 = vector.broadcast %cst_67 : f32 to vector<8x1xf32>
    %151 = arith.mulf %149, %150 : vector<8x1xf32>
    %cst_68 = arith.constant 6.400000e+01 : f32
    %152 = vector.broadcast %cst_68 : f32 to vector<1x80xf32>
    %153 = arith.subf %130, %152 : vector<1x80xf32>
    %cst_69 = arith.constant 0.000000e+00 : f32
    %154 = vector.broadcast %cst_69 : f32 to vector<1x80xf32>
    %155 = arith.cmpf oge, %153, %154 : vector<1x80xf32>
    %cst_70 = arith.constant 1.600000e+01 : f32
    %156 = vector.broadcast %cst_70 : f32 to vector<1x80xf32>
    %157 = arith.cmpf olt, %153, %156 : vector<1x80xf32>
    %158 = arith.andi %155, %157 : vector<1x80xi1>
    %cst_71 = arith.constant 2.500000e-01 : f32
    %159 = vector.broadcast %cst_71 : f32 to vector<1x80xf32>
    %160 = arith.mulf %153, %159 : vector<1x80xf32>
    %161 = math.floor %160 : vector<1x80xf32>
    %cst_72 = arith.constant 4.000000e+00 : f32
    %162 = vector.broadcast %cst_72 : f32 to vector<1x80xf32>
    %163 = arith.mulf %161, %162 : vector<1x80xf32>
    %164 = arith.subf %153, %163 : vector<1x80xf32>
    %cst_73 = arith.constant -1.000000e+09 : f32
    %165 = vector.broadcast %cst_73 : f32 to vector<1x80xf32>
    %166 = arith.select %158, %164, %165 : vector<1x80xi1>, vector<1x80xf32>
    %167 = vector.extract_strided_slice %5 {offsets = [0, 2], sizes = [8, 1], strides = [1, 1]} : vector<8x4xf32> to vector<8x1xf32>
    %cst_74 = arith.constant 4.000000e+00 : f32
    %168 = vector.broadcast %cst_74 : f32 to vector<8x1xf32>
    %169 = arith.mulf %167, %168 : vector<8x1xf32>
    %170 = vector.extract_strided_slice %5 {offsets = [0, 3], sizes = [8, 1], strides = [1, 1]} : vector<8x4xf32> to vector<8x1xf32>
    %cst_75 = arith.constant 4.000000e+00 : f32
    %171 = vector.broadcast %cst_75 : f32 to vector<8x1xf32>
    %172 = arith.mulf %170, %171 : vector<8x1xf32>
    %173 = vector.extract_strided_slice %128 {offsets = [0, 32], sizes = [8, 4], strides = [1, 1]} : vector<8x48xf32> to vector<8x4xf32>
    %cst_76 = arith.constant dense<0xFF800000> : vector<8xf32>
    %174 = vector.multi_reduction <maximumf>, %173, %cst_76 [1] : vector<8x4xf32> to vector<8xf32>
    %175 = vector.shape_cast %174 : vector<8xf32> to vector<8x1xf32>
    %176 = vector.broadcast %175 : vector<8x1xf32> to vector<8x4xf32>
    %177 = arith.subf %173, %176 : vector<8x4xf32>
    %178 = math.exp %177 : vector<8x4xf32>
    %cst_77 = arith.constant dense<0.000000e+00> : vector<8xf32>
    %179 = vector.multi_reduction <add>, %178, %cst_77 [1] : vector<8x4xf32> to vector<8xf32>
    %180 = vector.shape_cast %179 : vector<8xf32> to vector<8x1xf32>
    %181 = vector.broadcast %180 : vector<8x1xf32> to vector<8x4xf32>
    %182 = arith.divf %178, %181 : vector<8x4xf32>
    %cst_78 = arith.constant 0.000000e+00 : f32
    %183 = vector.broadcast %cst_78 : f32 to vector<8x80xf32>
    %184 = vector.extract_strided_slice %128 {offsets = [0, 0], sizes = [8, 1], strides = [1, 1]} : vector<8x48xf32> to vector<8x1xf32>
    %185 = arith.addf %148, %184 : vector<8x1xf32>
    %cst_79 = arith.constant 5.000000e-01 : f32
    %186 = vector.broadcast %cst_79 : f32 to vector<8x1xf32>
    %187 = arith.subf %185, %186 : vector<8x1xf32>
    %188 = vector.extract_strided_slice %128 {offsets = [0, 1], sizes = [8, 1], strides = [1, 1]} : vector<8x48xf32> to vector<8x1xf32>
    %189 = arith.addf %151, %188 : vector<8x1xf32>
    %cst_80 = arith.constant 5.000000e-01 : f32
    %190 = vector.broadcast %cst_80 : f32 to vector<8x1xf32>
    %191 = arith.subf %189, %190 : vector<8x1xf32>
    %192 = math.floor %187 : vector<8x1xf32>
    %193 = math.floor %191 : vector<8x1xf32>
    %194 = arith.subf %187, %192 : vector<8x1xf32>
    %195 = arith.subf %191, %193 : vector<8x1xf32>
    %196 = vector.broadcast %145 : vector<1x80xf32> to vector<8x80xf32>
    %197 = vector.broadcast %192 : vector<8x1xf32> to vector<8x80xf32>
    %198 = arith.cmpf oeq, %196, %197 : vector<8x80xf32>
    %cst_81 = arith.constant 1.000000e+00 : f32
    %cst_82 = arith.constant 0.000000e+00 : f32
    %199 = vector.broadcast %cst_81 : f32 to vector<8x80xf32>
    %200 = vector.broadcast %cst_82 : f32 to vector<8x80xf32>
    %201 = arith.select %198, %199, %200 : vector<8x80xi1>, vector<8x80xf32>
    %cst_83 = arith.constant 1.000000e+00 : f32
    %202 = vector.broadcast %cst_83 : f32 to vector<8x1xf32>
    %203 = arith.subf %202, %194 : vector<8x1xf32>
    %204 = vector.broadcast %203 : vector<8x1xf32> to vector<8x80xf32>
    %205 = arith.mulf %201, %204 : vector<8x80xf32>
    %cst_84 = arith.constant 1.000000e+00 : f32
    %206 = vector.broadcast %cst_84 : f32 to vector<8x1xf32>
    %207 = arith.addf %192, %206 : vector<8x1xf32>
    %208 = vector.broadcast %145 : vector<1x80xf32> to vector<8x80xf32>
    %209 = vector.broadcast %207 : vector<8x1xf32> to vector<8x80xf32>
    %210 = arith.cmpf oeq, %208, %209 : vector<8x80xf32>
    %cst_85 = arith.constant 1.000000e+00 : f32
    %cst_86 = arith.constant 0.000000e+00 : f32
    %211 = vector.broadcast %cst_85 : f32 to vector<8x80xf32>
    %212 = vector.broadcast %cst_86 : f32 to vector<8x80xf32>
    %213 = arith.select %210, %211, %212 : vector<8x80xi1>, vector<8x80xf32>
    %214 = vector.broadcast %194 : vector<8x1xf32> to vector<8x80xf32>
    %215 = arith.mulf %213, %214 : vector<8x80xf32>
    %216 = arith.addf %205, %215 : vector<8x80xf32>
    %217 = vector.broadcast %140 : vector<1x80xf32> to vector<8x80xf32>
    %218 = vector.broadcast %193 : vector<8x1xf32> to vector<8x80xf32>
    %219 = arith.cmpf oeq, %217, %218 : vector<8x80xf32>
    %cst_87 = arith.constant 1.000000e+00 : f32
    %cst_88 = arith.constant 0.000000e+00 : f32
    %220 = vector.broadcast %cst_87 : f32 to vector<8x80xf32>
    %221 = vector.broadcast %cst_88 : f32 to vector<8x80xf32>
    %222 = arith.select %219, %220, %221 : vector<8x80xi1>, vector<8x80xf32>
    %cst_89 = arith.constant 1.000000e+00 : f32
    %223 = vector.broadcast %cst_89 : f32 to vector<8x1xf32>
    %224 = arith.subf %223, %195 : vector<8x1xf32>
    %225 = vector.broadcast %224 : vector<8x1xf32> to vector<8x80xf32>
    %226 = arith.mulf %222, %225 : vector<8x80xf32>
    %cst_90 = arith.constant 1.000000e+00 : f32
    %227 = vector.broadcast %cst_90 : f32 to vector<8x1xf32>
    %228 = arith.addf %193, %227 : vector<8x1xf32>
    %229 = vector.broadcast %140 : vector<1x80xf32> to vector<8x80xf32>
    %230 = vector.broadcast %228 : vector<8x1xf32> to vector<8x80xf32>
    %231 = arith.cmpf oeq, %229, %230 : vector<8x80xf32>
    %cst_91 = arith.constant 1.000000e+00 : f32
    %cst_92 = arith.constant 0.000000e+00 : f32
    %232 = vector.broadcast %cst_91 : f32 to vector<8x80xf32>
    %233 = vector.broadcast %cst_92 : f32 to vector<8x80xf32>
    %234 = arith.select %231, %232, %233 : vector<8x80xi1>, vector<8x80xf32>
    %235 = vector.broadcast %195 : vector<8x1xf32> to vector<8x80xf32>
    %236 = arith.mulf %234, %235 : vector<8x80xf32>
    %237 = arith.addf %226, %236 : vector<8x80xf32>
    %238 = vector.extract_strided_slice %182 {offsets = [0, 0], sizes = [8, 1], strides = [1, 1]} : vector<8x4xf32> to vector<8x1xf32>
    %239 = vector.broadcast %238 : vector<8x1xf32> to vector<8x80xf32>
    %240 = arith.mulf %239, %216 : vector<8x80xf32>
    %241 = arith.mulf %240, %237 : vector<8x80xf32>
    %242 = arith.addf %183, %241 : vector<8x80xf32>
    %243 = vector.extract_strided_slice %128 {offsets = [0, 2], sizes = [8, 1], strides = [1, 1]} : vector<8x48xf32> to vector<8x1xf32>
    %244 = arith.addf %148, %243 : vector<8x1xf32>
    %cst_93 = arith.constant 5.000000e-01 : f32
    %245 = vector.broadcast %cst_93 : f32 to vector<8x1xf32>
    %246 = arith.subf %244, %245 : vector<8x1xf32>
    %247 = vector.extract_strided_slice %128 {offsets = [0, 3], sizes = [8, 1], strides = [1, 1]} : vector<8x48xf32> to vector<8x1xf32>
    %248 = arith.addf %151, %247 : vector<8x1xf32>
    %cst_94 = arith.constant 5.000000e-01 : f32
    %249 = vector.broadcast %cst_94 : f32 to vector<8x1xf32>
    %250 = arith.subf %248, %249 : vector<8x1xf32>
    %251 = math.floor %246 : vector<8x1xf32>
    %252 = math.floor %250 : vector<8x1xf32>
    %253 = arith.subf %246, %251 : vector<8x1xf32>
    %254 = arith.subf %250, %252 : vector<8x1xf32>
    %255 = vector.broadcast %145 : vector<1x80xf32> to vector<8x80xf32>
    %256 = vector.broadcast %251 : vector<8x1xf32> to vector<8x80xf32>
    %257 = arith.cmpf oeq, %255, %256 : vector<8x80xf32>
    %cst_95 = arith.constant 1.000000e+00 : f32
    %cst_96 = arith.constant 0.000000e+00 : f32
    %258 = vector.broadcast %cst_95 : f32 to vector<8x80xf32>
    %259 = vector.broadcast %cst_96 : f32 to vector<8x80xf32>
    %260 = arith.select %257, %258, %259 : vector<8x80xi1>, vector<8x80xf32>
    %cst_97 = arith.constant 1.000000e+00 : f32
    %261 = vector.broadcast %cst_97 : f32 to vector<8x1xf32>
    %262 = arith.subf %261, %253 : vector<8x1xf32>
    %263 = vector.broadcast %262 : vector<8x1xf32> to vector<8x80xf32>
    %264 = arith.mulf %260, %263 : vector<8x80xf32>
    %cst_98 = arith.constant 1.000000e+00 : f32
    %265 = vector.broadcast %cst_98 : f32 to vector<8x1xf32>
    %266 = arith.addf %251, %265 : vector<8x1xf32>
    %267 = vector.broadcast %145 : vector<1x80xf32> to vector<8x80xf32>
    %268 = vector.broadcast %266 : vector<8x1xf32> to vector<8x80xf32>
    %269 = arith.cmpf oeq, %267, %268 : vector<8x80xf32>
    %cst_99 = arith.constant 1.000000e+00 : f32
    %cst_100 = arith.constant 0.000000e+00 : f32
    %270 = vector.broadcast %cst_99 : f32 to vector<8x80xf32>
    %271 = vector.broadcast %cst_100 : f32 to vector<8x80xf32>
    %272 = arith.select %269, %270, %271 : vector<8x80xi1>, vector<8x80xf32>
    %273 = vector.broadcast %253 : vector<8x1xf32> to vector<8x80xf32>
    %274 = arith.mulf %272, %273 : vector<8x80xf32>
    %275 = arith.addf %264, %274 : vector<8x80xf32>
    %276 = vector.broadcast %140 : vector<1x80xf32> to vector<8x80xf32>
    %277 = vector.broadcast %252 : vector<8x1xf32> to vector<8x80xf32>
    %278 = arith.cmpf oeq, %276, %277 : vector<8x80xf32>
    %cst_101 = arith.constant 1.000000e+00 : f32
    %cst_102 = arith.constant 0.000000e+00 : f32
    %279 = vector.broadcast %cst_101 : f32 to vector<8x80xf32>
    %280 = vector.broadcast %cst_102 : f32 to vector<8x80xf32>
    %281 = arith.select %278, %279, %280 : vector<8x80xi1>, vector<8x80xf32>
    %cst_103 = arith.constant 1.000000e+00 : f32
    %282 = vector.broadcast %cst_103 : f32 to vector<8x1xf32>
    %283 = arith.subf %282, %254 : vector<8x1xf32>
    %284 = vector.broadcast %283 : vector<8x1xf32> to vector<8x80xf32>
    %285 = arith.mulf %281, %284 : vector<8x80xf32>
    %cst_104 = arith.constant 1.000000e+00 : f32
    %286 = vector.broadcast %cst_104 : f32 to vector<8x1xf32>
    %287 = arith.addf %252, %286 : vector<8x1xf32>
    %288 = vector.broadcast %140 : vector<1x80xf32> to vector<8x80xf32>
    %289 = vector.broadcast %287 : vector<8x1xf32> to vector<8x80xf32>
    %290 = arith.cmpf oeq, %288, %289 : vector<8x80xf32>
    %cst_105 = arith.constant 1.000000e+00 : f32
    %cst_106 = arith.constant 0.000000e+00 : f32
    %291 = vector.broadcast %cst_105 : f32 to vector<8x80xf32>
    %292 = vector.broadcast %cst_106 : f32 to vector<8x80xf32>
    %293 = arith.select %290, %291, %292 : vector<8x80xi1>, vector<8x80xf32>
    %294 = vector.broadcast %254 : vector<8x1xf32> to vector<8x80xf32>
    %295 = arith.mulf %293, %294 : vector<8x80xf32>
    %296 = arith.addf %285, %295 : vector<8x80xf32>
    %297 = vector.extract_strided_slice %182 {offsets = [0, 1], sizes = [8, 1], strides = [1, 1]} : vector<8x4xf32> to vector<8x1xf32>
    %298 = vector.broadcast %297 : vector<8x1xf32> to vector<8x80xf32>
    %299 = arith.mulf %298, %275 : vector<8x80xf32>
    %300 = arith.mulf %299, %296 : vector<8x80xf32>
    %301 = arith.addf %242, %300 : vector<8x80xf32>
    %302 = vector.extract_strided_slice %128 {offsets = [0, 4], sizes = [8, 1], strides = [1, 1]} : vector<8x48xf32> to vector<8x1xf32>
    %303 = arith.addf %169, %302 : vector<8x1xf32>
    %cst_107 = arith.constant 5.000000e-01 : f32
    %304 = vector.broadcast %cst_107 : f32 to vector<8x1xf32>
    %305 = arith.subf %303, %304 : vector<8x1xf32>
    %306 = vector.extract_strided_slice %128 {offsets = [0, 5], sizes = [8, 1], strides = [1, 1]} : vector<8x48xf32> to vector<8x1xf32>
    %307 = arith.addf %172, %306 : vector<8x1xf32>
    %cst_108 = arith.constant 5.000000e-01 : f32
    %308 = vector.broadcast %cst_108 : f32 to vector<8x1xf32>
    %309 = arith.subf %307, %308 : vector<8x1xf32>
    %310 = math.floor %305 : vector<8x1xf32>
    %311 = math.floor %309 : vector<8x1xf32>
    %312 = arith.subf %305, %310 : vector<8x1xf32>
    %313 = arith.subf %309, %311 : vector<8x1xf32>
    %314 = vector.broadcast %166 : vector<1x80xf32> to vector<8x80xf32>
    %315 = vector.broadcast %310 : vector<8x1xf32> to vector<8x80xf32>
    %316 = arith.cmpf oeq, %314, %315 : vector<8x80xf32>
    %cst_109 = arith.constant 1.000000e+00 : f32
    %cst_110 = arith.constant 0.000000e+00 : f32
    %317 = vector.broadcast %cst_109 : f32 to vector<8x80xf32>
    %318 = vector.broadcast %cst_110 : f32 to vector<8x80xf32>
    %319 = arith.select %316, %317, %318 : vector<8x80xi1>, vector<8x80xf32>
    %cst_111 = arith.constant 1.000000e+00 : f32
    %320 = vector.broadcast %cst_111 : f32 to vector<8x1xf32>
    %321 = arith.subf %320, %312 : vector<8x1xf32>
    %322 = vector.broadcast %321 : vector<8x1xf32> to vector<8x80xf32>
    %323 = arith.mulf %319, %322 : vector<8x80xf32>
    %cst_112 = arith.constant 1.000000e+00 : f32
    %324 = vector.broadcast %cst_112 : f32 to vector<8x1xf32>
    %325 = arith.addf %310, %324 : vector<8x1xf32>
    %326 = vector.broadcast %166 : vector<1x80xf32> to vector<8x80xf32>
    %327 = vector.broadcast %325 : vector<8x1xf32> to vector<8x80xf32>
    %328 = arith.cmpf oeq, %326, %327 : vector<8x80xf32>
    %cst_113 = arith.constant 1.000000e+00 : f32
    %cst_114 = arith.constant 0.000000e+00 : f32
    %329 = vector.broadcast %cst_113 : f32 to vector<8x80xf32>
    %330 = vector.broadcast %cst_114 : f32 to vector<8x80xf32>
    %331 = arith.select %328, %329, %330 : vector<8x80xi1>, vector<8x80xf32>
    %332 = vector.broadcast %312 : vector<8x1xf32> to vector<8x80xf32>
    %333 = arith.mulf %331, %332 : vector<8x80xf32>
    %334 = arith.addf %323, %333 : vector<8x80xf32>
    %335 = vector.broadcast %161 : vector<1x80xf32> to vector<8x80xf32>
    %336 = vector.broadcast %311 : vector<8x1xf32> to vector<8x80xf32>
    %337 = arith.cmpf oeq, %335, %336 : vector<8x80xf32>
    %cst_115 = arith.constant 1.000000e+00 : f32
    %cst_116 = arith.constant 0.000000e+00 : f32
    %338 = vector.broadcast %cst_115 : f32 to vector<8x80xf32>
    %339 = vector.broadcast %cst_116 : f32 to vector<8x80xf32>
    %340 = arith.select %337, %338, %339 : vector<8x80xi1>, vector<8x80xf32>
    %cst_117 = arith.constant 1.000000e+00 : f32
    %341 = vector.broadcast %cst_117 : f32 to vector<8x1xf32>
    %342 = arith.subf %341, %313 : vector<8x1xf32>
    %343 = vector.broadcast %342 : vector<8x1xf32> to vector<8x80xf32>
    %344 = arith.mulf %340, %343 : vector<8x80xf32>
    %cst_118 = arith.constant 1.000000e+00 : f32
    %345 = vector.broadcast %cst_118 : f32 to vector<8x1xf32>
    %346 = arith.addf %311, %345 : vector<8x1xf32>
    %347 = vector.broadcast %161 : vector<1x80xf32> to vector<8x80xf32>
    %348 = vector.broadcast %346 : vector<8x1xf32> to vector<8x80xf32>
    %349 = arith.cmpf oeq, %347, %348 : vector<8x80xf32>
    %cst_119 = arith.constant 1.000000e+00 : f32
    %cst_120 = arith.constant 0.000000e+00 : f32
    %350 = vector.broadcast %cst_119 : f32 to vector<8x80xf32>
    %351 = vector.broadcast %cst_120 : f32 to vector<8x80xf32>
    %352 = arith.select %349, %350, %351 : vector<8x80xi1>, vector<8x80xf32>
    %353 = vector.broadcast %313 : vector<8x1xf32> to vector<8x80xf32>
    %354 = arith.mulf %352, %353 : vector<8x80xf32>
    %355 = arith.addf %344, %354 : vector<8x80xf32>
    %356 = vector.extract_strided_slice %182 {offsets = [0, 2], sizes = [8, 1], strides = [1, 1]} : vector<8x4xf32> to vector<8x1xf32>
    %357 = vector.broadcast %356 : vector<8x1xf32> to vector<8x80xf32>
    %358 = arith.mulf %357, %334 : vector<8x80xf32>
    %359 = arith.mulf %358, %355 : vector<8x80xf32>
    %360 = arith.addf %301, %359 : vector<8x80xf32>
    %361 = vector.extract_strided_slice %128 {offsets = [0, 6], sizes = [8, 1], strides = [1, 1]} : vector<8x48xf32> to vector<8x1xf32>
    %362 = arith.addf %169, %361 : vector<8x1xf32>
    %cst_121 = arith.constant 5.000000e-01 : f32
    %363 = vector.broadcast %cst_121 : f32 to vector<8x1xf32>
    %364 = arith.subf %362, %363 : vector<8x1xf32>
    %365 = vector.extract_strided_slice %128 {offsets = [0, 7], sizes = [8, 1], strides = [1, 1]} : vector<8x48xf32> to vector<8x1xf32>
    %366 = arith.addf %172, %365 : vector<8x1xf32>
    %cst_122 = arith.constant 5.000000e-01 : f32
    %367 = vector.broadcast %cst_122 : f32 to vector<8x1xf32>
    %368 = arith.subf %366, %367 : vector<8x1xf32>
    %369 = math.floor %364 : vector<8x1xf32>
    %370 = math.floor %368 : vector<8x1xf32>
    %371 = arith.subf %364, %369 : vector<8x1xf32>
    %372 = arith.subf %368, %370 : vector<8x1xf32>
    %373 = vector.broadcast %166 : vector<1x80xf32> to vector<8x80xf32>
    %374 = vector.broadcast %369 : vector<8x1xf32> to vector<8x80xf32>
    %375 = arith.cmpf oeq, %373, %374 : vector<8x80xf32>
    %cst_123 = arith.constant 1.000000e+00 : f32
    %cst_124 = arith.constant 0.000000e+00 : f32
    %376 = vector.broadcast %cst_123 : f32 to vector<8x80xf32>
    %377 = vector.broadcast %cst_124 : f32 to vector<8x80xf32>
    %378 = arith.select %375, %376, %377 : vector<8x80xi1>, vector<8x80xf32>
    %cst_125 = arith.constant 1.000000e+00 : f32
    %379 = vector.broadcast %cst_125 : f32 to vector<8x1xf32>
    %380 = arith.subf %379, %371 : vector<8x1xf32>
    %381 = vector.broadcast %380 : vector<8x1xf32> to vector<8x80xf32>
    %382 = arith.mulf %378, %381 : vector<8x80xf32>
    %cst_126 = arith.constant 1.000000e+00 : f32
    %383 = vector.broadcast %cst_126 : f32 to vector<8x1xf32>
    %384 = arith.addf %369, %383 : vector<8x1xf32>
    %385 = vector.broadcast %166 : vector<1x80xf32> to vector<8x80xf32>
    %386 = vector.broadcast %384 : vector<8x1xf32> to vector<8x80xf32>
    %387 = arith.cmpf oeq, %385, %386 : vector<8x80xf32>
    %cst_127 = arith.constant 1.000000e+00 : f32
    %cst_128 = arith.constant 0.000000e+00 : f32
    %388 = vector.broadcast %cst_127 : f32 to vector<8x80xf32>
    %389 = vector.broadcast %cst_128 : f32 to vector<8x80xf32>
    %390 = arith.select %387, %388, %389 : vector<8x80xi1>, vector<8x80xf32>
    %391 = vector.broadcast %371 : vector<8x1xf32> to vector<8x80xf32>
    %392 = arith.mulf %390, %391 : vector<8x80xf32>
    %393 = arith.addf %382, %392 : vector<8x80xf32>
    %394 = vector.broadcast %161 : vector<1x80xf32> to vector<8x80xf32>
    %395 = vector.broadcast %370 : vector<8x1xf32> to vector<8x80xf32>
    %396 = arith.cmpf oeq, %394, %395 : vector<8x80xf32>
    %cst_129 = arith.constant 1.000000e+00 : f32
    %cst_130 = arith.constant 0.000000e+00 : f32
    %397 = vector.broadcast %cst_129 : f32 to vector<8x80xf32>
    %398 = vector.broadcast %cst_130 : f32 to vector<8x80xf32>
    %399 = arith.select %396, %397, %398 : vector<8x80xi1>, vector<8x80xf32>
    %cst_131 = arith.constant 1.000000e+00 : f32
    %400 = vector.broadcast %cst_131 : f32 to vector<8x1xf32>
    %401 = arith.subf %400, %372 : vector<8x1xf32>
    %402 = vector.broadcast %401 : vector<8x1xf32> to vector<8x80xf32>
    %403 = arith.mulf %399, %402 : vector<8x80xf32>
    %cst_132 = arith.constant 1.000000e+00 : f32
    %404 = vector.broadcast %cst_132 : f32 to vector<8x1xf32>
    %405 = arith.addf %370, %404 : vector<8x1xf32>
    %406 = vector.broadcast %161 : vector<1x80xf32> to vector<8x80xf32>
    %407 = vector.broadcast %405 : vector<8x1xf32> to vector<8x80xf32>
    %408 = arith.cmpf oeq, %406, %407 : vector<8x80xf32>
    %cst_133 = arith.constant 1.000000e+00 : f32
    %cst_134 = arith.constant 0.000000e+00 : f32
    %409 = vector.broadcast %cst_133 : f32 to vector<8x80xf32>
    %410 = vector.broadcast %cst_134 : f32 to vector<8x80xf32>
    %411 = arith.select %408, %409, %410 : vector<8x80xi1>, vector<8x80xf32>
    %412 = vector.broadcast %372 : vector<8x1xf32> to vector<8x80xf32>
    %413 = arith.mulf %411, %412 : vector<8x80xf32>
    %414 = arith.addf %403, %413 : vector<8x80xf32>
    %415 = vector.extract_strided_slice %182 {offsets = [0, 3], sizes = [8, 1], strides = [1, 1]} : vector<8x4xf32> to vector<8x1xf32>
    %416 = vector.broadcast %415 : vector<8x1xf32> to vector<8x80xf32>
    %417 = arith.mulf %416, %393 : vector<8x80xf32>
    %418 = arith.mulf %417, %414 : vector<8x80xf32>
    %419 = arith.addf %360, %418 : vector<8x80xf32>
    %420 = vector.extract_strided_slice %123 {offsets = [0, 0], sizes = [80, 8], strides = [1, 1]} : vector<80x32xf32> to vector<80x8xf32>
    %cst_135 = arith.constant dense<0.000000e+00> : vector<8x8xf32>
    %421 = tpu.matmul %419, %420, %cst_135 {dimension_numbers = #tpu.dot_dimension_numbers<[1], [0], [0], [1], [0, 0, 1, 1], [], []>} : vector<8x80xf32>, vector<80x8xf32>, vector<8x8xf32> -> vector<8x8xf32>
    %422 = vector.extract_strided_slice %128 {offsets = [0, 36], sizes = [8, 4], strides = [1, 1]} : vector<8x48xf32> to vector<8x4xf32>
    %cst_136 = arith.constant dense<0xFF800000> : vector<8xf32>
    %423 = vector.multi_reduction <maximumf>, %422, %cst_136 [1] : vector<8x4xf32> to vector<8xf32>
    %424 = vector.shape_cast %423 : vector<8xf32> to vector<8x1xf32>
    %425 = vector.broadcast %424 : vector<8x1xf32> to vector<8x4xf32>
    %426 = arith.subf %422, %425 : vector<8x4xf32>
    %427 = math.exp %426 : vector<8x4xf32>
    %cst_137 = arith.constant dense<0.000000e+00> : vector<8xf32>
    %428 = vector.multi_reduction <add>, %427, %cst_137 [1] : vector<8x4xf32> to vector<8xf32>
    %429 = vector.shape_cast %428 : vector<8xf32> to vector<8x1xf32>
    %430 = vector.broadcast %429 : vector<8x1xf32> to vector<8x4xf32>
    %431 = arith.divf %427, %430 : vector<8x4xf32>
    %cst_138 = arith.constant 0.000000e+00 : f32
    %432 = vector.broadcast %cst_138 : f32 to vector<8x80xf32>
    %433 = vector.extract_strided_slice %128 {offsets = [0, 8], sizes = [8, 1], strides = [1, 1]} : vector<8x48xf32> to vector<8x1xf32>
    %434 = arith.addf %148, %433 : vector<8x1xf32>
    %cst_139 = arith.constant 5.000000e-01 : f32
    %435 = vector.broadcast %cst_139 : f32 to vector<8x1xf32>
    %436 = arith.subf %434, %435 : vector<8x1xf32>
    %437 = vector.extract_strided_slice %128 {offsets = [0, 9], sizes = [8, 1], strides = [1, 1]} : vector<8x48xf32> to vector<8x1xf32>
    %438 = arith.addf %151, %437 : vector<8x1xf32>
    %cst_140 = arith.constant 5.000000e-01 : f32
    %439 = vector.broadcast %cst_140 : f32 to vector<8x1xf32>
    %440 = arith.subf %438, %439 : vector<8x1xf32>
    %441 = math.floor %436 : vector<8x1xf32>
    %442 = math.floor %440 : vector<8x1xf32>
    %443 = arith.subf %436, %441 : vector<8x1xf32>
    %444 = arith.subf %440, %442 : vector<8x1xf32>
    %445 = vector.broadcast %145 : vector<1x80xf32> to vector<8x80xf32>
    %446 = vector.broadcast %441 : vector<8x1xf32> to vector<8x80xf32>
    %447 = arith.cmpf oeq, %445, %446 : vector<8x80xf32>
    %cst_141 = arith.constant 1.000000e+00 : f32
    %cst_142 = arith.constant 0.000000e+00 : f32
    %448 = vector.broadcast %cst_141 : f32 to vector<8x80xf32>
    %449 = vector.broadcast %cst_142 : f32 to vector<8x80xf32>
    %450 = arith.select %447, %448, %449 : vector<8x80xi1>, vector<8x80xf32>
    %cst_143 = arith.constant 1.000000e+00 : f32
    %451 = vector.broadcast %cst_143 : f32 to vector<8x1xf32>
    %452 = arith.subf %451, %443 : vector<8x1xf32>
    %453 = vector.broadcast %452 : vector<8x1xf32> to vector<8x80xf32>
    %454 = arith.mulf %450, %453 : vector<8x80xf32>
    %cst_144 = arith.constant 1.000000e+00 : f32
    %455 = vector.broadcast %cst_144 : f32 to vector<8x1xf32>
    %456 = arith.addf %441, %455 : vector<8x1xf32>
    %457 = vector.broadcast %145 : vector<1x80xf32> to vector<8x80xf32>
    %458 = vector.broadcast %456 : vector<8x1xf32> to vector<8x80xf32>
    %459 = arith.cmpf oeq, %457, %458 : vector<8x80xf32>
    %cst_145 = arith.constant 1.000000e+00 : f32
    %cst_146 = arith.constant 0.000000e+00 : f32
    %460 = vector.broadcast %cst_145 : f32 to vector<8x80xf32>
    %461 = vector.broadcast %cst_146 : f32 to vector<8x80xf32>
    %462 = arith.select %459, %460, %461 : vector<8x80xi1>, vector<8x80xf32>
    %463 = vector.broadcast %443 : vector<8x1xf32> to vector<8x80xf32>
    %464 = arith.mulf %462, %463 : vector<8x80xf32>
    %465 = arith.addf %454, %464 : vector<8x80xf32>
    %466 = vector.broadcast %140 : vector<1x80xf32> to vector<8x80xf32>
    %467 = vector.broadcast %442 : vector<8x1xf32> to vector<8x80xf32>
    %468 = arith.cmpf oeq, %466, %467 : vector<8x80xf32>
    %cst_147 = arith.constant 1.000000e+00 : f32
    %cst_148 = arith.constant 0.000000e+00 : f32
    %469 = vector.broadcast %cst_147 : f32 to vector<8x80xf32>
    %470 = vector.broadcast %cst_148 : f32 to vector<8x80xf32>
    %471 = arith.select %468, %469, %470 : vector<8x80xi1>, vector<8x80xf32>
    %cst_149 = arith.constant 1.000000e+00 : f32
    %472 = vector.broadcast %cst_149 : f32 to vector<8x1xf32>
    %473 = arith.subf %472, %444 : vector<8x1xf32>
    %474 = vector.broadcast %473 : vector<8x1xf32> to vector<8x80xf32>
    %475 = arith.mulf %471, %474 : vector<8x80xf32>
    %cst_150 = arith.constant 1.000000e+00 : f32
    %476 = vector.broadcast %cst_150 : f32 to vector<8x1xf32>
    %477 = arith.addf %442, %476 : vector<8x1xf32>
    %478 = vector.broadcast %140 : vector<1x80xf32> to vector<8x80xf32>
    %479 = vector.broadcast %477 : vector<8x1xf32> to vector<8x80xf32>
    %480 = arith.cmpf oeq, %478, %479 : vector<8x80xf32>
    %cst_151 = arith.constant 1.000000e+00 : f32
    %cst_152 = arith.constant 0.000000e+00 : f32
    %481 = vector.broadcast %cst_151 : f32 to vector<8x80xf32>
    %482 = vector.broadcast %cst_152 : f32 to vector<8x80xf32>
    %483 = arith.select %480, %481, %482 : vector<8x80xi1>, vector<8x80xf32>
    %484 = vector.broadcast %444 : vector<8x1xf32> to vector<8x80xf32>
    %485 = arith.mulf %483, %484 : vector<8x80xf32>
    %486 = arith.addf %475, %485 : vector<8x80xf32>
    %487 = vector.extract_strided_slice %431 {offsets = [0, 0], sizes = [8, 1], strides = [1, 1]} : vector<8x4xf32> to vector<8x1xf32>
    %488 = vector.broadcast %487 : vector<8x1xf32> to vector<8x80xf32>
    %489 = arith.mulf %488, %465 : vector<8x80xf32>
    %490 = arith.mulf %489, %486 : vector<8x80xf32>
    %491 = arith.addf %432, %490 : vector<8x80xf32>
    %492 = vector.extract_strided_slice %128 {offsets = [0, 10], sizes = [8, 1], strides = [1, 1]} : vector<8x48xf32> to vector<8x1xf32>
    %493 = arith.addf %148, %492 : vector<8x1xf32>
    %cst_153 = arith.constant 5.000000e-01 : f32
    %494 = vector.broadcast %cst_153 : f32 to vector<8x1xf32>
    %495 = arith.subf %493, %494 : vector<8x1xf32>
    %496 = vector.extract_strided_slice %128 {offsets = [0, 11], sizes = [8, 1], strides = [1, 1]} : vector<8x48xf32> to vector<8x1xf32>
    %497 = arith.addf %151, %496 : vector<8x1xf32>
    %cst_154 = arith.constant 5.000000e-01 : f32
    %498 = vector.broadcast %cst_154 : f32 to vector<8x1xf32>
    %499 = arith.subf %497, %498 : vector<8x1xf32>
    %500 = math.floor %495 : vector<8x1xf32>
    %501 = math.floor %499 : vector<8x1xf32>
    %502 = arith.subf %495, %500 : vector<8x1xf32>
    %503 = arith.subf %499, %501 : vector<8x1xf32>
    %504 = vector.broadcast %145 : vector<1x80xf32> to vector<8x80xf32>
    %505 = vector.broadcast %500 : vector<8x1xf32> to vector<8x80xf32>
    %506 = arith.cmpf oeq, %504, %505 : vector<8x80xf32>
    %cst_155 = arith.constant 1.000000e+00 : f32
    %cst_156 = arith.constant 0.000000e+00 : f32
    %507 = vector.broadcast %cst_155 : f32 to vector<8x80xf32>
    %508 = vector.broadcast %cst_156 : f32 to vector<8x80xf32>
    %509 = arith.select %506, %507, %508 : vector<8x80xi1>, vector<8x80xf32>
    %cst_157 = arith.constant 1.000000e+00 : f32
    %510 = vector.broadcast %cst_157 : f32 to vector<8x1xf32>
    %511 = arith.subf %510, %502 : vector<8x1xf32>
    %512 = vector.broadcast %511 : vector<8x1xf32> to vector<8x80xf32>
    %513 = arith.mulf %509, %512 : vector<8x80xf32>
    %cst_158 = arith.constant 1.000000e+00 : f32
    %514 = vector.broadcast %cst_158 : f32 to vector<8x1xf32>
    %515 = arith.addf %500, %514 : vector<8x1xf32>
    %516 = vector.broadcast %145 : vector<1x80xf32> to vector<8x80xf32>
    %517 = vector.broadcast %515 : vector<8x1xf32> to vector<8x80xf32>
    %518 = arith.cmpf oeq, %516, %517 : vector<8x80xf32>
    %cst_159 = arith.constant 1.000000e+00 : f32
    %cst_160 = arith.constant 0.000000e+00 : f32
    %519 = vector.broadcast %cst_159 : f32 to vector<8x80xf32>
    %520 = vector.broadcast %cst_160 : f32 to vector<8x80xf32>
    %521 = arith.select %518, %519, %520 : vector<8x80xi1>, vector<8x80xf32>
    %522 = vector.broadcast %502 : vector<8x1xf32> to vector<8x80xf32>
    %523 = arith.mulf %521, %522 : vector<8x80xf32>
    %524 = arith.addf %513, %523 : vector<8x80xf32>
    %525 = vector.broadcast %140 : vector<1x80xf32> to vector<8x80xf32>
    %526 = vector.broadcast %501 : vector<8x1xf32> to vector<8x80xf32>
    %527 = arith.cmpf oeq, %525, %526 : vector<8x80xf32>
    %cst_161 = arith.constant 1.000000e+00 : f32
    %cst_162 = arith.constant 0.000000e+00 : f32
    %528 = vector.broadcast %cst_161 : f32 to vector<8x80xf32>
    %529 = vector.broadcast %cst_162 : f32 to vector<8x80xf32>
    %530 = arith.select %527, %528, %529 : vector<8x80xi1>, vector<8x80xf32>
    %cst_163 = arith.constant 1.000000e+00 : f32
    %531 = vector.broadcast %cst_163 : f32 to vector<8x1xf32>
    %532 = arith.subf %531, %503 : vector<8x1xf32>
    %533 = vector.broadcast %532 : vector<8x1xf32> to vector<8x80xf32>
    %534 = arith.mulf %530, %533 : vector<8x80xf32>
    %cst_164 = arith.constant 1.000000e+00 : f32
    %535 = vector.broadcast %cst_164 : f32 to vector<8x1xf32>
    %536 = arith.addf %501, %535 : vector<8x1xf32>
    %537 = vector.broadcast %140 : vector<1x80xf32> to vector<8x80xf32>
    %538 = vector.broadcast %536 : vector<8x1xf32> to vector<8x80xf32>
    %539 = arith.cmpf oeq, %537, %538 : vector<8x80xf32>
    %cst_165 = arith.constant 1.000000e+00 : f32
    %cst_166 = arith.constant 0.000000e+00 : f32
    %540 = vector.broadcast %cst_165 : f32 to vector<8x80xf32>
    %541 = vector.broadcast %cst_166 : f32 to vector<8x80xf32>
    %542 = arith.select %539, %540, %541 : vector<8x80xi1>, vector<8x80xf32>
    %543 = vector.broadcast %503 : vector<8x1xf32> to vector<8x80xf32>
    %544 = arith.mulf %542, %543 : vector<8x80xf32>
    %545 = arith.addf %534, %544 : vector<8x80xf32>
    %546 = vector.extract_strided_slice %431 {offsets = [0, 1], sizes = [8, 1], strides = [1, 1]} : vector<8x4xf32> to vector<8x1xf32>
    %547 = vector.broadcast %546 : vector<8x1xf32> to vector<8x80xf32>
    %548 = arith.mulf %547, %524 : vector<8x80xf32>
    %549 = arith.mulf %548, %545 : vector<8x80xf32>
    %550 = arith.addf %491, %549 : vector<8x80xf32>
    %551 = vector.extract_strided_slice %128 {offsets = [0, 12], sizes = [8, 1], strides = [1, 1]} : vector<8x48xf32> to vector<8x1xf32>
    %552 = arith.addf %169, %551 : vector<8x1xf32>
    %cst_167 = arith.constant 5.000000e-01 : f32
    %553 = vector.broadcast %cst_167 : f32 to vector<8x1xf32>
    %554 = arith.subf %552, %553 : vector<8x1xf32>
    %555 = vector.extract_strided_slice %128 {offsets = [0, 13], sizes = [8, 1], strides = [1, 1]} : vector<8x48xf32> to vector<8x1xf32>
    %556 = arith.addf %172, %555 : vector<8x1xf32>
    %cst_168 = arith.constant 5.000000e-01 : f32
    %557 = vector.broadcast %cst_168 : f32 to vector<8x1xf32>
    %558 = arith.subf %556, %557 : vector<8x1xf32>
    %559 = math.floor %554 : vector<8x1xf32>
    %560 = math.floor %558 : vector<8x1xf32>
    %561 = arith.subf %554, %559 : vector<8x1xf32>
    %562 = arith.subf %558, %560 : vector<8x1xf32>
    %563 = vector.broadcast %166 : vector<1x80xf32> to vector<8x80xf32>
    %564 = vector.broadcast %559 : vector<8x1xf32> to vector<8x80xf32>
    %565 = arith.cmpf oeq, %563, %564 : vector<8x80xf32>
    %cst_169 = arith.constant 1.000000e+00 : f32
    %cst_170 = arith.constant 0.000000e+00 : f32
    %566 = vector.broadcast %cst_169 : f32 to vector<8x80xf32>
    %567 = vector.broadcast %cst_170 : f32 to vector<8x80xf32>
    %568 = arith.select %565, %566, %567 : vector<8x80xi1>, vector<8x80xf32>
    %cst_171 = arith.constant 1.000000e+00 : f32
    %569 = vector.broadcast %cst_171 : f32 to vector<8x1xf32>
    %570 = arith.subf %569, %561 : vector<8x1xf32>
    %571 = vector.broadcast %570 : vector<8x1xf32> to vector<8x80xf32>
    %572 = arith.mulf %568, %571 : vector<8x80xf32>
    %cst_172 = arith.constant 1.000000e+00 : f32
    %573 = vector.broadcast %cst_172 : f32 to vector<8x1xf32>
    %574 = arith.addf %559, %573 : vector<8x1xf32>
    %575 = vector.broadcast %166 : vector<1x80xf32> to vector<8x80xf32>
    %576 = vector.broadcast %574 : vector<8x1xf32> to vector<8x80xf32>
    %577 = arith.cmpf oeq, %575, %576 : vector<8x80xf32>
    %cst_173 = arith.constant 1.000000e+00 : f32
    %cst_174 = arith.constant 0.000000e+00 : f32
    %578 = vector.broadcast %cst_173 : f32 to vector<8x80xf32>
    %579 = vector.broadcast %cst_174 : f32 to vector<8x80xf32>
    %580 = arith.select %577, %578, %579 : vector<8x80xi1>, vector<8x80xf32>
    %581 = vector.broadcast %561 : vector<8x1xf32> to vector<8x80xf32>
    %582 = arith.mulf %580, %581 : vector<8x80xf32>
    %583 = arith.addf %572, %582 : vector<8x80xf32>
    %584 = vector.broadcast %161 : vector<1x80xf32> to vector<8x80xf32>
    %585 = vector.broadcast %560 : vector<8x1xf32> to vector<8x80xf32>
    %586 = arith.cmpf oeq, %584, %585 : vector<8x80xf32>
    %cst_175 = arith.constant 1.000000e+00 : f32
    %cst_176 = arith.constant 0.000000e+00 : f32
    %587 = vector.broadcast %cst_175 : f32 to vector<8x80xf32>
    %588 = vector.broadcast %cst_176 : f32 to vector<8x80xf32>
    %589 = arith.select %586, %587, %588 : vector<8x80xi1>, vector<8x80xf32>
    %cst_177 = arith.constant 1.000000e+00 : f32
    %590 = vector.broadcast %cst_177 : f32 to vector<8x1xf32>
    %591 = arith.subf %590, %562 : vector<8x1xf32>
    %592 = vector.broadcast %591 : vector<8x1xf32> to vector<8x80xf32>
    %593 = arith.mulf %589, %592 : vector<8x80xf32>
    %cst_178 = arith.constant 1.000000e+00 : f32
    %594 = vector.broadcast %cst_178 : f32 to vector<8x1xf32>
    %595 = arith.addf %560, %594 : vector<8x1xf32>
    %596 = vector.broadcast %161 : vector<1x80xf32> to vector<8x80xf32>
    %597 = vector.broadcast %595 : vector<8x1xf32> to vector<8x80xf32>
    %598 = arith.cmpf oeq, %596, %597 : vector<8x80xf32>
    %cst_179 = arith.constant 1.000000e+00 : f32
    %cst_180 = arith.constant 0.000000e+00 : f32
    %599 = vector.broadcast %cst_179 : f32 to vector<8x80xf32>
    %600 = vector.broadcast %cst_180 : f32 to vector<8x80xf32>
    %601 = arith.select %598, %599, %600 : vector<8x80xi1>, vector<8x80xf32>
    %602 = vector.broadcast %562 : vector<8x1xf32> to vector<8x80xf32>
    %603 = arith.mulf %601, %602 : vector<8x80xf32>
    %604 = arith.addf %593, %603 : vector<8x80xf32>
    %605 = vector.extract_strided_slice %431 {offsets = [0, 2], sizes = [8, 1], strides = [1, 1]} : vector<8x4xf32> to vector<8x1xf32>
    %606 = vector.broadcast %605 : vector<8x1xf32> to vector<8x80xf32>
    %607 = arith.mulf %606, %583 : vector<8x80xf32>
    %608 = arith.mulf %607, %604 : vector<8x80xf32>
    %609 = arith.addf %550, %608 : vector<8x80xf32>
    %610 = vector.extract_strided_slice %128 {offsets = [0, 14], sizes = [8, 1], strides = [1, 1]} : vector<8x48xf32> to vector<8x1xf32>
    %611 = arith.addf %169, %610 : vector<8x1xf32>
    %cst_181 = arith.constant 5.000000e-01 : f32
    %612 = vector.broadcast %cst_181 : f32 to vector<8x1xf32>
    %613 = arith.subf %611, %612 : vector<8x1xf32>
    %614 = vector.extract_strided_slice %128 {offsets = [0, 15], sizes = [8, 1], strides = [1, 1]} : vector<8x48xf32> to vector<8x1xf32>
    %615 = arith.addf %172, %614 : vector<8x1xf32>
    %cst_182 = arith.constant 5.000000e-01 : f32
    %616 = vector.broadcast %cst_182 : f32 to vector<8x1xf32>
    %617 = arith.subf %615, %616 : vector<8x1xf32>
    %618 = math.floor %613 : vector<8x1xf32>
    %619 = math.floor %617 : vector<8x1xf32>
    %620 = arith.subf %613, %618 : vector<8x1xf32>
    %621 = arith.subf %617, %619 : vector<8x1xf32>
    %622 = vector.broadcast %166 : vector<1x80xf32> to vector<8x80xf32>
    %623 = vector.broadcast %618 : vector<8x1xf32> to vector<8x80xf32>
    %624 = arith.cmpf oeq, %622, %623 : vector<8x80xf32>
    %cst_183 = arith.constant 1.000000e+00 : f32
    %cst_184 = arith.constant 0.000000e+00 : f32
    %625 = vector.broadcast %cst_183 : f32 to vector<8x80xf32>
    %626 = vector.broadcast %cst_184 : f32 to vector<8x80xf32>
    %627 = arith.select %624, %625, %626 : vector<8x80xi1>, vector<8x80xf32>
    %cst_185 = arith.constant 1.000000e+00 : f32
    %628 = vector.broadcast %cst_185 : f32 to vector<8x1xf32>
    %629 = arith.subf %628, %620 : vector<8x1xf32>
    %630 = vector.broadcast %629 : vector<8x1xf32> to vector<8x80xf32>
    %631 = arith.mulf %627, %630 : vector<8x80xf32>
    %cst_186 = arith.constant 1.000000e+00 : f32
    %632 = vector.broadcast %cst_186 : f32 to vector<8x1xf32>
    %633 = arith.addf %618, %632 : vector<8x1xf32>
    %634 = vector.broadcast %166 : vector<1x80xf32> to vector<8x80xf32>
    %635 = vector.broadcast %633 : vector<8x1xf32> to vector<8x80xf32>
    %636 = arith.cmpf oeq, %634, %635 : vector<8x80xf32>
    %cst_187 = arith.constant 1.000000e+00 : f32
    %cst_188 = arith.constant 0.000000e+00 : f32
    %637 = vector.broadcast %cst_187 : f32 to vector<8x80xf32>
    %638 = vector.broadcast %cst_188 : f32 to vector<8x80xf32>
    %639 = arith.select %636, %637, %638 : vector<8x80xi1>, vector<8x80xf32>
    %640 = vector.broadcast %620 : vector<8x1xf32> to vector<8x80xf32>
    %641 = arith.mulf %639, %640 : vector<8x80xf32>
    %642 = arith.addf %631, %641 : vector<8x80xf32>
    %643 = vector.broadcast %161 : vector<1x80xf32> to vector<8x80xf32>
    %644 = vector.broadcast %619 : vector<8x1xf32> to vector<8x80xf32>
    %645 = arith.cmpf oeq, %643, %644 : vector<8x80xf32>
    %cst_189 = arith.constant 1.000000e+00 : f32
    %cst_190 = arith.constant 0.000000e+00 : f32
    %646 = vector.broadcast %cst_189 : f32 to vector<8x80xf32>
    %647 = vector.broadcast %cst_190 : f32 to vector<8x80xf32>
    %648 = arith.select %645, %646, %647 : vector<8x80xi1>, vector<8x80xf32>
    %cst_191 = arith.constant 1.000000e+00 : f32
    %649 = vector.broadcast %cst_191 : f32 to vector<8x1xf32>
    %650 = arith.subf %649, %621 : vector<8x1xf32>
    %651 = vector.broadcast %650 : vector<8x1xf32> to vector<8x80xf32>
    %652 = arith.mulf %648, %651 : vector<8x80xf32>
    %cst_192 = arith.constant 1.000000e+00 : f32
    %653 = vector.broadcast %cst_192 : f32 to vector<8x1xf32>
    %654 = arith.addf %619, %653 : vector<8x1xf32>
    %655 = vector.broadcast %161 : vector<1x80xf32> to vector<8x80xf32>
    %656 = vector.broadcast %654 : vector<8x1xf32> to vector<8x80xf32>
    %657 = arith.cmpf oeq, %655, %656 : vector<8x80xf32>
    %cst_193 = arith.constant 1.000000e+00 : f32
    %cst_194 = arith.constant 0.000000e+00 : f32
    %658 = vector.broadcast %cst_193 : f32 to vector<8x80xf32>
    %659 = vector.broadcast %cst_194 : f32 to vector<8x80xf32>
    %660 = arith.select %657, %658, %659 : vector<8x80xi1>, vector<8x80xf32>
    %661 = vector.broadcast %621 : vector<8x1xf32> to vector<8x80xf32>
    %662 = arith.mulf %660, %661 : vector<8x80xf32>
    %663 = arith.addf %652, %662 : vector<8x80xf32>
    %664 = vector.extract_strided_slice %431 {offsets = [0, 3], sizes = [8, 1], strides = [1, 1]} : vector<8x4xf32> to vector<8x1xf32>
    %665 = vector.broadcast %664 : vector<8x1xf32> to vector<8x80xf32>
    %666 = arith.mulf %665, %642 : vector<8x80xf32>
    %667 = arith.mulf %666, %663 : vector<8x80xf32>
    %668 = arith.addf %609, %667 : vector<8x80xf32>
    %669 = vector.extract_strided_slice %123 {offsets = [0, 8], sizes = [80, 8], strides = [1, 1]} : vector<80x32xf32> to vector<80x8xf32>
    %cst_195 = arith.constant dense<0.000000e+00> : vector<8x8xf32>
    %670 = tpu.matmul %668, %669, %cst_195 {dimension_numbers = #tpu.dot_dimension_numbers<[1], [0], [0], [1], [0, 0, 1, 1], [], []>} : vector<8x80xf32>, vector<80x8xf32>, vector<8x8xf32> -> vector<8x8xf32>
    %671 = vector.extract_strided_slice %128 {offsets = [0, 40], sizes = [8, 4], strides = [1, 1]} : vector<8x48xf32> to vector<8x4xf32>
    %cst_196 = arith.constant dense<0xFF800000> : vector<8xf32>
    %672 = vector.multi_reduction <maximumf>, %671, %cst_196 [1] : vector<8x4xf32> to vector<8xf32>
    %673 = vector.shape_cast %672 : vector<8xf32> to vector<8x1xf32>
    %674 = vector.broadcast %673 : vector<8x1xf32> to vector<8x4xf32>
    %675 = arith.subf %671, %674 : vector<8x4xf32>
    %676 = math.exp %675 : vector<8x4xf32>
    %cst_197 = arith.constant dense<0.000000e+00> : vector<8xf32>
    %677 = vector.multi_reduction <add>, %676, %cst_197 [1] : vector<8x4xf32> to vector<8xf32>
    %678 = vector.shape_cast %677 : vector<8xf32> to vector<8x1xf32>
    %679 = vector.broadcast %678 : vector<8x1xf32> to vector<8x4xf32>
    %680 = arith.divf %676, %679 : vector<8x4xf32>
    %cst_198 = arith.constant 0.000000e+00 : f32
    %681 = vector.broadcast %cst_198 : f32 to vector<8x80xf32>
    %682 = vector.extract_strided_slice %128 {offsets = [0, 16], sizes = [8, 1], strides = [1, 1]} : vector<8x48xf32> to vector<8x1xf32>
    %683 = arith.addf %148, %682 : vector<8x1xf32>
    %cst_199 = arith.constant 5.000000e-01 : f32
    %684 = vector.broadcast %cst_199 : f32 to vector<8x1xf32>
    %685 = arith.subf %683, %684 : vector<8x1xf32>
    %686 = vector.extract_strided_slice %128 {offsets = [0, 17], sizes = [8, 1], strides = [1, 1]} : vector<8x48xf32> to vector<8x1xf32>
    %687 = arith.addf %151, %686 : vector<8x1xf32>
    %cst_200 = arith.constant 5.000000e-01 : f32
    %688 = vector.broadcast %cst_200 : f32 to vector<8x1xf32>
    %689 = arith.subf %687, %688 : vector<8x1xf32>
    %690 = math.floor %685 : vector<8x1xf32>
    %691 = math.floor %689 : vector<8x1xf32>
    %692 = arith.subf %685, %690 : vector<8x1xf32>
    %693 = arith.subf %689, %691 : vector<8x1xf32>
    %694 = vector.broadcast %145 : vector<1x80xf32> to vector<8x80xf32>
    %695 = vector.broadcast %690 : vector<8x1xf32> to vector<8x80xf32>
    %696 = arith.cmpf oeq, %694, %695 : vector<8x80xf32>
    %cst_201 = arith.constant 1.000000e+00 : f32
    %cst_202 = arith.constant 0.000000e+00 : f32
    %697 = vector.broadcast %cst_201 : f32 to vector<8x80xf32>
    %698 = vector.broadcast %cst_202 : f32 to vector<8x80xf32>
    %699 = arith.select %696, %697, %698 : vector<8x80xi1>, vector<8x80xf32>
    %cst_203 = arith.constant 1.000000e+00 : f32
    %700 = vector.broadcast %cst_203 : f32 to vector<8x1xf32>
    %701 = arith.subf %700, %692 : vector<8x1xf32>
    %702 = vector.broadcast %701 : vector<8x1xf32> to vector<8x80xf32>
    %703 = arith.mulf %699, %702 : vector<8x80xf32>
    %cst_204 = arith.constant 1.000000e+00 : f32
    %704 = vector.broadcast %cst_204 : f32 to vector<8x1xf32>
    %705 = arith.addf %690, %704 : vector<8x1xf32>
    %706 = vector.broadcast %145 : vector<1x80xf32> to vector<8x80xf32>
    %707 = vector.broadcast %705 : vector<8x1xf32> to vector<8x80xf32>
    %708 = arith.cmpf oeq, %706, %707 : vector<8x80xf32>
    %cst_205 = arith.constant 1.000000e+00 : f32
    %cst_206 = arith.constant 0.000000e+00 : f32
    %709 = vector.broadcast %cst_205 : f32 to vector<8x80xf32>
    %710 = vector.broadcast %cst_206 : f32 to vector<8x80xf32>
    %711 = arith.select %708, %709, %710 : vector<8x80xi1>, vector<8x80xf32>
    %712 = vector.broadcast %692 : vector<8x1xf32> to vector<8x80xf32>
    %713 = arith.mulf %711, %712 : vector<8x80xf32>
    %714 = arith.addf %703, %713 : vector<8x80xf32>
    %715 = vector.broadcast %140 : vector<1x80xf32> to vector<8x80xf32>
    %716 = vector.broadcast %691 : vector<8x1xf32> to vector<8x80xf32>
    %717 = arith.cmpf oeq, %715, %716 : vector<8x80xf32>
    %cst_207 = arith.constant 1.000000e+00 : f32
    %cst_208 = arith.constant 0.000000e+00 : f32
    %718 = vector.broadcast %cst_207 : f32 to vector<8x80xf32>
    %719 = vector.broadcast %cst_208 : f32 to vector<8x80xf32>
    %720 = arith.select %717, %718, %719 : vector<8x80xi1>, vector<8x80xf32>
    %cst_209 = arith.constant 1.000000e+00 : f32
    %721 = vector.broadcast %cst_209 : f32 to vector<8x1xf32>
    %722 = arith.subf %721, %693 : vector<8x1xf32>
    %723 = vector.broadcast %722 : vector<8x1xf32> to vector<8x80xf32>
    %724 = arith.mulf %720, %723 : vector<8x80xf32>
    %cst_210 = arith.constant 1.000000e+00 : f32
    %725 = vector.broadcast %cst_210 : f32 to vector<8x1xf32>
    %726 = arith.addf %691, %725 : vector<8x1xf32>
    %727 = vector.broadcast %140 : vector<1x80xf32> to vector<8x80xf32>
    %728 = vector.broadcast %726 : vector<8x1xf32> to vector<8x80xf32>
    %729 = arith.cmpf oeq, %727, %728 : vector<8x80xf32>
    %cst_211 = arith.constant 1.000000e+00 : f32
    %cst_212 = arith.constant 0.000000e+00 : f32
    %730 = vector.broadcast %cst_211 : f32 to vector<8x80xf32>
    %731 = vector.broadcast %cst_212 : f32 to vector<8x80xf32>
    %732 = arith.select %729, %730, %731 : vector<8x80xi1>, vector<8x80xf32>
    %733 = vector.broadcast %693 : vector<8x1xf32> to vector<8x80xf32>
    %734 = arith.mulf %732, %733 : vector<8x80xf32>
    %735 = arith.addf %724, %734 : vector<8x80xf32>
    %736 = vector.extract_strided_slice %680 {offsets = [0, 0], sizes = [8, 1], strides = [1, 1]} : vector<8x4xf32> to vector<8x1xf32>
    %737 = vector.broadcast %736 : vector<8x1xf32> to vector<8x80xf32>
    %738 = arith.mulf %737, %714 : vector<8x80xf32>
    %739 = arith.mulf %738, %735 : vector<8x80xf32>
    %740 = arith.addf %681, %739 : vector<8x80xf32>
    %741 = vector.extract_strided_slice %128 {offsets = [0, 18], sizes = [8, 1], strides = [1, 1]} : vector<8x48xf32> to vector<8x1xf32>
    %742 = arith.addf %148, %741 : vector<8x1xf32>
    %cst_213 = arith.constant 5.000000e-01 : f32
    %743 = vector.broadcast %cst_213 : f32 to vector<8x1xf32>
    %744 = arith.subf %742, %743 : vector<8x1xf32>
    %745 = vector.extract_strided_slice %128 {offsets = [0, 19], sizes = [8, 1], strides = [1, 1]} : vector<8x48xf32> to vector<8x1xf32>
    %746 = arith.addf %151, %745 : vector<8x1xf32>
    %cst_214 = arith.constant 5.000000e-01 : f32
    %747 = vector.broadcast %cst_214 : f32 to vector<8x1xf32>
    %748 = arith.subf %746, %747 : vector<8x1xf32>
    %749 = math.floor %744 : vector<8x1xf32>
    %750 = math.floor %748 : vector<8x1xf32>
    %751 = arith.subf %744, %749 : vector<8x1xf32>
    %752 = arith.subf %748, %750 : vector<8x1xf32>
    %753 = vector.broadcast %145 : vector<1x80xf32> to vector<8x80xf32>
    %754 = vector.broadcast %749 : vector<8x1xf32> to vector<8x80xf32>
    %755 = arith.cmpf oeq, %753, %754 : vector<8x80xf32>
    %cst_215 = arith.constant 1.000000e+00 : f32
    %cst_216 = arith.constant 0.000000e+00 : f32
    %756 = vector.broadcast %cst_215 : f32 to vector<8x80xf32>
    %757 = vector.broadcast %cst_216 : f32 to vector<8x80xf32>
    %758 = arith.select %755, %756, %757 : vector<8x80xi1>, vector<8x80xf32>
    %cst_217 = arith.constant 1.000000e+00 : f32
    %759 = vector.broadcast %cst_217 : f32 to vector<8x1xf32>
    %760 = arith.subf %759, %751 : vector<8x1xf32>
    %761 = vector.broadcast %760 : vector<8x1xf32> to vector<8x80xf32>
    %762 = arith.mulf %758, %761 : vector<8x80xf32>
    %cst_218 = arith.constant 1.000000e+00 : f32
    %763 = vector.broadcast %cst_218 : f32 to vector<8x1xf32>
    %764 = arith.addf %749, %763 : vector<8x1xf32>
    %765 = vector.broadcast %145 : vector<1x80xf32> to vector<8x80xf32>
    %766 = vector.broadcast %764 : vector<8x1xf32> to vector<8x80xf32>
    %767 = arith.cmpf oeq, %765, %766 : vector<8x80xf32>
    %cst_219 = arith.constant 1.000000e+00 : f32
    %cst_220 = arith.constant 0.000000e+00 : f32
    %768 = vector.broadcast %cst_219 : f32 to vector<8x80xf32>
    %769 = vector.broadcast %cst_220 : f32 to vector<8x80xf32>
    %770 = arith.select %767, %768, %769 : vector<8x80xi1>, vector<8x80xf32>
    %771 = vector.broadcast %751 : vector<8x1xf32> to vector<8x80xf32>
    %772 = arith.mulf %770, %771 : vector<8x80xf32>
    %773 = arith.addf %762, %772 : vector<8x80xf32>
    %774 = vector.broadcast %140 : vector<1x80xf32> to vector<8x80xf32>
    %775 = vector.broadcast %750 : vector<8x1xf32> to vector<8x80xf32>
    %776 = arith.cmpf oeq, %774, %775 : vector<8x80xf32>
    %cst_221 = arith.constant 1.000000e+00 : f32
    %cst_222 = arith.constant 0.000000e+00 : f32
    %777 = vector.broadcast %cst_221 : f32 to vector<8x80xf32>
    %778 = vector.broadcast %cst_222 : f32 to vector<8x80xf32>
    %779 = arith.select %776, %777, %778 : vector<8x80xi1>, vector<8x80xf32>
    %cst_223 = arith.constant 1.000000e+00 : f32
    %780 = vector.broadcast %cst_223 : f32 to vector<8x1xf32>
    %781 = arith.subf %780, %752 : vector<8x1xf32>
    %782 = vector.broadcast %781 : vector<8x1xf32> to vector<8x80xf32>
    %783 = arith.mulf %779, %782 : vector<8x80xf32>
    %cst_224 = arith.constant 1.000000e+00 : f32
    %784 = vector.broadcast %cst_224 : f32 to vector<8x1xf32>
    %785 = arith.addf %750, %784 : vector<8x1xf32>
    %786 = vector.broadcast %140 : vector<1x80xf32> to vector<8x80xf32>
    %787 = vector.broadcast %785 : vector<8x1xf32> to vector<8x80xf32>
    %788 = arith.cmpf oeq, %786, %787 : vector<8x80xf32>
    %cst_225 = arith.constant 1.000000e+00 : f32
    %cst_226 = arith.constant 0.000000e+00 : f32
    %789 = vector.broadcast %cst_225 : f32 to vector<8x80xf32>
    %790 = vector.broadcast %cst_226 : f32 to vector<8x80xf32>
    %791 = arith.select %788, %789, %790 : vector<8x80xi1>, vector<8x80xf32>
    %792 = vector.broadcast %752 : vector<8x1xf32> to vector<8x80xf32>
    %793 = arith.mulf %791, %792 : vector<8x80xf32>
    %794 = arith.addf %783, %793 : vector<8x80xf32>
    %795 = vector.extract_strided_slice %680 {offsets = [0, 1], sizes = [8, 1], strides = [1, 1]} : vector<8x4xf32> to vector<8x1xf32>
    %796 = vector.broadcast %795 : vector<8x1xf32> to vector<8x80xf32>
    %797 = arith.mulf %796, %773 : vector<8x80xf32>
    %798 = arith.mulf %797, %794 : vector<8x80xf32>
    %799 = arith.addf %740, %798 : vector<8x80xf32>
    %800 = vector.extract_strided_slice %128 {offsets = [0, 20], sizes = [8, 1], strides = [1, 1]} : vector<8x48xf32> to vector<8x1xf32>
    %801 = arith.addf %169, %800 : vector<8x1xf32>
    %cst_227 = arith.constant 5.000000e-01 : f32
    %802 = vector.broadcast %cst_227 : f32 to vector<8x1xf32>
    %803 = arith.subf %801, %802 : vector<8x1xf32>
    %804 = vector.extract_strided_slice %128 {offsets = [0, 21], sizes = [8, 1], strides = [1, 1]} : vector<8x48xf32> to vector<8x1xf32>
    %805 = arith.addf %172, %804 : vector<8x1xf32>
    %cst_228 = arith.constant 5.000000e-01 : f32
    %806 = vector.broadcast %cst_228 : f32 to vector<8x1xf32>
    %807 = arith.subf %805, %806 : vector<8x1xf32>
    %808 = math.floor %803 : vector<8x1xf32>
    %809 = math.floor %807 : vector<8x1xf32>
    %810 = arith.subf %803, %808 : vector<8x1xf32>
    %811 = arith.subf %807, %809 : vector<8x1xf32>
    %812 = vector.broadcast %166 : vector<1x80xf32> to vector<8x80xf32>
    %813 = vector.broadcast %808 : vector<8x1xf32> to vector<8x80xf32>
    %814 = arith.cmpf oeq, %812, %813 : vector<8x80xf32>
    %cst_229 = arith.constant 1.000000e+00 : f32
    %cst_230 = arith.constant 0.000000e+00 : f32
    %815 = vector.broadcast %cst_229 : f32 to vector<8x80xf32>
    %816 = vector.broadcast %cst_230 : f32 to vector<8x80xf32>
    %817 = arith.select %814, %815, %816 : vector<8x80xi1>, vector<8x80xf32>
    %cst_231 = arith.constant 1.000000e+00 : f32
    %818 = vector.broadcast %cst_231 : f32 to vector<8x1xf32>
    %819 = arith.subf %818, %810 : vector<8x1xf32>
    %820 = vector.broadcast %819 : vector<8x1xf32> to vector<8x80xf32>
    %821 = arith.mulf %817, %820 : vector<8x80xf32>
    %cst_232 = arith.constant 1.000000e+00 : f32
    %822 = vector.broadcast %cst_232 : f32 to vector<8x1xf32>
    %823 = arith.addf %808, %822 : vector<8x1xf32>
    %824 = vector.broadcast %166 : vector<1x80xf32> to vector<8x80xf32>
    %825 = vector.broadcast %823 : vector<8x1xf32> to vector<8x80xf32>
    %826 = arith.cmpf oeq, %824, %825 : vector<8x80xf32>
    %cst_233 = arith.constant 1.000000e+00 : f32
    %cst_234 = arith.constant 0.000000e+00 : f32
    %827 = vector.broadcast %cst_233 : f32 to vector<8x80xf32>
    %828 = vector.broadcast %cst_234 : f32 to vector<8x80xf32>
    %829 = arith.select %826, %827, %828 : vector<8x80xi1>, vector<8x80xf32>
    %830 = vector.broadcast %810 : vector<8x1xf32> to vector<8x80xf32>
    %831 = arith.mulf %829, %830 : vector<8x80xf32>
    %832 = arith.addf %821, %831 : vector<8x80xf32>
    %833 = vector.broadcast %161 : vector<1x80xf32> to vector<8x80xf32>
    %834 = vector.broadcast %809 : vector<8x1xf32> to vector<8x80xf32>
    %835 = arith.cmpf oeq, %833, %834 : vector<8x80xf32>
    %cst_235 = arith.constant 1.000000e+00 : f32
    %cst_236 = arith.constant 0.000000e+00 : f32
    %836 = vector.broadcast %cst_235 : f32 to vector<8x80xf32>
    %837 = vector.broadcast %cst_236 : f32 to vector<8x80xf32>
    %838 = arith.select %835, %836, %837 : vector<8x80xi1>, vector<8x80xf32>
    %cst_237 = arith.constant 1.000000e+00 : f32
    %839 = vector.broadcast %cst_237 : f32 to vector<8x1xf32>
    %840 = arith.subf %839, %811 : vector<8x1xf32>
    %841 = vector.broadcast %840 : vector<8x1xf32> to vector<8x80xf32>
    %842 = arith.mulf %838, %841 : vector<8x80xf32>
    %cst_238 = arith.constant 1.000000e+00 : f32
    %843 = vector.broadcast %cst_238 : f32 to vector<8x1xf32>
    %844 = arith.addf %809, %843 : vector<8x1xf32>
    %845 = vector.broadcast %161 : vector<1x80xf32> to vector<8x80xf32>
    %846 = vector.broadcast %844 : vector<8x1xf32> to vector<8x80xf32>
    %847 = arith.cmpf oeq, %845, %846 : vector<8x80xf32>
    %cst_239 = arith.constant 1.000000e+00 : f32
    %cst_240 = arith.constant 0.000000e+00 : f32
    %848 = vector.broadcast %cst_239 : f32 to vector<8x80xf32>
    %849 = vector.broadcast %cst_240 : f32 to vector<8x80xf32>
    %850 = arith.select %847, %848, %849 : vector<8x80xi1>, vector<8x80xf32>
    %851 = vector.broadcast %811 : vector<8x1xf32> to vector<8x80xf32>
    %852 = arith.mulf %850, %851 : vector<8x80xf32>
    %853 = arith.addf %842, %852 : vector<8x80xf32>
    %854 = vector.extract_strided_slice %680 {offsets = [0, 2], sizes = [8, 1], strides = [1, 1]} : vector<8x4xf32> to vector<8x1xf32>
    %855 = vector.broadcast %854 : vector<8x1xf32> to vector<8x80xf32>
    %856 = arith.mulf %855, %832 : vector<8x80xf32>
    %857 = arith.mulf %856, %853 : vector<8x80xf32>
    %858 = arith.addf %799, %857 : vector<8x80xf32>
    %859 = vector.extract_strided_slice %128 {offsets = [0, 22], sizes = [8, 1], strides = [1, 1]} : vector<8x48xf32> to vector<8x1xf32>
    %860 = arith.addf %169, %859 : vector<8x1xf32>
    %cst_241 = arith.constant 5.000000e-01 : f32
    %861 = vector.broadcast %cst_241 : f32 to vector<8x1xf32>
    %862 = arith.subf %860, %861 : vector<8x1xf32>
    %863 = vector.extract_strided_slice %128 {offsets = [0, 23], sizes = [8, 1], strides = [1, 1]} : vector<8x48xf32> to vector<8x1xf32>
    %864 = arith.addf %172, %863 : vector<8x1xf32>
    %cst_242 = arith.constant 5.000000e-01 : f32
    %865 = vector.broadcast %cst_242 : f32 to vector<8x1xf32>
    %866 = arith.subf %864, %865 : vector<8x1xf32>
    %867 = math.floor %862 : vector<8x1xf32>
    %868 = math.floor %866 : vector<8x1xf32>
    %869 = arith.subf %862, %867 : vector<8x1xf32>
    %870 = arith.subf %866, %868 : vector<8x1xf32>
    %871 = vector.broadcast %166 : vector<1x80xf32> to vector<8x80xf32>
    %872 = vector.broadcast %867 : vector<8x1xf32> to vector<8x80xf32>
    %873 = arith.cmpf oeq, %871, %872 : vector<8x80xf32>
    %cst_243 = arith.constant 1.000000e+00 : f32
    %cst_244 = arith.constant 0.000000e+00 : f32
    %874 = vector.broadcast %cst_243 : f32 to vector<8x80xf32>
    %875 = vector.broadcast %cst_244 : f32 to vector<8x80xf32>
    %876 = arith.select %873, %874, %875 : vector<8x80xi1>, vector<8x80xf32>
    %cst_245 = arith.constant 1.000000e+00 : f32
    %877 = vector.broadcast %cst_245 : f32 to vector<8x1xf32>
    %878 = arith.subf %877, %869 : vector<8x1xf32>
    %879 = vector.broadcast %878 : vector<8x1xf32> to vector<8x80xf32>
    %880 = arith.mulf %876, %879 : vector<8x80xf32>
    %cst_246 = arith.constant 1.000000e+00 : f32
    %881 = vector.broadcast %cst_246 : f32 to vector<8x1xf32>
    %882 = arith.addf %867, %881 : vector<8x1xf32>
    %883 = vector.broadcast %166 : vector<1x80xf32> to vector<8x80xf32>
    %884 = vector.broadcast %882 : vector<8x1xf32> to vector<8x80xf32>
    %885 = arith.cmpf oeq, %883, %884 : vector<8x80xf32>
    %cst_247 = arith.constant 1.000000e+00 : f32
    %cst_248 = arith.constant 0.000000e+00 : f32
    %886 = vector.broadcast %cst_247 : f32 to vector<8x80xf32>
    %887 = vector.broadcast %cst_248 : f32 to vector<8x80xf32>
    %888 = arith.select %885, %886, %887 : vector<8x80xi1>, vector<8x80xf32>
    %889 = vector.broadcast %869 : vector<8x1xf32> to vector<8x80xf32>
    %890 = arith.mulf %888, %889 : vector<8x80xf32>
    %891 = arith.addf %880, %890 : vector<8x80xf32>
    %892 = vector.broadcast %161 : vector<1x80xf32> to vector<8x80xf32>
    %893 = vector.broadcast %868 : vector<8x1xf32> to vector<8x80xf32>
    %894 = arith.cmpf oeq, %892, %893 : vector<8x80xf32>
    %cst_249 = arith.constant 1.000000e+00 : f32
    %cst_250 = arith.constant 0.000000e+00 : f32
    %895 = vector.broadcast %cst_249 : f32 to vector<8x80xf32>
    %896 = vector.broadcast %cst_250 : f32 to vector<8x80xf32>
    %897 = arith.select %894, %895, %896 : vector<8x80xi1>, vector<8x80xf32>
    %cst_251 = arith.constant 1.000000e+00 : f32
    %898 = vector.broadcast %cst_251 : f32 to vector<8x1xf32>
    %899 = arith.subf %898, %870 : vector<8x1xf32>
    %900 = vector.broadcast %899 : vector<8x1xf32> to vector<8x80xf32>
    %901 = arith.mulf %897, %900 : vector<8x80xf32>
    %cst_252 = arith.constant 1.000000e+00 : f32
    %902 = vector.broadcast %cst_252 : f32 to vector<8x1xf32>
    %903 = arith.addf %868, %902 : vector<8x1xf32>
    %904 = vector.broadcast %161 : vector<1x80xf32> to vector<8x80xf32>
    %905 = vector.broadcast %903 : vector<8x1xf32> to vector<8x80xf32>
    %906 = arith.cmpf oeq, %904, %905 : vector<8x80xf32>
    %cst_253 = arith.constant 1.000000e+00 : f32
    %cst_254 = arith.constant 0.000000e+00 : f32
    %907 = vector.broadcast %cst_253 : f32 to vector<8x80xf32>
    %908 = vector.broadcast %cst_254 : f32 to vector<8x80xf32>
    %909 = arith.select %906, %907, %908 : vector<8x80xi1>, vector<8x80xf32>
    %910 = vector.broadcast %870 : vector<8x1xf32> to vector<8x80xf32>
    %911 = arith.mulf %909, %910 : vector<8x80xf32>
    %912 = arith.addf %901, %911 : vector<8x80xf32>
    %913 = vector.extract_strided_slice %680 {offsets = [0, 3], sizes = [8, 1], strides = [1, 1]} : vector<8x4xf32> to vector<8x1xf32>
    %914 = vector.broadcast %913 : vector<8x1xf32> to vector<8x80xf32>
    %915 = arith.mulf %914, %891 : vector<8x80xf32>
    %916 = arith.mulf %915, %912 : vector<8x80xf32>
    %917 = arith.addf %858, %916 : vector<8x80xf32>
    %918 = vector.extract_strided_slice %123 {offsets = [0, 16], sizes = [80, 8], strides = [1, 1]} : vector<80x32xf32> to vector<80x8xf32>
    %cst_255 = arith.constant dense<0.000000e+00> : vector<8x8xf32>
    %919 = tpu.matmul %917, %918, %cst_255 {dimension_numbers = #tpu.dot_dimension_numbers<[1], [0], [0], [1], [0, 0, 1, 1], [], []>} : vector<8x80xf32>, vector<80x8xf32>, vector<8x8xf32> -> vector<8x8xf32>
    %920 = vector.extract_strided_slice %128 {offsets = [0, 44], sizes = [8, 4], strides = [1, 1]} : vector<8x48xf32> to vector<8x4xf32>
    %cst_256 = arith.constant dense<0xFF800000> : vector<8xf32>
    %921 = vector.multi_reduction <maximumf>, %920, %cst_256 [1] : vector<8x4xf32> to vector<8xf32>
    %922 = vector.shape_cast %921 : vector<8xf32> to vector<8x1xf32>
    %923 = vector.broadcast %922 : vector<8x1xf32> to vector<8x4xf32>
    %924 = arith.subf %920, %923 : vector<8x4xf32>
    %925 = math.exp %924 : vector<8x4xf32>
    %cst_257 = arith.constant dense<0.000000e+00> : vector<8xf32>
    %926 = vector.multi_reduction <add>, %925, %cst_257 [1] : vector<8x4xf32> to vector<8xf32>
    %927 = vector.shape_cast %926 : vector<8xf32> to vector<8x1xf32>
    %928 = vector.broadcast %927 : vector<8x1xf32> to vector<8x4xf32>
    %929 = arith.divf %925, %928 : vector<8x4xf32>
    %cst_258 = arith.constant 0.000000e+00 : f32
    %930 = vector.broadcast %cst_258 : f32 to vector<8x80xf32>
    %931 = vector.extract_strided_slice %128 {offsets = [0, 24], sizes = [8, 1], strides = [1, 1]} : vector<8x48xf32> to vector<8x1xf32>
    %932 = arith.addf %148, %931 : vector<8x1xf32>
    %cst_259 = arith.constant 5.000000e-01 : f32
    %933 = vector.broadcast %cst_259 : f32 to vector<8x1xf32>
    %934 = arith.subf %932, %933 : vector<8x1xf32>
    %935 = vector.extract_strided_slice %128 {offsets = [0, 25], sizes = [8, 1], strides = [1, 1]} : vector<8x48xf32> to vector<8x1xf32>
    %936 = arith.addf %151, %935 : vector<8x1xf32>
    %cst_260 = arith.constant 5.000000e-01 : f32
    %937 = vector.broadcast %cst_260 : f32 to vector<8x1xf32>
    %938 = arith.subf %936, %937 : vector<8x1xf32>
    %939 = math.floor %934 : vector<8x1xf32>
    %940 = math.floor %938 : vector<8x1xf32>
    %941 = arith.subf %934, %939 : vector<8x1xf32>
    %942 = arith.subf %938, %940 : vector<8x1xf32>
    %943 = vector.broadcast %145 : vector<1x80xf32> to vector<8x80xf32>
    %944 = vector.broadcast %939 : vector<8x1xf32> to vector<8x80xf32>
    %945 = arith.cmpf oeq, %943, %944 : vector<8x80xf32>
    %cst_261 = arith.constant 1.000000e+00 : f32
    %cst_262 = arith.constant 0.000000e+00 : f32
    %946 = vector.broadcast %cst_261 : f32 to vector<8x80xf32>
    %947 = vector.broadcast %cst_262 : f32 to vector<8x80xf32>
    %948 = arith.select %945, %946, %947 : vector<8x80xi1>, vector<8x80xf32>
    %cst_263 = arith.constant 1.000000e+00 : f32
    %949 = vector.broadcast %cst_263 : f32 to vector<8x1xf32>
    %950 = arith.subf %949, %941 : vector<8x1xf32>
    %951 = vector.broadcast %950 : vector<8x1xf32> to vector<8x80xf32>
    %952 = arith.mulf %948, %951 : vector<8x80xf32>
    %cst_264 = arith.constant 1.000000e+00 : f32
    %953 = vector.broadcast %cst_264 : f32 to vector<8x1xf32>
    %954 = arith.addf %939, %953 : vector<8x1xf32>
    %955 = vector.broadcast %145 : vector<1x80xf32> to vector<8x80xf32>
    %956 = vector.broadcast %954 : vector<8x1xf32> to vector<8x80xf32>
    %957 = arith.cmpf oeq, %955, %956 : vector<8x80xf32>
    %cst_265 = arith.constant 1.000000e+00 : f32
    %cst_266 = arith.constant 0.000000e+00 : f32
    %958 = vector.broadcast %cst_265 : f32 to vector<8x80xf32>
    %959 = vector.broadcast %cst_266 : f32 to vector<8x80xf32>
    %960 = arith.select %957, %958, %959 : vector<8x80xi1>, vector<8x80xf32>
    %961 = vector.broadcast %941 : vector<8x1xf32> to vector<8x80xf32>
    %962 = arith.mulf %960, %961 : vector<8x80xf32>
    %963 = arith.addf %952, %962 : vector<8x80xf32>
    %964 = vector.broadcast %140 : vector<1x80xf32> to vector<8x80xf32>
    %965 = vector.broadcast %940 : vector<8x1xf32> to vector<8x80xf32>
    %966 = arith.cmpf oeq, %964, %965 : vector<8x80xf32>
    %cst_267 = arith.constant 1.000000e+00 : f32
    %cst_268 = arith.constant 0.000000e+00 : f32
    %967 = vector.broadcast %cst_267 : f32 to vector<8x80xf32>
    %968 = vector.broadcast %cst_268 : f32 to vector<8x80xf32>
    %969 = arith.select %966, %967, %968 : vector<8x80xi1>, vector<8x80xf32>
    %cst_269 = arith.constant 1.000000e+00 : f32
    %970 = vector.broadcast %cst_269 : f32 to vector<8x1xf32>
    %971 = arith.subf %970, %942 : vector<8x1xf32>
    %972 = vector.broadcast %971 : vector<8x1xf32> to vector<8x80xf32>
    %973 = arith.mulf %969, %972 : vector<8x80xf32>
    %cst_270 = arith.constant 1.000000e+00 : f32
    %974 = vector.broadcast %cst_270 : f32 to vector<8x1xf32>
    %975 = arith.addf %940, %974 : vector<8x1xf32>
    %976 = vector.broadcast %140 : vector<1x80xf32> to vector<8x80xf32>
    %977 = vector.broadcast %975 : vector<8x1xf32> to vector<8x80xf32>
    %978 = arith.cmpf oeq, %976, %977 : vector<8x80xf32>
    %cst_271 = arith.constant 1.000000e+00 : f32
    %cst_272 = arith.constant 0.000000e+00 : f32
    %979 = vector.broadcast %cst_271 : f32 to vector<8x80xf32>
    %980 = vector.broadcast %cst_272 : f32 to vector<8x80xf32>
    %981 = arith.select %978, %979, %980 : vector<8x80xi1>, vector<8x80xf32>
    %982 = vector.broadcast %942 : vector<8x1xf32> to vector<8x80xf32>
    %983 = arith.mulf %981, %982 : vector<8x80xf32>
    %984 = arith.addf %973, %983 : vector<8x80xf32>
    %985 = vector.extract_strided_slice %929 {offsets = [0, 0], sizes = [8, 1], strides = [1, 1]} : vector<8x4xf32> to vector<8x1xf32>
    %986 = vector.broadcast %985 : vector<8x1xf32> to vector<8x80xf32>
    %987 = arith.mulf %986, %963 : vector<8x80xf32>
    %988 = arith.mulf %987, %984 : vector<8x80xf32>
    %989 = arith.addf %930, %988 : vector<8x80xf32>
    %990 = vector.extract_strided_slice %128 {offsets = [0, 26], sizes = [8, 1], strides = [1, 1]} : vector<8x48xf32> to vector<8x1xf32>
    %991 = arith.addf %148, %990 : vector<8x1xf32>
    %cst_273 = arith.constant 5.000000e-01 : f32
    %992 = vector.broadcast %cst_273 : f32 to vector<8x1xf32>
    %993 = arith.subf %991, %992 : vector<8x1xf32>
    %994 = vector.extract_strided_slice %128 {offsets = [0, 27], sizes = [8, 1], strides = [1, 1]} : vector<8x48xf32> to vector<8x1xf32>
    %995 = arith.addf %151, %994 : vector<8x1xf32>
    %cst_274 = arith.constant 5.000000e-01 : f32
    %996 = vector.broadcast %cst_274 : f32 to vector<8x1xf32>
    %997 = arith.subf %995, %996 : vector<8x1xf32>
    %998 = math.floor %993 : vector<8x1xf32>
    %999 = math.floor %997 : vector<8x1xf32>
    %1000 = arith.subf %993, %998 : vector<8x1xf32>
    %1001 = arith.subf %997, %999 : vector<8x1xf32>
    %1002 = vector.broadcast %145 : vector<1x80xf32> to vector<8x80xf32>
    %1003 = vector.broadcast %998 : vector<8x1xf32> to vector<8x80xf32>
    %1004 = arith.cmpf oeq, %1002, %1003 : vector<8x80xf32>
    %cst_275 = arith.constant 1.000000e+00 : f32
    %cst_276 = arith.constant 0.000000e+00 : f32
    %1005 = vector.broadcast %cst_275 : f32 to vector<8x80xf32>
    %1006 = vector.broadcast %cst_276 : f32 to vector<8x80xf32>
    %1007 = arith.select %1004, %1005, %1006 : vector<8x80xi1>, vector<8x80xf32>
    %cst_277 = arith.constant 1.000000e+00 : f32
    %1008 = vector.broadcast %cst_277 : f32 to vector<8x1xf32>
    %1009 = arith.subf %1008, %1000 : vector<8x1xf32>
    %1010 = vector.broadcast %1009 : vector<8x1xf32> to vector<8x80xf32>
    %1011 = arith.mulf %1007, %1010 : vector<8x80xf32>
    %cst_278 = arith.constant 1.000000e+00 : f32
    %1012 = vector.broadcast %cst_278 : f32 to vector<8x1xf32>
    %1013 = arith.addf %998, %1012 : vector<8x1xf32>
    %1014 = vector.broadcast %145 : vector<1x80xf32> to vector<8x80xf32>
    %1015 = vector.broadcast %1013 : vector<8x1xf32> to vector<8x80xf32>
    %1016 = arith.cmpf oeq, %1014, %1015 : vector<8x80xf32>
    %cst_279 = arith.constant 1.000000e+00 : f32
    %cst_280 = arith.constant 0.000000e+00 : f32
    %1017 = vector.broadcast %cst_279 : f32 to vector<8x80xf32>
    %1018 = vector.broadcast %cst_280 : f32 to vector<8x80xf32>
    %1019 = arith.select %1016, %1017, %1018 : vector<8x80xi1>, vector<8x80xf32>
    %1020 = vector.broadcast %1000 : vector<8x1xf32> to vector<8x80xf32>
    %1021 = arith.mulf %1019, %1020 : vector<8x80xf32>
    %1022 = arith.addf %1011, %1021 : vector<8x80xf32>
    %1023 = vector.broadcast %140 : vector<1x80xf32> to vector<8x80xf32>
    %1024 = vector.broadcast %999 : vector<8x1xf32> to vector<8x80xf32>
    %1025 = arith.cmpf oeq, %1023, %1024 : vector<8x80xf32>
    %cst_281 = arith.constant 1.000000e+00 : f32
    %cst_282 = arith.constant 0.000000e+00 : f32
    %1026 = vector.broadcast %cst_281 : f32 to vector<8x80xf32>
    %1027 = vector.broadcast %cst_282 : f32 to vector<8x80xf32>
    %1028 = arith.select %1025, %1026, %1027 : vector<8x80xi1>, vector<8x80xf32>
    %cst_283 = arith.constant 1.000000e+00 : f32
    %1029 = vector.broadcast %cst_283 : f32 to vector<8x1xf32>
    %1030 = arith.subf %1029, %1001 : vector<8x1xf32>
    %1031 = vector.broadcast %1030 : vector<8x1xf32> to vector<8x80xf32>
    %1032 = arith.mulf %1028, %1031 : vector<8x80xf32>
    %cst_284 = arith.constant 1.000000e+00 : f32
    %1033 = vector.broadcast %cst_284 : f32 to vector<8x1xf32>
    %1034 = arith.addf %999, %1033 : vector<8x1xf32>
    %1035 = vector.broadcast %140 : vector<1x80xf32> to vector<8x80xf32>
    %1036 = vector.broadcast %1034 : vector<8x1xf32> to vector<8x80xf32>
    %1037 = arith.cmpf oeq, %1035, %1036 : vector<8x80xf32>
    %cst_285 = arith.constant 1.000000e+00 : f32
    %cst_286 = arith.constant 0.000000e+00 : f32
    %1038 = vector.broadcast %cst_285 : f32 to vector<8x80xf32>
    %1039 = vector.broadcast %cst_286 : f32 to vector<8x80xf32>
    %1040 = arith.select %1037, %1038, %1039 : vector<8x80xi1>, vector<8x80xf32>
    %1041 = vector.broadcast %1001 : vector<8x1xf32> to vector<8x80xf32>
    %1042 = arith.mulf %1040, %1041 : vector<8x80xf32>
    %1043 = arith.addf %1032, %1042 : vector<8x80xf32>
    %1044 = vector.extract_strided_slice %929 {offsets = [0, 1], sizes = [8, 1], strides = [1, 1]} : vector<8x4xf32> to vector<8x1xf32>
    %1045 = vector.broadcast %1044 : vector<8x1xf32> to vector<8x80xf32>
    %1046 = arith.mulf %1045, %1022 : vector<8x80xf32>
    %1047 = arith.mulf %1046, %1043 : vector<8x80xf32>
    %1048 = arith.addf %989, %1047 : vector<8x80xf32>
    %1049 = vector.extract_strided_slice %128 {offsets = [0, 28], sizes = [8, 1], strides = [1, 1]} : vector<8x48xf32> to vector<8x1xf32>
    %1050 = arith.addf %169, %1049 : vector<8x1xf32>
    %cst_287 = arith.constant 5.000000e-01 : f32
    %1051 = vector.broadcast %cst_287 : f32 to vector<8x1xf32>
    %1052 = arith.subf %1050, %1051 : vector<8x1xf32>
    %1053 = vector.extract_strided_slice %128 {offsets = [0, 29], sizes = [8, 1], strides = [1, 1]} : vector<8x48xf32> to vector<8x1xf32>
    %1054 = arith.addf %172, %1053 : vector<8x1xf32>
    %cst_288 = arith.constant 5.000000e-01 : f32
    %1055 = vector.broadcast %cst_288 : f32 to vector<8x1xf32>
    %1056 = arith.subf %1054, %1055 : vector<8x1xf32>
    %1057 = math.floor %1052 : vector<8x1xf32>
    %1058 = math.floor %1056 : vector<8x1xf32>
    %1059 = arith.subf %1052, %1057 : vector<8x1xf32>
    %1060 = arith.subf %1056, %1058 : vector<8x1xf32>
    %1061 = vector.broadcast %166 : vector<1x80xf32> to vector<8x80xf32>
    %1062 = vector.broadcast %1057 : vector<8x1xf32> to vector<8x80xf32>
    %1063 = arith.cmpf oeq, %1061, %1062 : vector<8x80xf32>
    %cst_289 = arith.constant 1.000000e+00 : f32
    %cst_290 = arith.constant 0.000000e+00 : f32
    %1064 = vector.broadcast %cst_289 : f32 to vector<8x80xf32>
    %1065 = vector.broadcast %cst_290 : f32 to vector<8x80xf32>
    %1066 = arith.select %1063, %1064, %1065 : vector<8x80xi1>, vector<8x80xf32>
    %cst_291 = arith.constant 1.000000e+00 : f32
    %1067 = vector.broadcast %cst_291 : f32 to vector<8x1xf32>
    %1068 = arith.subf %1067, %1059 : vector<8x1xf32>
    %1069 = vector.broadcast %1068 : vector<8x1xf32> to vector<8x80xf32>
    %1070 = arith.mulf %1066, %1069 : vector<8x80xf32>
    %cst_292 = arith.constant 1.000000e+00 : f32
    %1071 = vector.broadcast %cst_292 : f32 to vector<8x1xf32>
    %1072 = arith.addf %1057, %1071 : vector<8x1xf32>
    %1073 = vector.broadcast %166 : vector<1x80xf32> to vector<8x80xf32>
    %1074 = vector.broadcast %1072 : vector<8x1xf32> to vector<8x80xf32>
    %1075 = arith.cmpf oeq, %1073, %1074 : vector<8x80xf32>
    %cst_293 = arith.constant 1.000000e+00 : f32
    %cst_294 = arith.constant 0.000000e+00 : f32
    %1076 = vector.broadcast %cst_293 : f32 to vector<8x80xf32>
    %1077 = vector.broadcast %cst_294 : f32 to vector<8x80xf32>
    %1078 = arith.select %1075, %1076, %1077 : vector<8x80xi1>, vector<8x80xf32>
    %1079 = vector.broadcast %1059 : vector<8x1xf32> to vector<8x80xf32>
    %1080 = arith.mulf %1078, %1079 : vector<8x80xf32>
    %1081 = arith.addf %1070, %1080 : vector<8x80xf32>
    %1082 = vector.broadcast %161 : vector<1x80xf32> to vector<8x80xf32>
    %1083 = vector.broadcast %1058 : vector<8x1xf32> to vector<8x80xf32>
    %1084 = arith.cmpf oeq, %1082, %1083 : vector<8x80xf32>
    %cst_295 = arith.constant 1.000000e+00 : f32
    %cst_296 = arith.constant 0.000000e+00 : f32
    %1085 = vector.broadcast %cst_295 : f32 to vector<8x80xf32>
    %1086 = vector.broadcast %cst_296 : f32 to vector<8x80xf32>
    %1087 = arith.select %1084, %1085, %1086 : vector<8x80xi1>, vector<8x80xf32>
    %cst_297 = arith.constant 1.000000e+00 : f32
    %1088 = vector.broadcast %cst_297 : f32 to vector<8x1xf32>
    %1089 = arith.subf %1088, %1060 : vector<8x1xf32>
    %1090 = vector.broadcast %1089 : vector<8x1xf32> to vector<8x80xf32>
    %1091 = arith.mulf %1087, %1090 : vector<8x80xf32>
    %cst_298 = arith.constant 1.000000e+00 : f32
    %1092 = vector.broadcast %cst_298 : f32 to vector<8x1xf32>
    %1093 = arith.addf %1058, %1092 : vector<8x1xf32>
    %1094 = vector.broadcast %161 : vector<1x80xf32> to vector<8x80xf32>
    %1095 = vector.broadcast %1093 : vector<8x1xf32> to vector<8x80xf32>
    %1096 = arith.cmpf oeq, %1094, %1095 : vector<8x80xf32>
    %cst_299 = arith.constant 1.000000e+00 : f32
    %cst_300 = arith.constant 0.000000e+00 : f32
    %1097 = vector.broadcast %cst_299 : f32 to vector<8x80xf32>
    %1098 = vector.broadcast %cst_300 : f32 to vector<8x80xf32>
    %1099 = arith.select %1096, %1097, %1098 : vector<8x80xi1>, vector<8x80xf32>
    %1100 = vector.broadcast %1060 : vector<8x1xf32> to vector<8x80xf32>
    %1101 = arith.mulf %1099, %1100 : vector<8x80xf32>
    %1102 = arith.addf %1091, %1101 : vector<8x80xf32>
    %1103 = vector.extract_strided_slice %929 {offsets = [0, 2], sizes = [8, 1], strides = [1, 1]} : vector<8x4xf32> to vector<8x1xf32>
    %1104 = vector.broadcast %1103 : vector<8x1xf32> to vector<8x80xf32>
    %1105 = arith.mulf %1104, %1081 : vector<8x80xf32>
    %1106 = arith.mulf %1105, %1102 : vector<8x80xf32>
    %1107 = arith.addf %1048, %1106 : vector<8x80xf32>
    %1108 = vector.extract_strided_slice %128 {offsets = [0, 30], sizes = [8, 1], strides = [1, 1]} : vector<8x48xf32> to vector<8x1xf32>
    %1109 = arith.addf %169, %1108 : vector<8x1xf32>
    %cst_301 = arith.constant 5.000000e-01 : f32
    %1110 = vector.broadcast %cst_301 : f32 to vector<8x1xf32>
    %1111 = arith.subf %1109, %1110 : vector<8x1xf32>
    %1112 = vector.extract_strided_slice %128 {offsets = [0, 31], sizes = [8, 1], strides = [1, 1]} : vector<8x48xf32> to vector<8x1xf32>
    %1113 = arith.addf %172, %1112 : vector<8x1xf32>
    %cst_302 = arith.constant 5.000000e-01 : f32
    %1114 = vector.broadcast %cst_302 : f32 to vector<8x1xf32>
    %1115 = arith.subf %1113, %1114 : vector<8x1xf32>
    %1116 = math.floor %1111 : vector<8x1xf32>
    %1117 = math.floor %1115 : vector<8x1xf32>
    %1118 = arith.subf %1111, %1116 : vector<8x1xf32>
    %1119 = arith.subf %1115, %1117 : vector<8x1xf32>
    %1120 = vector.broadcast %166 : vector<1x80xf32> to vector<8x80xf32>
    %1121 = vector.broadcast %1116 : vector<8x1xf32> to vector<8x80xf32>
    %1122 = arith.cmpf oeq, %1120, %1121 : vector<8x80xf32>
    %cst_303 = arith.constant 1.000000e+00 : f32
    %cst_304 = arith.constant 0.000000e+00 : f32
    %1123 = vector.broadcast %cst_303 : f32 to vector<8x80xf32>
    %1124 = vector.broadcast %cst_304 : f32 to vector<8x80xf32>
    %1125 = arith.select %1122, %1123, %1124 : vector<8x80xi1>, vector<8x80xf32>
    %cst_305 = arith.constant 1.000000e+00 : f32
    %1126 = vector.broadcast %cst_305 : f32 to vector<8x1xf32>
    %1127 = arith.subf %1126, %1118 : vector<8x1xf32>
    %1128 = vector.broadcast %1127 : vector<8x1xf32> to vector<8x80xf32>
    %1129 = arith.mulf %1125, %1128 : vector<8x80xf32>
    %cst_306 = arith.constant 1.000000e+00 : f32
    %1130 = vector.broadcast %cst_306 : f32 to vector<8x1xf32>
    %1131 = arith.addf %1116, %1130 : vector<8x1xf32>
    %1132 = vector.broadcast %166 : vector<1x80xf32> to vector<8x80xf32>
    %1133 = vector.broadcast %1131 : vector<8x1xf32> to vector<8x80xf32>
    %1134 = arith.cmpf oeq, %1132, %1133 : vector<8x80xf32>
    %cst_307 = arith.constant 1.000000e+00 : f32
    %cst_308 = arith.constant 0.000000e+00 : f32
    %1135 = vector.broadcast %cst_307 : f32 to vector<8x80xf32>
    %1136 = vector.broadcast %cst_308 : f32 to vector<8x80xf32>
    %1137 = arith.select %1134, %1135, %1136 : vector<8x80xi1>, vector<8x80xf32>
    %1138 = vector.broadcast %1118 : vector<8x1xf32> to vector<8x80xf32>
    %1139 = arith.mulf %1137, %1138 : vector<8x80xf32>
    %1140 = arith.addf %1129, %1139 : vector<8x80xf32>
    %1141 = vector.broadcast %161 : vector<1x80xf32> to vector<8x80xf32>
    %1142 = vector.broadcast %1117 : vector<8x1xf32> to vector<8x80xf32>
    %1143 = arith.cmpf oeq, %1141, %1142 : vector<8x80xf32>
    %cst_309 = arith.constant 1.000000e+00 : f32
    %cst_310 = arith.constant 0.000000e+00 : f32
    %1144 = vector.broadcast %cst_309 : f32 to vector<8x80xf32>
    %1145 = vector.broadcast %cst_310 : f32 to vector<8x80xf32>
    %1146 = arith.select %1143, %1144, %1145 : vector<8x80xi1>, vector<8x80xf32>
    %cst_311 = arith.constant 1.000000e+00 : f32
    %1147 = vector.broadcast %cst_311 : f32 to vector<8x1xf32>
    %1148 = arith.subf %1147, %1119 : vector<8x1xf32>
    %1149 = vector.broadcast %1148 : vector<8x1xf32> to vector<8x80xf32>
    %1150 = arith.mulf %1146, %1149 : vector<8x80xf32>
    %cst_312 = arith.constant 1.000000e+00 : f32
    %1151 = vector.broadcast %cst_312 : f32 to vector<8x1xf32>
    %1152 = arith.addf %1117, %1151 : vector<8x1xf32>
    %1153 = vector.broadcast %161 : vector<1x80xf32> to vector<8x80xf32>
    %1154 = vector.broadcast %1152 : vector<8x1xf32> to vector<8x80xf32>
    %1155 = arith.cmpf oeq, %1153, %1154 : vector<8x80xf32>
    %cst_313 = arith.constant 1.000000e+00 : f32
    %cst_314 = arith.constant 0.000000e+00 : f32
    %1156 = vector.broadcast %cst_313 : f32 to vector<8x80xf32>
    %1157 = vector.broadcast %cst_314 : f32 to vector<8x80xf32>
    %1158 = arith.select %1155, %1156, %1157 : vector<8x80xi1>, vector<8x80xf32>
    %1159 = vector.broadcast %1119 : vector<8x1xf32> to vector<8x80xf32>
    %1160 = arith.mulf %1158, %1159 : vector<8x80xf32>
    %1161 = arith.addf %1150, %1160 : vector<8x80xf32>
    %1162 = vector.extract_strided_slice %929 {offsets = [0, 3], sizes = [8, 1], strides = [1, 1]} : vector<8x4xf32> to vector<8x1xf32>
    %1163 = vector.broadcast %1162 : vector<8x1xf32> to vector<8x80xf32>
    %1164 = arith.mulf %1163, %1140 : vector<8x80xf32>
    %1165 = arith.mulf %1164, %1161 : vector<8x80xf32>
    %1166 = arith.addf %1107, %1165 : vector<8x80xf32>
    %1167 = vector.extract_strided_slice %123 {offsets = [0, 24], sizes = [80, 8], strides = [1, 1]} : vector<80x32xf32> to vector<80x8xf32>
    %cst_315 = arith.constant dense<0.000000e+00> : vector<8x8xf32>
    %1168 = tpu.matmul %1166, %1167, %cst_315 {dimension_numbers = #tpu.dot_dimension_numbers<[1], [0], [0], [1], [0, 0, 1, 1], [], []>} : vector<8x80xf32>, vector<80x8xf32>, vector<8x8xf32> -> vector<8x8xf32>
    %1169 = tpu.concatenate %421, %670, %919, %1168 in 1 : vector<8x8xf32>, vector<8x8xf32>, vector<8x8xf32>, vector<8x8xf32> -> vector<8x32xf32>
    %c0_316 = arith.constant 0 : index
    %c0_317 = arith.constant 0 : index
    %1170 = vector.load %arg14[%c0_316, %c0_317] : memref<32x32xf32, #tpu.memory_space<vmem>>, vector<32x32xf32>
    %cst_318 = arith.constant dense<0.000000e+00> : vector<8x32xf32>
    %1171 = tpu.matmul %1169, %1170, %cst_318 {dimension_numbers = #tpu.dot_dimension_numbers<[1], [0], [0], [1], [0, 0, 1, 1], [], []>} : vector<8x32xf32>, vector<32x32xf32>, vector<8x32xf32> -> vector<8x32xf32>
    %c0_319 = arith.constant 0 : index
    %c0_320 = arith.constant 0 : index
    %1172 = vector.load %arg15[%c0_319, %c0_320] : memref<1x32xf32, #tpu.memory_space<vmem>>, vector<1x32xf32>
    %1173 = vector.broadcast %1172 : vector<1x32xf32> to vector<8x32xf32>
    %1174 = arith.addf %1171, %1173 : vector<8x32xf32>
    %1175 = arith.addf %111, %1174 : vector<8x32xf32>
    %1176 = vector.extract_strided_slice %6 {offsets = [2, 0], sizes = [1, 32], strides = [1, 1]} : vector<6x32xf32> to vector<1x32xf32>
    %1177 = vector.extract_strided_slice %6 {offsets = [3, 0], sizes = [1, 32], strides = [1, 1]} : vector<6x32xf32> to vector<1x32xf32>
    %cst_321 = arith.constant dense<0.000000e+00> : vector<8xf32>
    %1178 = vector.multi_reduction <add>, %1175, %cst_321 [1] : vector<8x32xf32> to vector<8xf32>
    %1179 = vector.shape_cast %1178 : vector<8xf32> to vector<8x1xf32>
    %cst_322 = arith.constant 3.200000e+01 : f32
    %1180 = vector.broadcast %cst_322 : f32 to vector<8x1xf32>
    %1181 = arith.divf %1179, %1180 : vector<8x1xf32>
    %1182 = vector.broadcast %1181 : vector<8x1xf32> to vector<8x32xf32>
    %1183 = arith.subf %1175, %1182 : vector<8x32xf32>
    %1184 = arith.mulf %1183, %1183 : vector<8x32xf32>
    %cst_323 = arith.constant dense<0.000000e+00> : vector<8xf32>
    %1185 = vector.multi_reduction <add>, %1184, %cst_323 [1] : vector<8x32xf32> to vector<8xf32>
    %1186 = vector.shape_cast %1185 : vector<8xf32> to vector<8x1xf32>
    %cst_324 = arith.constant 3.200000e+01 : f32
    %1187 = vector.broadcast %cst_324 : f32 to vector<8x1xf32>
    %1188 = arith.divf %1186, %1187 : vector<8x1xf32>
    %1189 = vector.broadcast %1181 : vector<8x1xf32> to vector<8x32xf32>
    %1190 = arith.subf %1175, %1189 : vector<8x32xf32>
    %cst_325 = arith.constant 9.99999974E-6 : f32
    %1191 = vector.broadcast %cst_325 : f32 to vector<8x1xf32>
    %1192 = arith.addf %1188, %1191 : vector<8x1xf32>
    %1193 = math.rsqrt %1192 : vector<8x1xf32>
    %1194 = vector.broadcast %1193 : vector<8x1xf32> to vector<8x32xf32>
    %1195 = arith.mulf %1190, %1194 : vector<8x32xf32>
    %1196 = vector.broadcast %1176 : vector<1x32xf32> to vector<8x32xf32>
    %1197 = arith.mulf %1195, %1196 : vector<8x32xf32>
    %1198 = vector.broadcast %1177 : vector<1x32xf32> to vector<8x32xf32>
    %1199 = arith.addf %1197, %1198 : vector<8x32xf32>
    %c0_326 = arith.constant 0 : index
    %c0_327 = arith.constant 0 : index
    %1200 = vector.load %arg16[%c0_326, %c0_327] : memref<32x64xf32, #tpu.memory_space<vmem>>, vector<32x64xf32>
    %cst_328 = arith.constant dense<0.000000e+00> : vector<8x64xf32>
    %1201 = tpu.matmul %1199, %1200, %cst_328 {dimension_numbers = #tpu.dot_dimension_numbers<[1], [0], [0], [1], [0, 0, 1, 1], [], []>} : vector<8x32xf32>, vector<32x64xf32>, vector<8x64xf32> -> vector<8x64xf32>
    %c0_329 = arith.constant 0 : index
    %c0_330 = arith.constant 0 : index
    %1202 = vector.load %arg17[%c0_329, %c0_330] : memref<1x64xf32, #tpu.memory_space<vmem>>, vector<1x64xf32>
    %1203 = vector.broadcast %1202 : vector<1x64xf32> to vector<8x64xf32>
    %1204 = arith.addf %1201, %1203 : vector<8x64xf32>
    %cst_331 = arith.constant 0.000000e+00 : f32
    %1205 = vector.broadcast %cst_331 : f32 to vector<8x64xf32>
    %1206 = arith.maximumf %1204, %1205 : vector<8x64xf32>
    %c0_332 = arith.constant 0 : index
    %c0_333 = arith.constant 0 : index
    %1207 = vector.load %arg18[%c0_332, %c0_333] : memref<64x32xf32, #tpu.memory_space<vmem>>, vector<64x32xf32>
    %cst_334 = arith.constant dense<0.000000e+00> : vector<8x32xf32>
    %1208 = tpu.matmul %1206, %1207, %cst_334 {dimension_numbers = #tpu.dot_dimension_numbers<[1], [0], [0], [1], [0, 0, 1, 1], [], []>} : vector<8x64xf32>, vector<64x32xf32>, vector<8x32xf32> -> vector<8x32xf32>
    %c0_335 = arith.constant 0 : index
    %c0_336 = arith.constant 0 : index
    %1209 = vector.load %arg19[%c0_335, %c0_336] : memref<1x32xf32, #tpu.memory_space<vmem>>, vector<1x32xf32>
    %1210 = vector.broadcast %1209 : vector<1x32xf32> to vector<8x32xf32>
    %1211 = arith.addf %1208, %1210 : vector<8x32xf32>
    %1212 = arith.addf %1199, %1211 : vector<8x32xf32>
    %1213 = vector.extract_strided_slice %6 {offsets = [4, 0], sizes = [1, 32], strides = [1, 1]} : vector<6x32xf32> to vector<1x32xf32>
    %1214 = vector.extract_strided_slice %6 {offsets = [5, 0], sizes = [1, 32], strides = [1, 1]} : vector<6x32xf32> to vector<1x32xf32>
    %cst_337 = arith.constant dense<0.000000e+00> : vector<8xf32>
    %1215 = vector.multi_reduction <add>, %1212, %cst_337 [1] : vector<8x32xf32> to vector<8xf32>
    %1216 = vector.shape_cast %1215 : vector<8xf32> to vector<8x1xf32>
    %cst_338 = arith.constant 3.200000e+01 : f32
    %1217 = vector.broadcast %cst_338 : f32 to vector<8x1xf32>
    %1218 = arith.divf %1216, %1217 : vector<8x1xf32>
    %1219 = vector.broadcast %1218 : vector<8x1xf32> to vector<8x32xf32>
    %1220 = arith.subf %1212, %1219 : vector<8x32xf32>
    %1221 = arith.mulf %1220, %1220 : vector<8x32xf32>
    %cst_339 = arith.constant dense<0.000000e+00> : vector<8xf32>
    %1222 = vector.multi_reduction <add>, %1221, %cst_339 [1] : vector<8x32xf32> to vector<8xf32>
    %1223 = vector.shape_cast %1222 : vector<8xf32> to vector<8x1xf32>
    %cst_340 = arith.constant 3.200000e+01 : f32
    %1224 = vector.broadcast %cst_340 : f32 to vector<8x1xf32>
    %1225 = arith.divf %1223, %1224 : vector<8x1xf32>
    %1226 = vector.broadcast %1218 : vector<8x1xf32> to vector<8x32xf32>
    %1227 = arith.subf %1212, %1226 : vector<8x32xf32>
    %cst_341 = arith.constant 9.99999974E-6 : f32
    %1228 = vector.broadcast %cst_341 : f32 to vector<8x1xf32>
    %1229 = arith.addf %1225, %1228 : vector<8x1xf32>
    %1230 = math.rsqrt %1229 : vector<8x1xf32>
    %1231 = vector.broadcast %1230 : vector<8x1xf32> to vector<8x32xf32>
    %1232 = arith.mulf %1227, %1231 : vector<8x32xf32>
    %1233 = vector.broadcast %1213 : vector<1x32xf32> to vector<8x32xf32>
    %1234 = arith.mulf %1232, %1233 : vector<8x32xf32>
    %1235 = vector.broadcast %1214 : vector<1x32xf32> to vector<8x32xf32>
    %1236 = arith.addf %1234, %1235 : vector<8x32xf32>
    %c0_342 = arith.constant 0 : index
    %c0_343 = arith.constant 0 : index
    %c0_344 = arith.constant 0 : index
    %1237 = vector.load %arg21[%c0_342, %c0_343, %c0_344] : memref<1x8x32xf32, #tpu.memory_space<vmem>>, vector<1x8x32xf32>
    %1238 = vector.shape_cast %1237 : vector<1x8x32xf32> to vector<8x32xf32>
    %1239 = vector.shape_cast %1236 : vector<8x32xf32> to vector<1x8x32xf32>
    tpu.vector_store %arg21[%c0_342, %c0_343, %c0_344], %1239 {strides = array<i32>} : memref<1x8x32xf32, #tpu.memory_space<vmem>>, vector<1x8x32xf32>,
    return
  }
  func.func @transform_0(%arg0: i32) -> (i32, i32, i32) {
    %c0_i32 = arith.constant 0 : i32
    %c0_i32_0 = arith.constant 0 : i32
    %c0_i32_1 = arith.constant 0 : i32
    return %arg0, %c0_i32, %c0_i32_0 : i32, i32, i32
  }
  func.func @transform_1(%arg0: i32) -> (i32, i32, i32) {
    %c0_i32 = arith.constant 0 : i32
    %c0_i32_0 = arith.constant 0 : i32
    %c0_i32_1 = arith.constant 0 : i32
    return %arg0, %c0_i32, %c0_i32_0 : i32, i32, i32
  }
  func.func @transform_2(%arg0: i32) -> (i32, i32, i32) {
    %c0_i32 = arith.constant 0 : i32
    %c0_i32_0 = arith.constant 0 : i32
    %c0_i32_1 = arith.constant 0 : i32
    return %arg0, %c0_i32, %c0_i32_0 : i32, i32, i32
  }
  func.func @transform_3(%arg0: i32) -> (i32, i32, i32) {
    %c0_i32 = arith.constant 0 : i32
    %c0_i32_0 = arith.constant 0 : i32
    %c0_i32_1 = arith.constant 0 : i32
    return %arg0, %c0_i32, %c0_i32_0 : i32, i32, i32
  }
  func.func @transform_4(%arg0: i32) -> (i32, i32, i32) {
    %c0_i32 = arith.constant 0 : i32
    %c0_i32_0 = arith.constant 0 : i32
    %c0_i32_1 = arith.constant 0 : i32
    return %arg0, %c0_i32, %c0_i32_0 : i32, i32, i32
  }
  func.func @transform_5(%arg0: i32) -> (i32, i32) {
    %c0_i32 = arith.constant 0 : i32
    %c0_i32_0 = arith.constant 0 : i32
    %c0_i32_1 = arith.constant 0 : i32
    return %c0_i32, %c0_i32_0 : i32, i32
  }
  func.func @transform_6(%arg0: i32) -> (i32, i32) {
    %c0_i32 = arith.constant 0 : i32
    %c0_i32_0 = arith.constant 0 : i32
    %c0_i32_1 = arith.constant 0 : i32
    return %c0_i32, %c0_i32_0 : i32, i32
  }
  func.func @transform_7(%arg0: i32) -> (i32, i32) {
    %c0_i32 = arith.constant 0 : i32
    %c0_i32_0 = arith.constant 0 : i32
    %c0_i32_1 = arith.constant 0 : i32
    return %c0_i32, %c0_i32_0 : i32, i32
  }
  func.func @transform_8(%arg0: i32) -> (i32, i32) {
    %c0_i32 = arith.constant 0 : i32
    %c0_i32_0 = arith.constant 0 : i32
    %c0_i32_1 = arith.constant 0 : i32
    return %c0_i32, %c0_i32_0 : i32, i32
  }
  func.func @transform_9(%arg0: i32) -> (i32, i32) {
    %c0_i32 = arith.constant 0 : i32
    %c0_i32_0 = arith.constant 0 : i32
    %c0_i32_1 = arith.constant 0 : i32
    return %c0_i32, %c0_i32_0 : i32, i32
  }
  func.func @transform_10(%arg0: i32) -> (i32, i32) {
    %c0_i32 = arith.constant 0 : i32
    %c0_i32_0 = arith.constant 0 : i32
    %c0_i32_1 = arith.constant 0 : i32
    return %c0_i32, %c0_i32_0 : i32, i32
  }
  func.func @transform_11(%arg0: i32) -> (i32, i32) {
    %c0_i32 = arith.constant 0 : i32
    %c0_i32_0 = arith.constant 0 : i32
    %c0_i32_1 = arith.constant 0 : i32
    return %c0_i32, %c0_i32_0 : i32, i32
  }
  func.func @transform_12(%arg0: i32) -> (i32, i32) {
    %c0_i32 = arith.constant 0 : i32
    %c0_i32_0 = arith.constant 0 : i32
    %c0_i32_1 = arith.constant 0 : i32
    return %c0_i32, %c0_i32_0 : i32, i32
  }
  func.func @transform_13(%arg0: i32) -> (i32, i32) {
    %c0_i32 = arith.constant 0 : i32
    %c0_i32_0 = arith.constant 0 : i32
    %c0_i32_1 = arith.constant 0 : i32
    return %c0_i32, %c0_i32_0 : i32, i32
  }
  func.func @transform_14(%arg0: i32) -> (i32, i32) {
    %c0_i32 = arith.constant 0 : i32
    %c0_i32_0 = arith.constant 0 : i32
    %c0_i32_1 = arith.constant 0 : i32
    return %c0_i32, %c0_i32_0 : i32, i32
  }
  func.func @transform_15(%arg0: i32) -> (i32, i32) {
    %c0_i32 = arith.constant 0 : i32
    %c0_i32_0 = arith.constant 0 : i32
    %c0_i32_1 = arith.constant 0 : i32
    return %c0_i32, %c0_i32_0 : i32, i32
  }
  func.func @transform_16(%arg0: i32) -> (i32, i32) {
    %c0_i32 = arith.constant 0 : i32
    %c0_i32_0 = arith.constant 0 : i32
    %c0_i32_1 = arith.constant 0 : i32
    return %c0_i32, %c0_i32_0 : i32, i32
  }
  func.func @transform_17(%arg0: i32) -> (i32, i32) {
    %c0_i32 = arith.constant 0 : i32
    %c0_i32_0 = arith.constant 0 : i32
    %c0_i32_1 = arith.constant 0 : i32
    return %c0_i32, %c0_i32_0 : i32, i32
  }
  func.func @transform_18(%arg0: i32) -> (i32, i32) {
    %c0_i32 = arith.constant 0 : i32
    %c0_i32_0 = arith.constant 0 : i32
    %c0_i32_1 = arith.constant 0 : i32
    return %c0_i32, %c0_i32_0 : i32, i32
  }
  func.func @transform_19(%arg0: i32) -> (i32, i32) {
    %c0_i32 = arith.constant 0 : i32
    %c0_i32_0 = arith.constant 0 : i32
    %c0_i32_1 = arith.constant 0 : i32
    return %c0_i32, %c0_i32_0 : i32, i32
  }
  func.func @transform_20(%arg0: i32) -> (i32, i32, i32) {
    %c0_i32 = arith.constant 0 : i32
    %c0_i32_0 = arith.constant 0 : i32
    %c0_i32_1 = arith.constant 0 : i32
    return %arg0, %c0_i32, %c0_i32_0 : i32, i32, i32
  }
}

</mosaic_0001>

<bundles_post_ra>
// kernel: tpu_custom_call.1
= control target key start
LH: loop header
LB: loop body
LE: loop exit
PB: predicated region body
PF: predicated region fallthrough
CT: control target
= control target key end

     0   :  { %s4852_s0 = inlined_call_operand.vmem [shape: f32[2,8,32], index: 0, kind: input, shape index: {}]   ;;  %s4853_s1 = inlined_call_operand.vmem [shape: f32[2,8,32], index: 1, kind: input, shape index: {}]   ;;  %s4854_s2 = inlined_call_operand.vmem [shape: f32[2,8,4], index: 2, kind: input, shape index: {}]   ;;  %s4855_s3 = inlined_call_operand.vmem [shape: f32[2,80,32], index: 3, kind: input, shape index: {}]   ;;  %s4856_s4 = inlined_call_operand.vmem [shape: f32[2,80,1], index: 4, kind: input, shape index: {}]   ;;  %s4857_s5 = inlined_call_operand.vmem [shape: f32[32,96], index: 5, kind: input, shape index: {}]   ;;  %s4858_s6 = inlined_call_operand.vmem [shape: f32[1,96], index: 6, kind: input, shape index: {}]   ;;  %s4859_s7 = inlined_call_operand.vmem [shape: f32[32,32], index: 7, kind: input, shape index: {}]   ;;  %s4860_s8 = inlined_call_operand.vmem [shape: f32[1,32], index: 8, kind: input, shape index: {}]   ;;  %s4861_s9 = inlined_call_operand.vmem [shape: f32[32,48], index: 9, kind: input, shape index: {}]   ;;  %s4862_s10 = inlined_call_operand.vmem [shape: f32[1,48], index: 10, kind: input, shape index: {}]   ;;  %s4863_s11 = inlined_call_operand.vmem [shape: f32[32,32], index: 11, kind: input, shape index: {}]   ;;  %s4864_s12 = inlined_call_operand.vmem [shape: f32[1,32], index: 12, kind: input, shape index: {}]   ;;  %s4865_s13 = inlined_call_operand.vmem [shape: f32[32,32], index: 13, kind: input, shape index: {}]   ;;  %s4866_s14 = inlined_call_operand.vmem [shape: f32[1,32], index: 14, kind: input, shape index: {}]   ;;  %s4867_s15 = inlined_call_operand.vmem [shape: f32[32,64], index: 15, kind: input, shape index: {}]   ;;  %s4868_s16 = inlined_call_operand.vmem [shape: f32[1,64], index: 16, kind: input, shape index: {}]   ;;  %s4869_s17 = inlined_call_operand.vmem [shape: f32[64,32], index: 17, kind: input, shape index: {}]   ;;  %s4870_s18 = inlined_call_operand.vmem [shape: f32[1,32], index: 18, kind: input, shape index: {}]   ;;  %s4871_s19 = inlined_call_operand.vmem [shape: f32[6,32], index: 19, kind: input, shape index: {}]   ;;  %s4872_s20 = inlined_call_operand.hbm [shape: f32[2,8,32], index: 20, kind: output, shape index: {}]  }
   0x1   :  { %4910 = sst [smem:[#allocation41_spill]] %s4852_s0 }
   0x2   :  { %4911 = sst [smem:[#allocation42_spill]] %s4853_s1 }
   0x3   :  { %4912 = sst [smem:[#allocation43_spill]] %s4854_s2 }
   0x4   :  { %4913 = sst [smem:[#allocation44_spill]] %s4855_s3 }
   0x5   :  { %4914 = sst [smem:[#allocation45_spill]] %s4856_s4 }
   0x6   :  { %4915 = sst [smem:[#allocation46_spill]] %s4857_s5 }
   0x7   :  { %4916 = sst [smem:[#allocation47_spill]] %s4858_s6 }
   0x8   :  { %25 = vsyncpa [#allocation3], 0 }
   0x9   :  { %27 = vsyncpa [#allocation3 + $0x1], 0  ;;  %s3620_s1 = smov 0   ;;  %s3622_s22 = smov 0  }
   0xa   :  { %s3624_s23 = smov 0   ;;  %s3626_s24 = smov 0  }
   0xb LB: > { %4917 = sst [smem:[#allocation5_spill]] %s3455_s1  ;;  %s3641_s2 = sadd.s32 4294967295, %s3467_s24   ;;  %s3467_s24 = sphi %s3626_s24, %s5011_s24   ;;  %s3463_s23 = sphi %s3624_s23, %s5013_s23   ;;  %s3459_s22 = sphi %s3622_s22, %s5015_s22   ;;  %s3455_s1 = sphi %s3620_s1, %s5014_s1  }
   0xc   : > { %4918 = sst [smem:[#allocation6_spill]] %s3463_s23  ;;  %s3008_s25 = sadd.s32 4294967294, %s3467_s24  }
   0xd   : > { %4919 = sst [smem:[#allocation7_spill]] %s3467_s24  ;;  %s3645_s3 = sadd.s32 1, %s3467_s24  }
   0xe   : > { %4920 = sst [smem:[#allocation8_spill]] %s3645_s3  ;;  %s485_s26 = sadd.s32 1, %s3463_s23 }
   0xf   : > { %s482_s27 = ssub.s32 %s3467_s24, %s3645_s3  ;;  %p495_p0 = scmp.ne.s32.totalorder %s3463_s23, %s3459_s22 }
  0x10   : > { %p483_p1 = scmp.eq.s32.totalorder %s482_s27, 0  ;;  %p496_p2 = scmp.eq.s32.totalorder %s3641_s2, 1 }
  0x11   : > { %p501_p3 = scmp.ne.s32.totalorder %s3459_s22, %s3455_s1  ;;  %p502_p4 = scmp.eq.s32.totalorder %s3008_s25, 1 }
  0x12   : > { %s3656_s28 = scalar_select %p483_p1, %s3463_s23, %s485_s26  }
  0x13   : > { %p3658_p5 = por %p496_p2, %p495_p0  ;;  %p3662_p6 = por %p502_p4, %p501_p3 }
  0x14   : > { %4921 = sst [smem:[#allocation9_spill]] %s3656_s28  ;;  %p3011_p7 = scmp.ge.s32.totalorder %s3467_s24, 1 }
  0x15   : > { %s4923_s29 = scalar_select %p3662_p6, 1, 0 }
  0x16   : > { %p602_p8 = scmp.lt.s32.totalorder %s3467_s24, 3 }
  0x17   : > { %4924 = sst [smem:[#allocation10_spill]] %s4923_s29 }
  0x18   : > { %p603_p9 = pnand %p3011_p7, %p602_p8 }
  0x1a   : > { %606 = sbr.rel (%p603_p9) target bundleno = 4148 (0x1034), region = 100 }
  0x1f   : > { %s4925_s5 = sld [smem:[#allocation46_spill]]  ;;  %p677_p10 = scmp.lt.s32.totalorder %s3641_s2, 1  ;;  %vm712_vm0 = vcmask 261120   ;;  %vm745_vm1 = vcmask 64512  }
  0x20   : > { %s4926_s25 = sld [smem:[#allocation41_spill]]  ;;  %s4886_s1 = smov 120  }
  0x21   : > { %s3679_s28 = scalar_select %p677_p10, %s3641_s2, 1 }
  0x22   : > { %s4927_s27 = sld [smem:[#allocation42_spill]]  ;;  %s3472_s0 = smov 64  }
  0x23   : > { %s3685_s30 = sshll.u32 %s3679_s28, 3  ;;  %s4928_s6 = sld [smem:[#allocation47_spill]] }
  0x24   : > { %s3473_s21 = smov 56   ;;  %s3475_s26 = smov 80  }
  0x25   : > { %v707_v0 = vld [vmem:[%s4925_s5 + $0x18] sm:$0xff]  ;;  %v706_v1 = vld [vmem:[%s4925_s5 + $0x10] sm:$0xff]  ;;  %v705_v2 = vld [vmem:[%s4925_s5 + $0x8] sm:$0xff]  ;;  %s4884_s23 = smov 104   ;;  %s3478_s3 = smov 40  }
  0x26   : > { %731 = vmatpush.msra.mxu0 %v707_v0  ;;  %v704_v3 = vld [vmem:[%s4925_s5] sm:$0xff]  ;;  %s680_s29 = scalar_lea.vmem %s4926_s25, %s3685_s30  ;;  %s3474_s25 = smov 72  }
  0x27   : > { %v3695_v4 = vld [vmem:[%s680_s29] sm:$0xff]  ;;  %s4880_s29 = smov 88   ;;  %s4930_s5 = sld [smem:[#allocation44_spill]] }
  0x28   : > { %732 = vmatpush.msra.mxu0 %v706_v1  ;;  %s684_s24 = scalar_lea.vmem %s4927_s27, %s3685_s30  ;;  %s4882_s27 = smov 112  }
  0x29   : > { %v3697_v5 = vld [vmem:[%s684_s24] sm:$0xff]  ;;  %s4881_s24 = smov 96  }
  0x2a   : > { %733 = vmatpush.msra.mxu0 %v705_v2  ;;  %v703_v6 = vadd.f32 %v3697_v5, %v3695_v4  ;;  %v3357_v7 = vld [vmem:[%s4928_s6] ss:$0 sm:$0xff] }
  0x2c   : > { %734 = vmatpush.msra.mxu0 %v704_v3 }
  0x2d   : > { %3018 = vmatmul.msk.f32.vlgmr.msra.gmra.mxu0 %vm712_vm0, %v703_v6 }
  0x35   : > { %3019 = vmatmul.msk.f32.gmra.mxu0 %vm712_vm0, %v3695_v4 }
  0xaa   : > { %v736_v8 = vpop.f32.mrf.mxu0 }
  0xab   : > { %v737_v9 = vadd.f32 %v3357_v7, %v736_v8 }
  0xad   : > { %822 = vrot.lane.b32.xlu1 %v737_v9, %s4886_s1  ;;  %743 = vrot.lane.b32.xlu0 %v737_v9, %s4881_s24  ;;  %s3491_s1 = smov 100   ;;  %s3492_s24 = smov 110  }
  0xb2   : > { %v739_v10 = vpop.f32.mrf.mxu0 }
  0xb3   : > { %v3710_v11 = vadd.f32 %v3357_v7, %v739_v10 }
  0xb5   : > { %824 = vrot.lane.b32.xlu0 %v737_v9, %s4880_s29  ;;  %796 = vrot.lane.b32.xlu2 %v3710_v11, %s3472_s0  ;;  %s4879_s0 = smov 8  }
  0xbd   : > { %875 = vrot.lane.b32.xlu2 %v3710_v11, %s3473_s21  ;;  %s3480_s21 = smov 48  }
 0x10f   : > { %v797_v18 = vpop.permute.xlu2 %796 }
 0x110   : > { %817 = vmatpush.msra.mxu2 %v797_v18 }
 0x117   : > { %v876_v22 = vpop.permute.xlu2 %875 }
 0x118   : > { %896 = vmatpush.msrb.mxu2 %v876_v22  ;;  %v1155_v22 = vld [vmem:[%s4863_s11 + $0x18] sm:$0xff] }
 0x119   : > { %1202 = vmatpush.msrb.mxu0 %v1155_v22 }
 0x11f   : > { %v744_v12 = vpop.permute.xlu0 %743  ;;  %v823_v14 = vpop.permute.xlu1 %822 }
 0x120   : > { %3020 = vmatpush.xpose.msk.msra.mxu1 %vm745_vm1, %v744_v12 }
 0x123   : > { %3021 = vmatmul.msk.f32.vlgmr.msra.gmra.mxu1 %vm745_vm1, %v737_v9 }
 0x127   : > { %v825_v13 = vpop.permute.xlu0 %824 }
 0x128   : > { %3023 = vmatpush.xpose.msk.msra.mxu3 %vm745_vm1, %v825_v13 }
 0x12b   : > { %3024 = vmatmul.msk.f32.vlgmr.msra.gmra.mxu3 %vm745_vm1, %v823_v14 }
 0x1a0   : > { %v767_v15 = vpop.f32.mrf.mxu1 }
 0x1a1   : > { %v770_v16 = vmul.f32 0.35355338, %v767_v15 }
 0x1a3   : > { %v771_v17 = vsel %vm745_vm1, %v770_v16, -inf }
 0x1a4   : > { %772 = vmax.xlane.f32.xlu1 %v771_v17 }
 0x1ae   : > { %v847_v19 = vpop.f32.mrf.mxu3 }
 0x1af   : > { %v850_v20 = vmul.f32 0.35355338, %v847_v19 }
 0x1b1   : > { %v851_v21 = vsel %vm745_vm1, %v850_v20, -inf }
 0x1b2   : > { %852 = vmax.xlane.f32.xlu2 %v851_v21 }
 0x1bd   : > { %982 = vrot.lane.b32.xlu1 %v737_v9, %s3474_s25  ;;  %s3080_s25 = smul.u32 80, %s3679_s28  ;;  %s3487_s28 = smov 126  }
 0x1bf   : > { %s3761_s6 = scalar_lea.vmem %s4930_s5, %s3080_s25  ;;  %s3485_s5 = smov 108  }
 0x1ca   : > { %903 = vrot.lane.b32.xlu2 %v737_v9, %s3475_s26  ;;  %s3490_s26 = smov 118  }
 0x217   : > { %v773_v23 = vpop.xlane.xlu1 %772 }
 0x218   : > { %v774_v24 = vsub.f32 %v770_v16, %v773_v23  ;;  %v1154_v23 = vld [vmem:[%s4863_s11 + $0x10] sm:$0xff] }
 0x219   : > { %1203 = vmatpush.msrb.mxu0 %v1154_v23 }
 0x21a   : > { %v775_v25 = vmul.f32 1.442695, %v774_v24 }
 0x21c   : > { %3364 = vpow2.f32 %v775_v25  ;;  %v1153_v25 = vld [vmem:[%s4863_s11 + $0x8] sm:$0xff] }
 0x21d   : > { %1204 = vmatpush.msrb.mxu0 %v1153_v25 }
 0x222   : > { %v3365_v26 = vpop.eup %3364 }
 0x223   : > { %v777_v27 = vsel %vm745_vm1, %v3365_v26, 0.0 }
 0x224   : > { %778 = vadd.xlane.f32.xlu2 %v777_v27  ;;  %v1152_v27 = vld [vmem:[%s4863_s11] sm:$0xff] }
 0x225   : > { %v853_v28 = vpop.xlane.xlu2 %852  ;;  %1205 = vmatpush.msrb.mxu0 %v1152_v27 }
 0x226   : > { %v854_v29 = vsub.f32 %v850_v20, %v853_v28  ;;  %v1142_v28 = vld [vmem:[%s3761_s6] sm:$0xff] }
 0x227   : > { %3033 = vmatmul.msk.f32.vlgmr.msrb.gmra.mxu0 %vm712_vm0, %v1142_v28 }
 0x228   : > { %v855_v30 = vmul.f32 1.442695, %v854_v29 }
 0x22a   : > { %3366 = vpow2.f32 %v855_v30 }
 0x22d   : > { %v904_v31 = vpop.permute.xlu2 %903 }
 0x22e   : > { %3026 = vmatpush.xpose.msk.msrb.mxu1 %vm745_vm1, %v904_v31  ;;  %v1151_v31 = vld [vmem:[%s3761_s6 + $0x48] sm:$0xff] }
 0x22f   : > { %v983_v48 = vpop.permute.xlu1 %982 }
 0x230   : > { %v3367_v32 = vpop.eup %3366 }
 0x231   : > { %v857_v33 = vsel %vm745_vm1, %v3367_v32, 0.0 }
 0x232   : > { %858 = vadd.xlane.f32.xlu0 %v857_v33 }
 0x23c   : > { %901 = vrot.lane.b32.xlu2 %v737_v9, %s4882_s27  ;;  %s3486_s27 = smov 124  }
 0x246   : > { %980 = vrot.lane.b32.xlu0 %v737_v9, %s4884_s23  ;;  %s4932_s23 = smov 120  }
 0x297   : > { %v779_v34 = vpop.xlane.xlu2 %778 }
 0x298   : > { %3368 = vrcp.f32 %v779_v34  ;;  %v791_v39 = vand.u32 2147483648, %v779_v34  ;;  %v789_v41 = vand.u32 2147483647, %v779_v34  ;;  %vm785_vm3 = vweird.f32 %v779_v34 }
 0x29a   : > { %v792_v44 = vor.u32 1.1754944e-38, %v791_v39  ;;  %vm790_vm5 = vcmp.eq.f32.partialorder %v789_v41, 8.507059e+37 }
 0x29e   : > { %v3369_v35 = vpop.eup %3368 }
 0x29f   : > { %v781_v36 = vmul.f32 %v3369_v35, %v779_v34  ;;  %v902_v37 = vpop.permute.xlu2 %901  ;;  %vm786_vm2 = vweird.f32 %v3369_v35 }
 0x2a0   : > { %3027 = vmatmul.msk.f32.vlgmr.msrb.gmra.mxu1 %vm745_vm1, %v902_v37  ;;  %vm787_vm4 = vmor %vm785_vm3, %vm786_vm2 }
 0x2a1   : > { %v782_v38 = vsub.f32 1.0, %v781_v36  ;;  %v1143_v36 = vld [vmem:[%s3761_s6 + $0x8] sm:$0xff] }
 0x2a2   : > { %3034 = vmatmul.msk.f32.gmra.mxu0 %vm712_vm0, %v1143_v36 }
 0x2a3   : > { %v783_v40 = vmul.f32 %v3369_v35, %v782_v38 }
 0x2a5   : > { %v859_v42 = vpop.xlane.xlu0 %858  ;;  %v784_v43 = vadd.f32 %v3369_v35, %v783_v40 }
 0x2a6   : > { %3370 = vrcp.f32 %v859_v42  ;;  %v871_v52 = vand.u32 2147483648, %v859_v42  ;;  %v869_v54 = vand.u32 2147483647, %v859_v42  ;;  %vm865_vm7 = vweird.f32 %v859_v42 }
 0x2a7   : > { %v788_v45 = vsel %vm787_vm4, %v3369_v35, %v784_v43  ;;  %vm1072_vm4 = vcmask 130048  }
 0x2a8   : > { %v793_v46 = vsel %vm790_vm5, %v792_v44, %v788_v45  ;;  %v872_v56 = vor.u32 1.1754944e-38, %v871_v52  ;;  %vm870_vm9 = vcmp.eq.f32.partialorder %v869_v54, 8.507059e+37  ;;  %vm1074_vm5 = vcmask 195584  }
 0x2a9   : > { %v794_v47 = vmul.f32 %v3365_v26, %v793_v46  ;;  %v1144_v46 = vld [vmem:[%s3761_s6 + $0x10] sm:$0xff] }
 0x2aa   : > { %3035 = vmatmul.msk.f32.gmra.mxu0 %vm712_vm0, %v1144_v46 }
 0x2ab   : > { %3022 = vmatmul.msk.f32.vlgmr.msra.gmra.mxu2 %vm745_vm1, %v794_v47 }
 0x2ac   : > { %v3371_v49 = vpop.eup %3370  ;;  %3029 = vmatpush.xpose.msk.msra.mxu2 %vm745_vm1, %v983_v48 }
 0x2ad   : > { %v861_v50 = vmul.f32 %v3371_v49, %v859_v42  ;;  %vm866_vm6 = vweird.f32 %v3371_v49 }
 0x2ae   : > { %vm867_vm8 = vmor %vm865_vm7, %vm866_vm6 }
 0x2af   : > { %v862_v51 = vsub.f32 1.0, %v861_v50 }
 0x2b1   : > { %v863_v53 = vmul.f32 %v3371_v49, %v862_v51 }
 0x2b3   : > { %v864_v55 = vadd.f32 %v3371_v49, %v863_v53 }
 0x2b5   : > { %v868_v57 = vsel %vm867_vm8, %v3371_v49, %v864_v55 }
 0x2b6   : > { %v873_v58 = vsel %vm870_vm9, %v872_v56, %v868_v57  ;;  %v1145_v57 = vld [vmem:[%s3761_s6 + $0x18] sm:$0xff] }
 0x2b7   : > { %v874_v59 = vmul.f32 %v3367_v32, %v873_v58  ;;  %3036 = vmatmul.msk.f32.gmra.mxu0 %vm712_vm0, %v1145_v57 }
 0x2b8   : > { %v981_v60 = vpop.permute.xlu0 %980 }
 0x2b9   : > { %3025 = vmatmul.msk.f32.vlgmr.msrb.gmra.mxu2 %vm745_vm1, %v874_v59 }
 0x2ba   : > { %3073 = vmatpush.msrb.mxu2 %v1155_v22 }
 0x2bc   : > { %3075 = vmatpush.msrb.mxu2 %v1154_v23 }
 0x2be   : > { %3077 = vmatpush.msrb.mxu2 %v1153_v25 }
 0x2c0   : > { %3079 = vmatpush.msrb.mxu2 %v1152_v27 }
 0x2c1   : > { %3030 = vmatmul.msk.f32.vlgmr.msra.gmra.mxu2 %vm745_vm1, %v981_v60  ;;  %v1146_v60 = vld [vmem:[%s3761_s6 + $0x20] sm:$0xff] }
 0x2c2   : > { %3037 = vmatmul.msk.f32.gmra.mxu0 %vm712_vm0, %v1146_v60 }
 0x2c9   : > { %3042 = vmatmul.msk.f32.vlgmr.msrb.gmra.mxu2 %vm712_vm0, %v1151_v31 }
 0x31d   : > { %v926_v61 = vpop.f32.mrf.mxu1 }
 0x31e   : > { %v929_v62 = vmul.f32 0.35355338, %v926_v61  ;;  %v1149_v61 = vld [vmem:[%s3761_s6 + $0x38] sm:$0xff] }
 0x320   : > { %v930_v63 = vsel %vm745_vm1, %v929_v62, -inf }
 0x321   : > { %931 = vmax.xlane.f32.xlu2 %v930_v63  ;;  %v1147_v63 = vld [vmem:[%s3761_s6 + $0x28] sm:$0xff] }
 0x322   : > { %3038 = vmatmul.msk.f32.gmra.mxu0 %vm712_vm0, %v1147_v63  ;;  %v1079_v63 = vld [vmem:[%s4859_s7 + $0x18] sm:$0xff] }
 0x32e   : > { %v3731_v0 = vpop.f32.mrf.mxu2 }
 0x33c   : > { %v898_v1 = vpop.f32.mrf.mxu2 }
 0x344   : > { %v1005_v2 = vpop.f32.mrf.mxu2 }
 0x345   : > { %v1008_v3 = vmul.f32 0.35355338, %v1005_v2 }
 0x347   : > { %v1009_v6 = vsel %vm745_vm1, %v1008_v3, -inf }
 0x348   : > { %1010 = vmax.xlane.f32.xlu1 %v1009_v6 }
 0x361   : > { %1033 = vrot.lane.b32.xlu1 %v3710_v11, %s3478_s3  ;;  %s3483_s3 = smov 24  }
 0x394   : > { %v932_v7 = vpop.xlane.xlu2 %931 }
 0x395   : > { %v933_v8 = vsub.f32 %v929_v62, %v932_v7 }
 0x397   : > { %v934_v9 = vmul.f32 1.442695, %v933_v8  ;;  %v1207_v8 = vpop.f32.mrf.mxu0 }
 0x399   : > { %3372 = vpow2.f32 %v934_v9 }
 0x39f   : > { %v3735_v10 = vpop.eup %3372 }
 0x3a0   : > { %v936_v12 = vsel %vm745_vm1, %v3735_v10, 0.0 }
 0x3a1   : > { %937 = vadd.xlane.f32.xlu0 %v936_v12 }
 0x3b5   : > { %1060 = vrot.lane.b32.xlu0 %v898_v1, %s4879_s0  ;;  %s4929_s0 = sld [smem:[#allocation45_spill]]  ;;  %v1150_v1 = vld [vmem:[%s3761_s6 + $0x40] sm:$0xff] }
 0x3bb   : > { %v1011_v13 = vpop.xlane.xlu1 %1010  ;;  %s3749_s29 = scalar_lea.vmem %s4929_s0, %s3080_s25  ;;  %s4935_s25 = smov 112  }
 0x3bc   : > { %v1012_v14 = vsub.f32 %v1008_v3, %v1011_v13  ;;  %v1237_v26 = vld [vmem:[%s3749_s29] sm:$0xff]  ;;  %v1238_v30 = vld [vmem:[%s3749_s29 + $0x8] sm:$0xff]  ;;  %v1239_v39 = vld [vmem:[%s3749_s29 + $0x10] sm:$0xff]  ;;  %s3489_s0 = smov 116  }
 0x3bd   : > { %v1241_v40 = vld [vmem:[%s3749_s29 + $0x20] sm:$0xff]  ;;  %v1240_v51 = vld [vmem:[%s3749_s29 + $0x18] sm:$0xff]  ;;  %v1246_v52 = vld [vmem:[%s3749_s29 + $0x48] sm:$0xff] }
 0x3be   : > { %v1013_v15 = vmul.f32 1.442695, %v1012_v14  ;;  %v1243_v59 = vld [vmem:[%s3749_s29 + $0x30] sm:$0xff]  ;;  %v1244_v62 = vld [vmem:[%s3749_s29 + $0x38] sm:$0xff]  ;;  %v1245_v2 = vld [vmem:[%s3749_s29 + $0x40] sm:$0xff]  ;;  %v1234_v14 = vpop.f32.mrf.mxu2 }
 0x3bf   : > { %v1148_v3 = vld [vmem:[%s3761_s6 + $0x30] sm:$0xff]  ;;  %s3482_s6 = smov 16  }
 0x3c0   : > { %3374 = vpow2.f32 %v1013_v15  ;;  %3039 = vmatmul.msk.f32.gmra.mxu0 %vm712_vm0, %v1148_v3  ;;  %v3358_v15 = vld [vmem:[%s4864_s12] ss:$0 sm:$0xff] }
 0x3c1   : > { %v1076_v3 = vld [vmem:[%s4859_s7] sm:$0xff] }
 0x3c6   : > { %v3740_v16 = vpop.eup %3374 }
 0x3c7   : > { %v1015_v17 = vsel %vm745_vm1, %v3740_v16, 0.0 }
 0x3c8   : > { %1016 = vadd.xlane.f32.xlu2 %v1015_v17  ;;  %v1235_v17 = vadd.f32 %v3358_v15, %v1234_v14  ;;  %v1308_v14 = vld [vmem:[%s4861_s9 + $0x8] sm:$0xff] }
 0x3d3   : > { %v1034_v18 = vpop.permute.xlu1 %1033 }
 0x3d4   : > { %1054 = vmatpush.msra.mxu1 %v1034_v18 }
 0x3d6   : > { %3072 = vmatpush.msrb.mxu1 %v1155_v22 }
 0x3d8   : > { %3074 = vmatpush.msrb.mxu1 %v1154_v23 }
 0x3da   : > { %3076 = vmatpush.msrb.mxu1 %v1153_v25 }
 0x3dc   : > { %3078 = vmatpush.msrb.mxu1 %v1152_v27 }
 0x3e0   : > { %954 = vrot.lane.b32.xlu2 %v3710_v11, %s3480_s21  ;;  %v4892_v11 = vmov 0   ;;  %s3488_s21 = smov 102  }
 0x3e1   : > { %3166 = vset.pattern.permute.xlu0 %v4892_v11  ;;  %3167 = vset.pattern.permute.xlu1 %v4892_v11 }
 0x3e2   : > { %1249 = vperm.xlu0 %3166, %v1237_v26   ;;  %3168 = vset.pattern.permute.xlu2 %v4892_v11  ;;  %v1242_v26 = vld [vmem:[%s3749_s29 + $0x28] sm:$0xff]  ;;  %s4934_s29 = smov 104  }
 0x3e3   : > { %1269 = vperm.xlu1 %3167, %v1241_v40  }
 0x3ea   : > { %1254 = vperm.xlu0 %3166, %v1238_v30  }
 0x3eb   : > { %1294 = vperm.xlu1 %3167, %v1246_v52  }
 0x3f2   : > { %1259 = vperm.xlu0 %3166, %v1239_v39  }
 0x3fa   : > { %1264 = vperm.xlu0 %3166, %v1240_v51  }
 0x402   : > { %1279 = vperm.xlu0 %3166, %v1243_v59  }
 0x40a   : > { %1284 = vperm.xlu0 %3166, %v1244_v62  }
 0x412   : > { %1289 = vperm.xlu0 %3166, %v1245_v2   ;;  %v1077_v2 = vld [vmem:[%s4859_s7 + $0x8] sm:$0xff] }
 0x414   : > { %v938_v19 = vpop.xlane.xlu0 %937 }
 0x415   : > { %3376 = vrcp.f32 %v938_v19  ;;  %v950_v33 = vand.u32 2147483648, %v938_v19  ;;  %vm944_vm11 = vweird.f32 %v938_v19  ;;  %v948_v35 = vand.u32 2147483647, %v938_v19 }
 0x417   : > { %v951_v38 = vor.u32 1.1754944e-38, %v950_v33  ;;  %vm949_vm13 = vcmp.eq.f32.partialorder %v948_v35, 8.507059e+37 }
 0x41b   : > { %v3377_v20 = vpop.eup %3376 }
 0x41c   : > { %v940_v21 = vmul.f32 %v3377_v20, %v938_v19  ;;  %vm945_vm10 = vweird.f32 %v3377_v20 }
 0x41d   : > { %vm946_vm12 = vmor %vm944_vm11, %vm945_vm10  ;;  %vm2028_vm10 = vcmask 359744   ;;  %vm1674_vm11 = vcmask 326944  }
 0x41e   : > { %v941_v24 = vsub.f32 1.0, %v940_v21 }
 0x420   : > { %v942_v29 = vmul.f32 %v3377_v20, %v941_v24 }
 0x422   : > { %v943_v32 = vadd.f32 %v3377_v20, %v942_v29 }
 0x424   : > { %v947_v37 = vsel %vm946_vm12, %v3377_v20, %v943_v32  ;;  %v1208_v32 = vadd.f32 %v3358_v15, %v1207_v8  ;;  %vm1360_vm12 = vcmask 294144  }
 0x425   : > { %v952_v41 = vsel %vm949_vm13, %v951_v38, %v947_v37  ;;  %vm2372_vm13 = vcmask 392544  }
 0x426   : > { %v953_v45 = vmul.f32 %v3735_v10, %v952_v41  ;;  %v1210_v10 = vpop.f32.mrf.mxu0 }
 0x427   : > { %v3804_v6 = vpop.permute.xlu0 %1060  ;;  %v1211_v33 = vadd.f32 %v3358_v15, %v1210_v10 }
 0x43b   : > { %v1017_v34 = vpop.xlane.xlu2 %1016 }
 0x43c   : > { %3378 = vrcp.f32 %v1017_v34  ;;  %v1029_v48 = vand.u32 2147483648, %v1017_v34  ;;  %v1027_v50 = vand.u32 2147483647, %v1017_v34  ;;  %vm1023_vm15 = vweird.f32 %v1017_v34 }
 0x43e   : > { %v1030_v54 = vor.u32 1.1754944e-38, %v1029_v48  ;;  %vm1028_vm3 = vcmp.eq.f32.partialorder %v1027_v50, 8.507059e+37 }
 0x442   : > { %v3379_v42 = vpop.eup %3378 }
 0x443   : > { %v1019_v43 = vmul.f32 %v3379_v42, %v1017_v34  ;;  %v955_v44 = vpop.permute.xlu2 %954  ;;  %vm1024_vm14 = vweird.f32 %v3379_v42 }
 0x444   : > { %975 = vmatpush.msrb.mxu3 %v955_v44  ;;  %vm1025_vm2 = vmor %vm1023_vm15, %vm1024_vm14 }
 0x445   : > { %v1020_v47 = vsub.f32 1.0, %v1019_v43  ;;  %3028 = vmatmul.msk.f32.vlgmr.msrb.gmra.mxu3 %vm745_vm1, %v953_v45 }
 0x446   : > { %1099 = vmatpush.msra.mxu3 %v1079_v63 }
 0x447   : > { %v1021_v49 = vmul.f32 %v3379_v42, %v1020_v47 }
 0x449   : > { %v1022_v53 = vadd.f32 %v3379_v42, %v1021_v49 }
 0x44b   : > { %v1026_v55 = vsel %vm1025_vm2, %v3379_v42, %v1022_v53 }
 0x44c   : > { %v1031_v56 = vsel %vm1028_vm3, %v1030_v54, %v1026_v55 }
 0x44d   : > { %v1032_v58 = vmul.f32 %v3740_v16, %v1031_v56  ;;  %v1213_v16 = vpop.f32.mrf.mxu0 }
 0x44e   : > { %v1214_v24 = vadd.f32 %v3358_v15, %v1213_v16 }
 0x44f   : > { %3031 = vmatmul.msk.f32.vlgmr.msra.gmra.mxu1 %vm745_vm1, %v1032_v58 }
 0x454   : > { %v1250_v7 = vpop.permute.xlu0 %1249 }
 0x455   : > { %v1270_v13 = vpop.permute.xlu1 %1269  ;;  %v1216_v23 = vpop.f32.mrf.mxu0  ;;  %v1297_v36 = vmul.f32 %v1250_v7, %v1208_v32 }
 0x456   : > { %v1217_v25 = vadd.f32 %v3358_v15, %v1216_v23 }
 0x457   : > { %3040 = vmatmul.msk.f32.vlgmr.msrb.gmra.mxu1 %vm712_vm0, %v1149_v61 }
 0x45c   : > { %v1255_v9 = vpop.permute.xlu0 %1254 }
 0x45d   : > { %v1295_v20 = vpop.permute.xlu1 %1294  ;;  %v1219_v30 = vpop.f32.mrf.mxu0  ;;  %v1298_v37 = vmul.f32 %v1255_v9, %v1211_v33 }
 0x45e   : > { %v1306_v21 = vmul.f32 %v1295_v20, %v1235_v17  ;;  %v1220_v35 = vadd.f32 %v3358_v15, %v1219_v30  ;;  %v1307_v17 = vld [vmem:[%s4861_s9] sm:$0xff] }
 0x45f   : > { %3041 = vmatmul.msk.f32.gmra.mxu1 %vm712_vm0, %v1150_v1  ;;  %v3815_v41 = vpack.i.bf16 %v1297_v36, %v1298_v37  ;;  %v1078_v1 = vld [vmem:[%s4859_s7 + $0x10] sm:$0xff] }
 0x460   : > { %1660 = vmatpush.msra.mxu1 %v1306_v21  ;;  %v1301_v55 = vmul.f32 %v1270_v13, %v1220_v35  ;;  %1100 = vmatpush.msra.mxu3 %v1078_v1  ;;  %v1309_v13 = vld [vmem:[%s4861_s9 + $0x10] sm:$0xff] }
 0x461   : > { %4933 = vst [vmem:[#allocation12_spill] sm:$0xff] %v3815_v41 }
 0x462   : > { %1101 = vmatpush.msra.mxu3 %v1077_v2 }
 0x464   : > { %v1260_v12 = vpop.permute.xlu0 %1259  ;;  %1102 = vmatpush.msra.mxu3 %v1076_v3 }
 0x465   : > { %v1299_v27 = vmul.f32 %v1260_v12, %v1214_v24  ;;  %v1222_v39 = vpop.f32.mrf.mxu0  ;;  %v1310_v12 = vld [vmem:[%s4861_s9 + $0x18] sm:$0xff] }
 0x466   : > { %v1223_v42 = vadd.f32 %v3358_v15, %v1222_v39  ;;  %1330 = vmatpush.msra.mxu2 %v1310_v12 }
 0x468   : > { %1331 = vmatpush.msra.mxu2 %v1309_v13 }
 0x46a   : > { %1332 = vmatpush.msra.mxu2 %v1308_v14  ;;  %v702_v14 = vld [vmem:[%s4871_s19] sm:$0x3f] }
 0x46c   : > { %v1265_v19 = vpop.permute.xlu0 %1264  ;;  %1333 = vmatpush.msra.mxu2 %v1307_v17  ;;  %v1137_v17 = vperm.slane %v702_v14, 0 }
 0x46d   : > { %v1300_v28 = vmul.f32 %v1265_v19, %v1217_v25  ;;  %v1225_v48 = vpop.f32.mrf.mxu0 }
 0x46e   : > { %v1226_v49 = vadd.f32 %v3358_v15, %v1225_v48 }
 0x46f   : > { %v3811_v34 = vpack.i.bf16 %v1299_v27, %v1300_v28 }
 0x471   : > { %4931 = vst [vmem:[#allocation11_spill] sm:$0xff] %v3811_v34 }
 0x474   : > { %v1280_v29 = vpop.permute.xlu0 %1279 }
 0x475   : > { %v1303_v50 = vmul.f32 %v1280_v29, %v1226_v49 }
 0x47c   : > { %v1285_v38 = vpop.permute.xlu0 %1284 }
 0x484   : > { %v1290_v45 = vpop.permute.xlu0 %1289 }
 0x4c8   : > { %v977_v18 = vpop.f32.mrf.mxu3 }
 0x4c9   : > { %1064 = vrot.lane.b32.xlu2 %v977_v18, %s3482_s6  ;;  %v1071_v18 = vsel %vm745_vm1, %v3731_v0, %v3804_v6 }
 0x4cc   : > { %v1056_v22 = vpop.f32.mrf.mxu1 }
 0x4d1   : > { %1274 = vperm.xlu2 %3168, %v1242_v26  }
 0x4d4   : > { %v1228_v31 = vpop.f32.mrf.mxu1 }
 0x4d5   : > { %v1229_v43 = vadd.f32 %v3358_v15, %v1228_v31 }
 0x4d7   : > { %v1304_v46 = vmul.f32 %v1285_v38, %v1229_v43 }
 0x4d9   : > { %3180 = vrot.lane.b32.xlu2 %v3811_v34, %s4932_s23  ;;  %v3204_v52 = vpack.i.bf16 %v1303_v50, %v1304_v46 }
 0x4dc   : > { %v1231_v40 = vpop.f32.mrf.mxu1 }
 0x4dd   : > { %v1232_v44 = vadd.f32 %v3358_v15, %v1231_v40 }
 0x4df   : > { %v1305_v47 = vmul.f32 %v1290_v45, %v1232_v44 }
 0x4e1   : > { %3190 = vrot.lane.b32.xlu2 %v3815_v41, %s4932_s23  ;;  %1661 = vmatpush.msra.mxu1 %v1305_v47  ;;  %v3229_v51 = vpack.i.bf16 %v1305_v47, %v1306_v21 }
 0x4e3   : > { %1662 = vmatpush.msra.mxu1 %v1304_v46 }
 0x4e5   : > { %1663 = vmatpush.msra.mxu1 %v1303_v50  ;;  %v3359_v50 = vld [vmem:[%s4860_s8] ss:$0 sm:$0xff] }
 0x4e9   : > { %3230 = vrot.lane.b32.xlu2 %v3229_v51, %s4934_s29 }
 0x523   : > { %v1065_v53 = vpop.permute.xlu2 %1064 }
 0x524   : > { %v1073_v19 = vsel %vm1072_vm4, %v1071_v18, %v1065_v53 }
 0x52b   : > { %v1275_v54 = vpop.permute.xlu2 %1274 }
 0x52c   : > { %v1302_v56 = vmul.f32 %v1275_v54, %v1223_v42 }
 0x52e   : > { %1664 = vmatpush.msra.mxu1 %v1302_v56  ;;  %v3174_v57 = vpack.i.bf16 %v1301_v55, %v1302_v56 }
 0x530   : > { %3175 = vrot.lane.b32.xlu1 %v3174_v57, %s4935_s25  ;;  %3170 = vrot.lane.b32.xlu0 %v3174_v57, %s4932_s23 }
 0x531   : > { %1665 = vmatpush.msra.mxu1 %v1301_v55  ;;  %v3484_v55 = vmov 32.0  }
 0x532   : > { %3380 = vrcp.f32 %v3484_v55 }
 0x533   : > { %1666 = vmatpush.msra.mxu1 %v1300_v28  ;;  %v3181_v58 = vpop.permute.xlu2 %3180 }
 0x534   : > { %v3182_v0 = vunpack.i.l.bf16 %v3181_v58  ;;  %v3183_v6 = vunpack.i.h.bf16 %v3181_v58 }
 0x535   : > { %1667 = vmatpush.msra.mxu1 %v1299_v27 }
 0x537   : > { %1668 = vmatpush.msra.mxu1 %v1298_v37 }
 0x538   : > { %3195 = vrot.lane.b32.xlu1 %v3174_v57, %s4934_s29  ;;  %3185 = vrot.lane.b32.xlu0 %v3811_v34, %s4935_s25  ;;  %v3381_v56 = vpop.eup %3380 }
 0x539   : > { %1669 = vmatpush.msra.mxu1 %v1297_v36  ;;  %v1112_v57 = vmul.f32 32.0, %v3381_v56  ;;  %vm1116_vm6 = vweird.f32 %v3381_v56 }
 0x53b   : > { %v3831_v59 = vpop.permute.xlu2 %3190  ;;  %v1113_v58 = vsub.f32 1.0, %v1112_v57 }
 0x53c   : > { %v3192_v31 = vunpack.i.l.bf16 %v3831_v59  ;;  %v3193_v33 = vunpack.i.h.bf16 %v3831_v59 }
 0x53d   : > { %v1114_v59 = vmul.f32 %v3381_v56, %v1113_v58 }
 0x540   : > { %3205 = vrot.lane.b32.xlu1 %v3204_v52, %s4932_s23  ;;  %3200 = vrot.lane.b32.xlu0 %v3815_v41, %s4935_s25 }
 0x543   : > { %v3231_v60 = vpop.permute.xlu2 %3230 }
 0x544   : > { %v3233_v61 = vunpack.i.h.bf16 %v3231_v60  ;;  %v3232_v62 = vunpack.i.l.bf16 %v3231_v60  ;;  %v1115_v60 = vadd.f32 %v3381_v56, %v1114_v59 }
 0x546   : > { %2702 = vmatpush.msrb.mxu1 %v3232_v62 }
 0x548   : > { %3220 = vrot.lane.b32.xlu1 %v3229_v51, %s4932_s23  ;;  %1068 = vrot.lane.b32.xlu0 %v1056_v22, %s3483_s3 }
 0x549   : > { %2703 = vmatpush.msrb.mxu1 %v3233_v61  ;;  %v3880_v61 = vsel %vm1116_vm6, %v3381_v56, %v1115_v60 }
 0x54a   : > { %4936 = vst [vmem:[#allocation13_spill] sm:$0xff] %v3880_v61 }
 0x550   : > { %3210 = vrot.lane.b32.xlu0 %v3204_v52, %s4935_s25 }
 0x558   : > { %3215 = vrot.lane.b32.xlu0 %v3204_v52, %s4934_s29 }
 0x560   : > { %3225 = vrot.lane.b32.xlu0 %v3229_v51, %s4935_s25 }
 0x5a2   : > { %v3847_v7 = vpop.permute.xlu1 %3175  ;;  %v3171_v8 = vpop.permute.xlu0 %3170 }
 0x5a3   : > { %v3172_v28 = vunpack.i.l.bf16 %v3171_v8  ;;  %v3173_v29 = vunpack.i.h.bf16 %v3171_v8  ;;  %v3177_v44 = vunpack.i.l.bf16 %v3847_v7  ;;  %v3178_v45 = vunpack.i.h.bf16 %v3847_v7 }
 0x5aa   : > { %v3196_v9 = vpop.permute.xlu1 %3195  ;;  %v3849_v10 = vpop.permute.xlu0 %3185 }
 0x5ab   : > { %v3197_v36 = vunpack.i.l.bf16 %v3196_v9  ;;  %v3198_v37 = vunpack.i.h.bf16 %v3196_v9  ;;  %v3187_v46 = vunpack.i.l.bf16 %v3849_v10  ;;  %v3188_v47 = vunpack.i.h.bf16 %v3849_v10 }
 0x5b2   : > { %v3206_v15 = vpop.permute.xlu1 %3205  ;;  %v3201_v16 = vpop.permute.xlu0 %3200 }
 0x5b3   : > { %v3207_v25 = vunpack.i.l.bf16 %v3206_v15  ;;  %v3208_v26 = vunpack.i.h.bf16 %v3206_v15  ;;  %v3202_v48 = vunpack.i.l.bf16 %v3201_v16  ;;  %v3203_v49 = vunpack.i.h.bf16 %v3201_v16 }
 0x5ba   : > { %v3221_v20 = vpop.permute.xlu1 %3220  ;;  %v1069_v21 = vpop.permute.xlu0 %1068 }
 0x5bb   : > { %v3222_v22 = vunpack.i.l.bf16 %v3221_v20  ;;  %v1075_v23 = vsel %vm1074_vm5, %v1073_v19, %v1069_v21  ;;  %v3223_v24 = vunpack.i.h.bf16 %v3221_v20  ;;  %v1139_v20 = vperm.slane %v702_v14, 1 }
 0x5bc   : > { %3032 = vmatmul.msk.f32.vlgmr.msra.gmra.mxu3 %vm712_vm0, %v1075_v23 }
 0x5bd   : > { %2014 = vmatpush.msrb.mxu3 %v3222_v22 }
 0x5bf   : > { %2015 = vmatpush.msrb.mxu3 %v3223_v24  ;;  %v3360_v24 = vld [vmem:[%s4862_s10] ss:$0 sm:$0xff] }
 0x5c1   : > { %2016 = vmatpush.msrb.mxu3 %v3207_v25 }
 0x5c2   : > { %v3211_v27 = vpop.permute.xlu0 %3210 }
 0x5c3   : > { %2017 = vmatpush.msrb.mxu3 %v3208_v26  ;;  %v3212_v42 = vunpack.i.l.bf16 %v3211_v27  ;;  %v3213_v43 = vunpack.i.h.bf16 %v3211_v27 }
 0x5c5   : > { %2018 = vmatpush.msrb.mxu3 %v3172_v28 }
 0x5c7   : > { %2019 = vmatpush.msrb.mxu3 %v3173_v29 }
 0x5c9   : > { %2020 = vmatpush.msrb.mxu3 %v3182_v0 }
 0x5ca   : > { %v3216_v30 = vpop.permute.xlu0 %3215 }
 0x5cb   : > { %v3217_v32 = vunpack.i.l.bf16 %v3216_v30  ;;  %2021 = vmatpush.msrb.mxu3 %v3183_v6  ;;  %v3218_v35 = vunpack.i.h.bf16 %v3216_v30 }
 0x5cd   : > { %2022 = vmatpush.msrb.mxu3 %v3192_v31  ;;  %2704 = vmatpush.msrb.mxu1 %v3217_v32 }
 0x5cf   : > { %2023 = vmatpush.msrb.mxu3 %v3193_v33  ;;  %2705 = vmatpush.msrb.mxu1 %v3218_v35 }
 0x5d1   : > { %2706 = vmatpush.msrb.mxu1 %v3197_v36 }
 0x5d2   : > { %v3226_v38 = vpop.permute.xlu0 %3225 }
 0x5d3   : > { %v3227_v39 = vunpack.i.l.bf16 %v3226_v38  ;;  %2707 = vmatpush.msrb.mxu1 %v3198_v37  ;;  %v3228_v40 = vunpack.i.h.bf16 %v3226_v38 }
 0x5d5   : > { %2358 = vmatpush.msrb.mxu2 %v3227_v39 }
 0x5d7   : > { %2359 = vmatpush.msrb.mxu2 %v3228_v40 }
 0x5d9   : > { %2360 = vmatpush.msrb.mxu2 %v3212_v42 }
 0x5db   : > { %2361 = vmatpush.msrb.mxu2 %v3213_v43 }
 0x5dd   : > { %2362 = vmatpush.msrb.mxu2 %v3177_v44 }
 0x5df   : > { %2363 = vmatpush.msrb.mxu2 %v3178_v45 }
 0x5e1   : > { %2364 = vmatpush.msrb.mxu2 %v3187_v46 }
 0x5e3   : > { %2365 = vmatpush.msrb.mxu2 %v3188_v47 }
 0x5e5   : > { %2366 = vmatpush.msrb.mxu2 %v3202_v48 }
 0x5e7   : > { %2367 = vmatpush.msrb.mxu2 %v3203_v49 }
 0x63f   : > { %v1104_v51 = vpop.f32.mrf.mxu3 }
 0x640   : > { %v1105_v52 = vadd.f32 %v3359_v50, %v1104_v51 }
 0x642   : > { %v1107_v53 = vadd.f32 %v1105_v52, %v3695_v4 }
 0x644   : > { %v1108_v54 = vsel %vm712_vm0, %v1107_v53, 0.0 }
 0x645   : > { %1109 = vadd.xlane.f32.xlu1 %v1108_v54 }
 0x6b8   : > { %v1110_v62 = vpop.xlane.xlu1 %1109 }
 0x6b9   : > { %v1118_v63 = vmul.f32 %v3880_v61, %v1110_v62 }
 0x6bb   : > { %v1119_v1 = vsub.f32 %v1107_v53, %v1118_v63 }
 0x6bd   : > { %v1120_v2 = vmul.f32 %v1119_v1, %v1119_v1 }
 0x6bf   : > { %v1121_v4 = vsel %vm712_vm0, %v1120_v2, 0.0 }
 0x6c0   : > { %1122 = vadd.xlane.f32.xlu2 %v1121_v4 }
 0x733   : > { %v1123_v3 = vpop.xlane.xlu2 %1122 }
 0x734   : > { %v1124_v7 = vmul.f32 %v1123_v3, %v3880_v61  ;;  %v4953_v61 = vmov 0  }
 0x736   : > { %v1125_v8 = vadd.f32 1e-05, %v1124_v7 }
 0x738   : > { %3382 = vrsqrt.f32 %v1125_v8  ;;  %vm1132_vm8 = vweird.f32 %v1125_v8 }
 0x73e   : > { %v3383_v9 = vpop.eup %3382 }
 0x73f   : > { %v1127_v10 = vmul.f32 %v3383_v9, %v1125_v8  ;;  %vm1133_vm7 = vweird.f32 %v3383_v9 }
 0x740   : > { %vm1134_vm9 = vmor %vm1132_vm8, %vm1133_vm7 }
 0x741   : > { %v1128_v12 = vmul.f32 %v3383_v9, %v1127_v10 }
 0x743   : > { %v1129_v13 = vmul.f32 0.5, %v1128_v12 }
 0x745   : > { %v1130_v15 = vsub.f32 1.5, %v1129_v13 }
 0x747   : > { %v1131_v16 = vmul.f32 %v3383_v9, %v1130_v15 }
 0x749   : > { %v1135_v18 = vsel %vm1134_vm9, %v3383_v9, %v1131_v16 }
 0x74a   : > { %v1136_v19 = vmul.f32 %v1135_v18, %v1119_v1 }
 0x74c   : > { %v1138_v21 = vmul.f32 %v1137_v17, %v1136_v19 }
 0x74e   : > { %v3888_v22 = vadd.f32 %v1139_v20, %v1138_v21 }
 0x750   : > { %4937 = vst [vmem:[#allocation14_spill] sm:$0xff] %v3888_v22  ;;  %v1141_v23 = vadd.f32 %v3888_v22, %v3697_v5  ;;  %v4901_v5 = vmov 1   ;;  %v4955_v22 = vmov 2  }
 0x751   : > { %3235 = vset.pattern.permute.xlu1 %v4901_v5  ;;  %3234 = vset.pattern.permute.xlu2 %v4901_v5 }
 0x752   : > { %3043 = vmatmul.msk.f32.vlgmr.msra.gmra.mxu2 %vm712_vm0, %v1141_v23 }
 0x7d5   : > { %v1335_v25 = vpop.f32.mrf.mxu2 }
 0x7d6   : > { %v3896_v26 = vadd.f32 %v3360_v24, %v1335_v25 }
 0x7d8   : > { %2253 = vrot.lane.b32.xlu1 %v3896_v26, %s3485_s5  ;;  %1584 = vrot.lane.b32.xlu2 %v3896_v26, %s3486_s27  ;;  %v2029_v27 = vsel %vm2028_vm10, %v3896_v26, -inf  ;;  %s4938_s27 = sld [smem:[#allocation43_spill]]  ;;  %v1675_v30 = vsel %vm1674_vm11, %v3896_v26, -inf  ;;  %v1361_v32 = vsel %vm1360_vm12, %v3896_v26, -inf  ;;  %v2373_v35 = vsel %vm2372_vm13, %v3896_v26, -inf }
 0x7d9   : > { %1455 = vrot.lane.b32.xlu0 %v3896_v26, %s3487_s28 }
 0x7de   : > { %s688_s28 = scalar_lea.vmem %s4938_s27, %s3685_s30  ;;  %s4965_s30 = smov 96  }
 0x7df   : > { %v701_v28 = vld [vmem:[%s688_s28] sm:$0xff] }
 0x7e0   : > { %2468 = vrot.lane.b32.xlu1 %v3896_v26, %s3488_s21  ;;  %1703 = vrot.lane.b32.xlu2 %v3896_v26, %s4932_s23  ;;  %v3919_v29 = vmul.f32 8.0, %v701_v28  ;;  %v3926_v36 = vmul.f32 4.0, %v701_v28  ;;  %s3498_s21 = smov 92  }
 0x7e1   : > { %1899 = vrot.lane.b32.xlu0 %v3896_v26, %s3489_s0  ;;  %s4976_s0 = smov 88  }
 0x7e2   : > { %v1390_v0 = vadd.f32 %v3919_v29, %v3896_v26 }
 0x7e4   : > { %v3045_v6 = vadd.f32 -0.5, %v1390_v0 }
 0x7e6   : > { %v1392_v31 = vfloor.f32 %v3045_v6 }
 0x7e8   : > { %1770 = vrot.lane.b32.xlu2 %v3896_v26, %s3490_s26  ;;  %v1408_v33 = vadd.f32 1.0, %v1392_v31  ;;  %v1393_v46 = vsub.f32 %v3045_v6, %v1392_v31  ;;  %s3069_s26 = sshll.u32 %s3641_s2, 3 }
 0x7e9   : > { %2401 = vrot.lane.b32.xlu0 %v3896_v26, %s4934_s29  ;;  %s2896_s23 = scalar_lea.hbm %s4872_s20, %s3069_s26 }
 0x7ea   : > { %v1401_v8 = vsub.f32 1.0, %v1393_v46 }
 0x7f0   : > { %2057 = vrot.lane.b32.xlu2 %v3896_v26, %s4935_s25  ;;  %s3497_s25 = smov 84  }
 0x7f1   : > { %2597 = vrot.lane.b32.xlu0 %v3896_v26, %s3491_s1 }
 0x7f8   : > { %2124 = vrot.lane.b32.xlu2 %v3896_v26, %s3492_s24 }
 0x80a   : > { %2030 = vmax.xlane.f32.xlu1 %v2029_v27 }
 0x81b   : > { %1676 = vmax.xlane.f32.xlu0 %v1675_v30 }
 0x821   : > { %1362 = vmax.xlane.f32.xlu2 %v1361_v32 }
 0x823   : > { %1435 = vperm.xlu1 %3235, %v1408_v33  }
 0x829   : > { %2374 = vmax.xlane.f32.xlu2 %v2373_v35  ;;  %v4896_v35 = vmov 2  }
 0x82f   : > { %1396 = vperm.xlu0 %3166, %v1392_v31  }
 0x832   : > { %v1585_v37 = vpop.permute.xlu2 %1584 }
 0x833   : > { %v1587_v38 = vadd.f32 %v1585_v37, %v3926_v36 }
 0x835   : > { %v3048_v39 = vadd.f32 -0.5, %v1587_v38  ;;  %v4890_v38 = vmov 3  }
 0x837   : > { %v3929_v40 = vfloor.f32 %v3048_v39  ;;  %1411 = vperm.xlu0 %3166, %v1408_v33  }
 0x839   : > { %v3932_v42 = vsub.f32 %v3048_v39, %v3929_v40 }
 0x83a   : > { %v1704_v43 = vpop.permute.xlu2 %1703 }
 0x83b   : > { %v1706_v44 = vadd.f32 %v1704_v43, %v3919_v29 }
 0x83d   : > { %v3050_v45 = vadd.f32 -0.5, %v1706_v44 }
 0x83f   : > { %v3935_v47 = vfloor.f32 %v3050_v45  ;;  %1418 = vperm.xlu0 %3166, %v1393_v46  }
 0x841   : > { %1424 = vperm.xlu2 %3234, %v1392_v31   ;;  %v3938_v48 = vsub.f32 %v3050_v45, %v3935_v47 }
 0x842   : > { %v1771_v49 = vpop.permute.xlu2 %1770 }
 0x843   : > { %v1773_v50 = vadd.f32 %v1771_v49, %v3919_v29  ;;  %v1836_v51 = vadd.f32 %v1771_v49, %v3926_v36 }
 0x845   : > { %v3051_v52 = vadd.f32 -0.5, %v1773_v50  ;;  %v3052_v53 = vadd.f32 -0.5, %v1836_v51  ;;  %v1338_v50 = vlaneseq }
 0x847   : > { %v3942_v54 = vfloor.f32 %v3051_v52  ;;  %v3944_v55 = vfloor.f32 %v3052_v53  ;;  %3236 = vset.pattern.permute.xlu0 %v4901_v5 }
 0x848   : > { %1441 = vperm.xlu0 %3236, %v1393_v46  }
 0x849   : > { %3239 = vset.pattern.permute.xlu2 %v4892_v11  ;;  %v3949_v56 = vsub.f32 %v3052_v53, %v3944_v55  ;;  %v3952_v57 = vsub.f32 %v3051_v52, %v3942_v54 }
 0x84a   : > { %v3954_v58 = vpop.permute.xlu1 %2253  ;;  %v2058_v59 = vpop.permute.xlu2 %2057 }
 0x84b   : > { %v2060_v60 = vadd.f32 %v2058_v59, %v3919_v29  ;;  %v1456_v62 = vpop.permute.xlu0 %1455  ;;  %v1339_v59 = vand.u32 127, %v1338_v50 }
 0x84c   : > { %v1458_v63 = vadd.f32 %v1456_v62, %v3919_v29  ;;  %v1521_v1 = vadd.f32 %v1456_v62, %v3926_v36 }
 0x84d   : > { %v3055_v2 = vadd.f32 -0.5, %v2060_v60 }
 0x84e   : > { %v3046_v4 = vadd.f32 -0.5, %v1458_v63  ;;  %v3047_v3 = vadd.f32 -0.5, %v1521_v1  ;;  %v4067_v63 = vcvt.s32.f32 %v1339_v59  ;;  %v1791_v59 = vadd.f32 1.0, %v3942_v54 }
 0x84f   : > { %v3959_v7 = vfloor.f32 %v3055_v2 }
 0x850   : > { %v3961_v9 = vfloor.f32 %v3046_v4  ;;  %v3963_v10 = vfloor.f32 %v3047_v3  ;;  %3237 = vset.pattern.permute.xlu0 %v4892_v11  ;;  %vm1341_vm14 = vcmp.ge.f32.partialorder %v4067_v63, 0.0  ;;  %vm1342_vm15 = vcmp.lt.f32.partialorder %v4067_v63, 64.0 }
 0x851   : > { %1404 = vperm.xlu0 %3237, %v1401_v8   ;;  %v3967_v12 = vsub.f32 %v3055_v2, %v3959_v7  ;;  %vm1343_vm2 = vmand %vm1341_vm14, %vm1342_vm15 }
 0x852   : > { %1492 = vperm.xlu1 %3235, %v3961_v9   ;;  %1464 = vperm.xlu2 %3239, %v3961_v9   ;;  %v3971_v13 = vpop.permute.xlu1 %2468  ;;  %v2125_v14 = vpop.permute.xlu2 %2124  ;;  %v3974_v15 = vsub.f32 %v3047_v3, %v3963_v10  ;;  %v3977_v16 = vsub.f32 %v3046_v4, %v3961_v9  ;;  %v1476_v2 = vadd.f32 1.0, %v3961_v9  ;;  %v1344_v3 = vmul.f32 0.125, %v4067_v63 }
 0x853   : > { %v2471_v17 = vadd.f32 %v3971_v13, %v3919_v29  ;;  %v2127_v18 = vadd.f32 %v2125_v14, %v3919_v29  ;;  %v2190_v19 = vadd.f32 %v2125_v14, %v3926_v36  ;;  %v1900_v20 = vpop.permute.xlu0 %1899  ;;  %v2534_v53 = vadd.f32 %v3971_v13, %v3926_v36 }
 0x854   : > { %v1902_v21 = vadd.f32 %v1900_v20, %v3926_v36  ;;  %v4080_v14 = vfloor.f32 %v1344_v3 }
 0x855   : > { %v3061_v23 = vadd.f32 -0.5, %v2471_v17  ;;  %v3056_v24 = vadd.f32 -0.5, %v2127_v18  ;;  %v3057_v25 = vadd.f32 -0.5, %v2190_v19  ;;  %v4065_v62 = vadd.f32 -0.5, %v2534_v53 }
 0x856   : > { %v3053_v27 = vadd.f32 -0.5, %v1902_v21  ;;  %v1346_v18 = vmul.f32 8.0, %v4080_v14  ;;  %v1539_v19 = vadd.f32 1.0, %v3963_v10 }
 0x857   : > { %v3984_v28 = vfloor.f32 %v3061_v23  ;;  %v3986_v0 = vfloor.f32 %v3056_v24  ;;  %v3988_v6 = vfloor.f32 %v3057_v25  ;;  %v4073_v4 = vfloor.f32 %v4065_v62 }
 0x858   : > { %v3990_v30 = vfloor.f32 %v3053_v27  ;;  %v1347_v20 = vsub.f32 %v4067_v63, %v1346_v18 }
 0x859   : > { %v3993_v31 = vsub.f32 %v3061_v23, %v3984_v28  ;;  %3238 = vset.pattern.permute.xlu0 %v4901_v5  ;;  %v3997_v32 = vsub.f32 %v3056_v24, %v3986_v0  ;;  %v4004_v37 = vsub.f32 %v3057_v25, %v3988_v6  ;;  %v4888_v24 = vmov 0.0  }
 0x85a   : > { %v4000_v33 = vsub.f32 %v3053_v27, %v3990_v30  ;;  %3240 = vset.pattern.permute.xlu1 %v4896_v35  ;;  %1430 = vperm.xlu0 %3238, %v1401_v8   ;;  %v4100_v23 = vsel %vm1343_vm2, %v1347_v20, -1e+09 }
 0x85b   : > { %3241 = vset.pattern.permute.xlu2 %v4890_v38  ;;  %v2402_v39 = vpop.permute.xlu0 %2401  ;;  %1527 = vperm.xlu1 %3240, %v3963_v10  }
 0x85c   : > { %v2404_v43 = vadd.f32 %v2402_v39, %v3919_v29  ;;  %1555 = vperm.xlu2 %3241, %v3963_v10   ;;  %v2256_v29 = vadd.f32 %v3954_v58, %v3926_v36 }
 0x85e   : > { %v3060_v44 = vadd.f32 -0.5, %v2404_v43  ;;  %v4049_v51 = vadd.f32 -0.5, %v2256_v29  ;;  %v4115_v29 = vadd.f32 1.0, %v3986_v0 }
 0x860   : > { %v4010_v45 = vfloor.f32 %v3060_v44  ;;  %v4059_v58 = vfloor.f32 %v4049_v51 }
 0x862   : > { %v4013_v46 = vsub.f32 %v3060_v44, %v4010_v45  ;;  %3242 = vset.pattern.permute.xlu0 %v4890_v38 }
 0x863   : > { %1593 = vperm.xlu1 %3240, %v3929_v40   ;;  %1621 = vperm.xlu0 %3242, %v3929_v40   ;;  %v2598_v49 = vpop.permute.xlu0 %2597 }
 0x864   : > { %3243 = vset.pattern.permute.xlu2 %v4892_v11  ;;  %v2600_v8 = vadd.f32 %v2598_v49, %v3926_v36 }
 0x865   : > { %1712 = vperm.xlu2 %3243, %v3935_v47  }
 0x866   : > { %v4083_v9 = vadd.f32 -0.5, %v2600_v8 }
 0x868   : > { %v4091_v36 = vfloor.f32 %v4083_v9 }
 0x86b   : > { %3245 = vset.pattern.permute.xlu1 %v4892_v11  ;;  %3244 = vset.pattern.permute.xlu0 %v4892_v11 }
 0x86c   : > { %2133 = vperm.xlu1 %3245, %v3986_v0   ;;  %1779 = vperm.xlu0 %3244, %v3942_v54  }
 0x86d   : > { %3248 = vset.pattern.permute.xlu2 %v4896_v35 }
 0x86e   : > { %1842 = vperm.xlu2 %3248, %v3944_v55  }
 0x874   : > { %3247 = vset.pattern.permute.xlu1 %v4901_v5  ;;  %2066 = vperm.xlu0 %3244, %v3959_v7  }
 0x875   : > { %1807 = vperm.xlu1 %3247, %v3942_v54  }
 0x876   : > { %3249 = vset.pattern.permute.xlu2 %v4901_v5 }
 0x877   : > { %2161 = vperm.xlu2 %3249, %v3986_v0  }
 0x87c   : > { %3246 = vset.pattern.permute.xlu0 %v4901_v5 }
 0x87d   : > { %3253 = vset.pattern.permute.xlu1 %v4890_v38  ;;  %1740 = vperm.xlu0 %3246, %v3935_v47   ;;  %v4108_v43 = vpop.xlane.xlu1 %2030 }
 0x87e   : > { %2224 = vperm.xlu1 %3253, %v3988_v6  }
 0x87f   : > { %3250 = vset.pattern.permute.xlu2 %v4896_v35 }
 0x880   : > { %2196 = vperm.xlu2 %3250, %v3988_v6  }
 0x885   : > { %2094 = vperm.xlu0 %3246, %v3959_v7  }
 0x886   : > { %3256 = vset.pattern.permute.xlu1 %v4892_v11 }
 0x887   : > { %2410 = vperm.xlu1 %3256, %v4010_v45  }
 0x888   : > { %3251 = vset.pattern.permute.xlu2 %v4890_v38 }
 0x889   : > { %1870 = vperm.xlu2 %3251, %v3944_v55  }
 0x88d   : > { %3254 = vset.pattern.permute.xlu0 %v4890_v38 }
 0x88e   : > { %1936 = vperm.xlu0 %3254, %v3990_v30   ;;  %v4062_v60 = vpop.xlane.xlu0 %1676 }
 0x88f   : > { %2477 = vperm.xlu1 %3256, %v3984_v28  }
 0x891   : > { %3252 = vset.pattern.permute.xlu2 %v4896_v35 }
 0x892   : > { %1908 = vperm.xlu2 %3252, %v3990_v30  }
 0x894   : > { %v4051_v52 = vpop.xlane.xlu2 %1362 }
 0x895   : > { %v1436_v50 = vpop.permute.xlu1 %1435 }
 0x896   : > { %3257 = vset.pattern.permute.xlu0 %v4901_v5  ;;  %vm1438_vm7 = vcmp.eq.f32.partialorder %v4080_v14, %v1436_v50 }
 0x897   : > { %3258 = vset.pattern.permute.xlu1 %v4901_v5  ;;  %2438 = vperm.xlu0 %3257, %v4010_v45  }
 0x898   : > { %2505 = vperm.xlu1 %3258, %v3984_v28  }
 0x89a   : > { %2262 = vperm.xlu2 %3252, %v4059_v58  }
 0x89c   : > { %v4069_v1 = vpop.xlane.xlu2 %2374 }
 0x89f   : > { %1503 = vperm.xlu0 %3257, %v1476_v2  }
 0x8a0   : > { %3260 = vset.pattern.permute.xlu1 %v4890_v38 }
 0x8a1   : > { %v1397_v13 = vpop.permute.xlu0 %1396  ;;  %2568 = vperm.xlu1 %3260, %v4073_v4  }
 0x8a2   : > { %3255 = vset.pattern.permute.xlu2 %v4890_v38  ;;  %vm1399_vm6 = vcmp.eq.f32.partialorder %v4100_v23, %v1397_v13  ;;  %v1439_v13 = vsel %vm1438_vm7, 1.0, %v4888_v24 }
 0x8a3   : > { %2290 = vperm.xlu2 %3255, %v4059_v58   ;;  %v1400_v0 = vsel %vm1399_vm6, 1.0, %v4888_v24 }
 0x8a4   : > { %v1425_v17 = vpop.permute.xlu2 %1424 }
 0x8a5   : > { %vm1427_vm8 = vcmp.eq.f32.partialorder %v4080_v14, %v1425_v17 }
 0x8a6   : > { %v1428_v20 = vsel %vm1427_vm8, 1.0, %v4888_v24 }
 0x8a7   : > { %3266 = vset.pattern.permute.xlu0 %v4896_v35 }
 0x8a8   : > { %1542 = vperm.xlu0 %3266, %v1539_v19  }
 0x8a9   : > { %3261 = vset.pattern.permute.xlu1 %v4896_v35  ;;  %v1412_v21 = vpop.permute.xlu0 %1411 }
 0x8aa   : > { %2606 = vperm.xlu1 %3261, %v4091_v36   ;;  %vm1414_vm3 = vcmp.eq.f32.partialorder %v4100_v23, %v1412_v21 }
 0x8ab   : > { %3259 = vset.pattern.permute.xlu2 %v4896_v35  ;;  %v1415_v25 = vsel %vm1414_vm3, 1.0, %v4888_v24  ;;  %v1854_v24 = vadd.f32 1.0, %v3944_v55  ;;  %v2618_v55 = vadd.f32 1.0, %v4091_v36 }
 0x8ac   : > { %2540 = vperm.xlu2 %3259, %v4073_v4   ;;  %v4098_v10 = vpop.permute.xlu2 %1464 }
 0x8b0   : > { %3269 = vset.pattern.permute.xlu0 %v4890_v38 }
 0x8b1   : > { %v1419_v27 = vpop.permute.xlu0 %1418  ;;  %1572 = vperm.xlu0 %3269, %v3974_v15  }
 0x8b2   : > { %v1421_v39 = vmul.f32 %v1419_v27, %v1415_v25  ;;  %3262 = vset.pattern.permute.xlu1 %v4890_v38 }
 0x8b3   : > { %2634 = vperm.xlu1 %3262, %v4091_v36  }
 0x8b4   : > { %3264 = vset.pattern.permute.xlu2 %v4892_v11 }
 0x8b5   : > { %1486 = vperm.xlu2 %3264, %v3977_v16  }
 0x8b6   : > { %v4112_v44 = vpop.permute.xlu2 %1555 }
 0x8b9   : > { %3274 = vset.pattern.permute.xlu0 %v4892_v11 }
 0x8ba   : > { %v1442_v49 = vpop.permute.xlu0 %1441  ;;  %2148 = vperm.xlu0 %3274, %v4115_v29  }
 0x8bb   : > { %3263 = vset.pattern.permute.xlu1 %v4892_v11  ;;  %v1444_v21 = vmul.f32 %v1442_v49, %v1439_v13  ;;  %v1724_v13 = vadd.f32 1.0, %v3935_v47 }
 0x8bc   : > { %1479 = vperm.xlu1 %3263, %v1476_v2  }
 0x8bd   : > { %3268 = vset.pattern.permute.xlu2 %v4890_v38 }
 0x8be   : > { %1566 = vperm.xlu2 %3268, %v1539_v19  }
 0x8bf   : > { %v4121_v53 = vpop.permute.xlu2 %1712 }
 0x8c2   : > { %3277 = vset.pattern.permute.xlu0 %v4901_v5 }
 0x8c3   : > { %1818 = vperm.xlu0 %3277, %v1791_v59   ;;  %v1405_v3 = vpop.permute.xlu0 %1404 }
 0x8c4   : > { %v1407_v8 = vmul.f32 %v1405_v3, %v1400_v0  ;;  %3265 = vset.pattern.permute.xlu1 %v4901_v5  ;;  %v4128_v18 = vpop.permute.xlu1 %1492  ;;  %v2078_v3 = vadd.f32 1.0, %v3959_v7 }
 0x8c5   : > { %1509 = vperm.xlu1 %3265, %v3977_v16  }
 0x8c6   : > { %3270 = vset.pattern.permute.xlu2 %v4896_v35  ;;  %v4132_v2 = vadd.f32 %v1421_v39, %v1407_v8  ;;  %v1605_v39 = vadd.f32 1.0, %v3929_v40  ;;  %v2208_v8 = vadd.f32 1.0, %v3988_v6  ;;  %v4176_v6 = vsub.f32 %v4049_v51, %v4059_v58 }
 0x8c7   : > { %1615 = vperm.xlu2 %3270, %v3932_v42  }
 0x8c8   : > { %4939 = vst [vmem:[#allocation15_spill] sm:$0xff] %v4132_v2  ;;  %v4135_v54 = vpop.permute.xlu2 %1842  ;;  %v4958_v2 = vmov 3  }
 0x8c9   : > { %4940 = vst [vmem:[#allocation16_spill] sm:$0xff] %v4135_v54  ;;  %v1920_v54 = vadd.f32 1.0, %v3990_v30 }
 0x8cb   : > { %3281 = vset.pattern.permute.xlu0 %v4892_v11 }
 0x8cc   : > { %2155 = vperm.xlu0 %3281, %v3997_v32   ;;  %v1431_v19 = vpop.permute.xlu0 %1430 }
 0x8cd   : > { %v1433_v25 = vmul.f32 %v1431_v19, %v1428_v20  ;;  %3267 = vset.pattern.permute.xlu1 %v4896_v35  ;;  %v4144_v27 = vpop.permute.xlu1 %1527 }
 0x8ce   : > { %1549 = vperm.xlu1 %3267, %v3974_v15  }
 0x8cf   : > { %v4148_v17 = vadd.f32 %v1444_v21, %v1433_v25  ;;  %3271 = vset.pattern.permute.xlu2 %v4890_v38 }
 0x8d0   : > { %1632 = vperm.xlu2 %3271, %v1605_v39  }
 0x8d1   : > { %4941 = vst [vmem:[#allocation17_spill] sm:$0xff] %v4148_v17  ;;  %v4151_v50 = vpop.permute.xlu2 %2161 }
 0x8d4   : > { %3284 = vset.pattern.permute.xlu0 %v4896_v35 }
 0x8d5   : > { %v4154_v0 = vpop.permute.xlu1 %1593  ;;  %1864 = vperm.xlu0 %3284, %v3949_v56   ;;  %v4157_v49 = vpop.permute.xlu0 %1621 }
 0x8d6   : > { %4942 = vst [vmem:[#allocation18_spill] sm:$0xff] %v4157_v49  ;;  %1608 = vperm.xlu1 %3267, %v1605_v39   ;;  %v2489_v39 = vadd.f32 1.0, %v3984_v28 }
 0x8d8   : > { %3273 = vset.pattern.permute.xlu2 %v4892_v11 }
 0x8d9   : > { %2081 = vperm.xlu2 %3273, %v2078_v3  }
 0x8da   : > { %v4161_v40 = vpop.permute.xlu2 %2196 }
 0x8db   : > { %4943 = vst [vmem:[#allocation19_spill] sm:$0xff] %v4161_v40 }
 0x8dd   : > { %3289 = vset.pattern.permute.xlu0 %v4890_v38 }
 0x8de   : > { %3272 = vset.pattern.permute.xlu1 %v4892_v11  ;;  %v4167_v19 = vpop.permute.xlu1 %2133  ;;  %2235 = vperm.xlu0 %3289, %v2208_v8   ;;  %v4169_v20 = vpop.permute.xlu0 %1779 }
 0x8df   : > { %4944 = vst [vmem:[#allocation20_spill] sm:$0xff] %v4167_v19  ;;  %1727 = vperm.xlu1 %3272, %v1724_v13  }
 0x8e0   : > { %4945 = vst [vmem:[#allocation21_spill] sm:$0xff] %v4169_v20  ;;  %v2274_v20 = vadd.f32 1.0, %v4059_v58  ;;  %v4293_v58 = vsub.f32 %v4065_v62, %v4073_v4 }
 0x8e1   : > { %3275 = vset.pattern.permute.xlu2 %v4901_v5 }
 0x8e2   : > { %1751 = vperm.xlu2 %3275, %v1724_v13  }
 0x8e3   : > { %v4172_v7 = vpop.permute.xlu2 %1870 }
 0x8e4   : > { %4946 = vst [vmem:[#allocation22_spill] sm:$0xff] %v4172_v7  ;;  %v4907_v7 = vsub.f32 1.0, %v4000_v33 }
 0x8e6   : > { %3294 = vset.pattern.permute.xlu0 %v4896_v35  ;;  %v4179_v47 = vpop.permute.xlu0 %2066 }
 0x8e7   : > { %1794 = vperm.xlu1 %3272, %v1791_v59   ;;  %v4181_v21 = vpop.permute.xlu1 %1807  ;;  %2284 = vperm.xlu0 %3294, %v4176_v6  }
 0x8e8   : > { %4947 = vst [vmem:[#allocation23_spill] sm:$0xff] %v4181_v21 }
 0x8ea   : > { %3276 = vset.pattern.permute.xlu2 %v4892_v11 }
 0x8eb   : > { %1801 = vperm.xlu2 %3276, %v3952_v57  }
 0x8ec   : > { %v4186_v25 = vpop.permute.xlu2 %1908 }
 0x8ed   : > { %4948 = vst [vmem:[#allocation24_spill] sm:$0xff] %v4186_v25 }
 0x8ef   : > { %1734 = vperm.xlu1 %3272, %v3938_v48   ;;  %3297 = vset.pattern.permute.xlu0 %v4892_v11  ;;  %v4191_v51 = vpop.permute.xlu0 %1740 }
 0x8f0   : > { %v4193_v13 = vpop.permute.xlu1 %2224  ;;  %2492 = vperm.xlu0 %3297, %v2489_v39  }
 0x8f3   : > { %3280 = vset.pattern.permute.xlu2 %v4901_v5 }
 0x8f4   : > { %2105 = vperm.xlu2 %3280, %v2078_v3   ;;  %v4196_v59 = vpop.permute.xlu2 %2262 }
 0x8f5   : > { %4949 = vst [vmem:[#allocation25_spill] sm:$0xff] %v4196_v59  ;;  %v4903_v59 = vsub.f32 1.0, %v3977_v16 }
 0x8f7   : > { %3278 = vset.pattern.permute.xlu1 %v4896_v35  ;;  %v4200_v38 = vpop.permute.xlu0 %2094 }
 0x8f8   : > { %4950 = vst [vmem:[#allocation26_spill] sm:$0xff] %v4200_v38  ;;  %1857 = vperm.xlu1 %3278, %v1854_v24   ;;  %3301 = vset.pattern.permute.xlu0 %v4901_v5 }
 0x8f9   : > { %v4203_v28 = vpop.permute.xlu1 %2410  ;;  %2516 = vperm.xlu0 %3301, %v2489_v39  }
 0x8fa   : > { %4951 = vst [vmem:[#allocation27_spill] sm:$0xff] %v4203_v28  ;;  %v4960_v28 = vmov 1  }
 0x8fc   : > { %1757 = vperm.xlu2 %3280, %v3938_v48  }
 0x8fd   : > { %v4206_v11 = vpop.permute.xlu2 %2290 }
 0x8fe   : > { %4952 = vst [vmem:[#allocation28_spill] sm:$0xff] %v4206_v11 }
 0x900   : > { %3279 = vset.pattern.permute.xlu1 %v4953_v61  ;;  %v4209_v3 = vpop.permute.xlu0 %1936 }
 0x901   : > { %2088 = vperm.xlu1 %3279, %v3967_v12   ;;  %v4213_v35 = vpop.permute.xlu1 %2477  ;;  %3306 = vset.pattern.permute.xlu0 %v4955_v22 }
 0x902   : > { %4954 = vst [vmem:[#allocation29_spill] sm:$0xff] %v4213_v35  ;;  %2621 = vperm.xlu0 %3306, %v2618_v55  }
 0x904   : > { %1824 = vperm.xlu2 %3280, %v3952_v57  }
 0x906   : > { %v4217_v39 = vpop.permute.xlu2 %2540 }
 0x909   : > { %3282 = vset.pattern.permute.xlu1 %v4901_v5  ;;  %v4220_v17 = vpop.permute.xlu0 %2438 }
 0x90a   : > { %4956 = vst [vmem:[#allocation30_spill] sm:$0xff] %v4220_v17  ;;  %2172 = vperm.xlu1 %3282, %v4115_v29   ;;  %v4223_v41 = vpop.permute.xlu1 %2505  ;;  %3308 = vset.pattern.permute.xlu0 %v4958_v2  ;;  %v3044_v29 = vadd.f32 -64.0, %v4067_v63 }
 0x90b   : > { %4957 = vst [vmem:[#allocation31_spill] sm:$0xff] %v4223_v41  ;;  %2645 = vperm.xlu0 %3308, %v2618_v55  }
 0x90c   : > { %2178 = vperm.xlu2 %3280, %v3997_v32   ;;  %v1354_v5 = vmul.f32 0.25, %v3044_v29  ;;  %vm1351_vm12 = vcmp.ge.f32.partialorder %v3044_v29, 0.0  ;;  %vm1352_vm13 = vcmp.lt.f32.partialorder %v3044_v29, 16.0 }
 0x90d   : > { %vm1353_vm14 = vmand %vm1351_vm12, %vm1352_vm13 }
 0x90e   : > { %v4248_v63 = vfloor.f32 %v1354_v5 }
 0x90f   : > { %v1487_v34 = vpop.permute.xlu2 %1486 }
 0x911   : > { %v1504_v35 = vpop.permute.xlu0 %1503 }
 0x912   : > { %3283 = vset.pattern.permute.xlu1 %v4955_v22  ;;  %vm1506_vm11 = vcmp.eq.f32.partialorder %v4080_v14, %v1504_v35 }
 0x913   : > { %2211 = vperm.xlu1 %3283, %v2208_v8   ;;  %v4229_v40 = vpop.permute.xlu1 %2568  ;;  %3309 = vset.pattern.permute.xlu0 %v4953_v61  ;;  %v4905_v8 = vsub.f32 1.0, %v3938_v48 }
 0x914   : > { %3288 = vset.pattern.permute.xlu2 %v4955_v22  ;;  %1472 = vperm.xlu0 %3309, %v4903_v59  }
 0x915   : > { %2218 = vperm.xlu2 %3288, %v4004_v37  }
 0x918   : > { %v1567_v55 = vpop.permute.xlu2 %1566 }
 0x919   : > { %vm1569_vm9 = vcmp.eq.f32.partialorder %v4248_v63, %v1567_v55 }
 0x91a   : > { %v4237_v41 = vpop.permute.xlu0 %1542 }
 0x91b   : > { %3285 = vset.pattern.permute.xlu1 %v4958_v2 }
 0x91c   : > { %1881 = vperm.xlu1 %3285, %v1854_v24   ;;  %v4241_v17 = vpop.permute.xlu1 %2606  ;;  %3315 = vset.pattern.permute.xlu0 %v4960_v28  ;;  %v4961_v24 = vmov 0.0  }
 0x91d   : > { %4959 = vst [vmem:[#allocation32_spill] sm:$0xff] %v4241_v17  ;;  %3293 = vset.pattern.permute.xlu2 %v4958_v2  ;;  %1746 = vperm.xlu0 %3315, %v4905_v8   ;;  %v1570_v21 = vsel %vm1569_vm9, 1.0, %v4961_v24  ;;  %v4904_v17 = vsub.f32 1.0, %v3997_v32 }
 0x91e   : > { %1947 = vperm.xlu2 %3293, %v1920_v54  }
 0x921   : > { %v4251_v59 = vpop.permute.xlu2 %1615 }
 0x923   : > { %v1573_v11 = vpop.permute.xlu0 %1572 }
 0x924   : > { %v4255_v25 = vmul.f32 %v1573_v11, %v1570_v21  ;;  %3286 = vset.pattern.permute.xlu1 %v4955_v22  ;;  %v4906_v11 = vsub.f32 1.0, %v4004_v37 }
 0x925   : > { %1923 = vperm.xlu1 %3286, %v1920_v54   ;;  %v4258_v30 = vpop.permute.xlu1 %2634  ;;  %2167 = vperm.xlu0 %3315, %v4904_v17  }
 0x926   : > { %4962 = vst [vmem:[#allocation33_spill] sm:$0xff] %v4258_v30  ;;  %2241 = vperm.xlu2 %3293, %v4004_v37   ;;  %v1356_v30 = vmul.f32 4.0, %v4248_v63 }
 0x928   : > { %v1357_v35 = vsub.f32 %v3044_v29, %v1356_v30 }
 0x92a   : > { %v4263_v5 = vpop.permute.xlu2 %1632 }
 0x92c   : > { %v2149_v55 = vpop.permute.xlu0 %2148 }
 0x92d   : > { %3287 = vset.pattern.permute.xlu1 %v4960_v28  ;;  %3321 = vset.pattern.permute.xlu0 %v4958_v2  ;;  %vm2151_vm15 = vcmp.eq.f32.partialorder %v4100_v23, %v2149_v55 }
 0x92e   : > { %1638 = vperm.xlu2 %3293, %v3932_v42   ;;  %2111 = vperm.xlu1 %3287, %v3967_v12   ;;  %v1480_v54 = vpop.permute.xlu1 %1479  ;;  %v2152_v29 = vsel %vm2151_vm15, 1.0, %v4961_v24  ;;  %vm1635_vm15 = vcmp.eq.f32.partialorder %v4248_v63, %v4263_v5 }
 0x92f   : > { %vm1482_vm10 = vcmp.eq.f32.partialorder %v4100_v23, %v1480_v54  ;;  %2230 = vperm.xlu0 %3321, %v4906_v11   ;;  %v1507_v54 = vsel %vm1506_vm11, 1.0, %v4961_v24  ;;  %v4296_v11 = vsel %vm1353_vm14, %v1357_v35, -1e+09  ;;  %vm1467_vm14 = vcmp.eq.f32.partialorder %v4100_v23, %v4098_v10 }
 0x930   : > { %v1483_v21 = vsel %vm1482_vm10, 1.0, %v4961_v24  ;;  %vm1545_vm2 = vcmp.eq.f32.partialorder %v4296_v11, %v4237_v41 }
 0x931   : > { %v4274_v17 = vmul.f32 %v1487_v34, %v1483_v21  ;;  %v1546_v41 = vsel %vm1545_vm2, 1.0, %v4961_v24 }
 0x933   : > { %v4276_v8 = vpop.permute.xlu2 %2081 }
 0x934   : > { %vm2084_vm11 = vcmp.eq.f32.partialorder %v4100_v23, %v4276_v8  ;;  %v4971_v8 = vsub.f32 1.0, %v3977_v16 }
 0x935   : > { %v4280_v19 = vpop.permute.xlu0 %1818 }
 0x936   : > { %1953 = vperm.xlu2 %3293, %v4000_v33   ;;  %3290 = vset.pattern.permute.xlu1 %v4955_v22  ;;  %vm1821_vm8 = vcmp.eq.f32.partialorder %v4080_v14, %v4280_v19 }
 0x937   : > { %1942 = vperm.xlu0 %3321, %v4907_v7   ;;  %2277 = vperm.xlu1 %3290, %v2274_v20   ;;  %v1510_v34 = vpop.permute.xlu1 %1509  ;;  %v2422_v7 = vadd.f32 1.0, %v4010_v45 }
 0x938   : > { %v4289_v21 = vmul.f32 %v1510_v34, %v1507_v54  ;;  %v2545_v34 = vsub.f32 1.0, %v4293_v58  ;;  %v1364_v54 = vsub.f32 %v3896_v26, %v4051_v52 }
 0x93a   : > { %v1365_v49 = vmul.f32 1.442695, %v1364_v54 }
 0x93c   : > { %v1752_v38 = vpop.permute.xlu2 %1751  ;;  %3384 = vpow2.f32 %v1365_v49 }
 0x93d   : > { %vm1754_vm6 = vcmp.eq.f32.partialorder %v4080_v14, %v1752_v38 }
 0x93e   : > { %3296 = vset.pattern.permute.xlu2 %v4953_v61  ;;  %v2156_v30 = vpop.permute.xlu0 %2155  ;;  %v1755_v49 = vsel %vm1754_vm6, 1.0, %v4961_v24 }
 0x93f   : > { %3326 = vset.pattern.permute.xlu0 %v4955_v22  ;;  %v4305_v62 = vmul.f32 %v2156_v30, %v2152_v29  ;;  %2425 = vperm.xlu2 %3296, %v2422_v7  }
 0x940   : > { %3291 = vset.pattern.permute.xlu1 %v4958_v2  ;;  %2548 = vperm.xlu0 %3326, %v2545_v34   ;;  %v1550_v55 = vpop.permute.xlu1 %1549 }
 0x941   : > { %4963 = vst [vmem:[#allocation34_spill] sm:$0xff] %v4305_v62  ;;  %1887 = vperm.xlu1 %3291, %v3949_v56   ;;  %v4310_v45 = vmul.f32 %v1550_v55, %v1546_v41  ;;  %v2376_v55 = vsub.f32 %v3896_v26, %v4069_v1 }
 0x943   : > { %v2377_v54 = vmul.f32 1.442695, %v2376_v55 }
 0x945   : > { %v1802_v35 = vpop.permute.xlu2 %1801  ;;  %3386 = vpow2.f32 %v2377_v54  ;;  %v1822_v54 = vsel %vm1821_vm8, 1.0, %v4961_v24 }
 0x947   : > { %3299 = vset.pattern.permute.xlu2 %v4960_v28  ;;  %v1865_v29 = vpop.permute.xlu0 %1864 }
 0x948   : > { %3327 = vset.pattern.permute.xlu0 %v4958_v2  ;;  %2449 = vperm.xlu2 %3299, %v2422_v7   ;;  %v1609_v30 = vpop.permute.xlu1 %1608  ;;  %v4327_v7 = vpop.eup %3384 }
 0x949   : > { %3292 = vset.pattern.permute.xlu1 %v4955_v22  ;;  %vm1611_vm3 = vcmp.eq.f32.partialorder %v4296_v11, %v1609_v30  ;;  %2574 = vperm.xlu0 %3327, %v2545_v34   ;;  %4964 = vst [vmem:[#allocation35_spill] sm:$0xff] %v4327_v7 }
 0x94a   : > { %v1612_v52 = vsel %vm1611_vm3, 1.0, %v4961_v24  ;;  %1930 = vperm.xlu1 %3292, %v4000_v33   ;;  %vm1743_vm3 = vcmp.eq.f32.partialorder %v4080_v14, %v4191_v51  ;;  %v4972_v51 = vsub.f32 1.0, %v3938_v48  ;;  %v4973_v48 = vsub.f32 1.0, %v3997_v32 }
 0x94b   : > { %v4323_v41 = vmul.f32 %v4251_v59, %v1612_v52  ;;  %v4340_v55 = vpop.eup %3386 }
 0x94c   : > { %4966 = vst [vmem:[#allocation36_spill] sm:$0xff] %v4340_v55 }
 0x94e   : > { %v4325_v62 = vpop.permute.xlu2 %2105 }
 0x94f   : > { %vm2108_vm8 = vcmp.eq.f32.partialorder %v4080_v14, %v4325_v62 }
 0x950   : > { %3300 = vset.pattern.permute.xlu2 %v4953_v61  ;;  %v4330_v30 = vpop.permute.xlu0 %2235 }
 0x951   : > { %2499 = vperm.xlu2 %3300, %v3993_v31   ;;  %1368 = vrot.lane.b32.xlu0 %v4327_v7, %s4965_s30  ;;  %v1728_v1 = vpop.permute.xlu1 %1727  ;;  %vm2238_vm12 = vcmp.eq.f32.partialorder %v4248_v63, %v4330_v30  ;;  %v1532_v30 = vsub.f32 1.0, %v3974_v15  ;;  %v1636_v15 = vsel %vm1635_vm15, 1.0, %v4961_v24  ;;  %vm2571_vm15 = vcmp.eq.f32.partialorder %v4248_v63, %v4229_v40 }
 0x952   : > { %3295 = vset.pattern.permute.xlu1 %v4958_v2  ;;  %vm1730_vm9 = vcmp.eq.f32.partialorder %v4100_v23, %v1728_v1  ;;  %v2415_v40 = vsub.f32 1.0, %v4013_v46 }
 0x953   : > { %2301 = vperm.xlu1 %3295, %v2274_v20   ;;  %v1731_v19 = vsel %vm1730_vm9, 1.0, %v4961_v24  ;;  %vm2227_vm9 = vcmp.eq.f32.partialorder %v4248_v63, %v4193_v13 }
 0x956   : > { %v1758_v59 = vpop.permute.xlu2 %1757 }
 0x957   : > { %v4338_v34 = vmul.f32 %v1758_v59, %v1755_v49  ;;  %v4358_v59 = vsub.f32 %v4083_v9, %v4091_v36 }
 0x959   : > { %3304 = vset.pattern.permute.xlu2 %v4955_v22  ;;  %2380 = vrot.lane.b32.xlu0 %v4340_v55, %s3497_s25  ;;  %v1795_v52 = vpop.permute.xlu1 %1794  ;;  %v4344_v7 = vpop.permute.xlu0 %2284 }
 0x95a   : > { %4967 = vst [vmem:[#allocation37_spill] sm:$0xff] %v4344_v7  ;;  %vm1797_vm7 = vcmp.eq.f32.partialorder %v4100_v23, %v1795_v52  ;;  %2562 = vperm.xlu2 %3304, %v4293_v58   ;;  %v2552_v7 = vadd.f32 1.0, %v4073_v4 }
 0x95b   : > { %v1798_v38 = vsel %vm1797_vm7, 1.0, %v4961_v24  ;;  %2307 = vperm.xlu1 %3295, %v4176_v6   ;;  %vm2164_vm7 = vcmp.eq.f32.partialorder %v4080_v14, %v4151_v50 }
 0x95c   : > { %v4352_v20 = vmul.f32 %v1802_v35, %v1798_v38 }
 0x95e   : > { %4968 = vst [vmem:[#allocation38_spill] sm:$0xff] %v4352_v20  ;;  %v1825_v49 = vpop.permute.xlu2 %1824 }
 0x95f   : > { %v4360_v52 = vmul.f32 %v1825_v49, %v1822_v54 }
 0x961   : > { %4969 = vst [vmem:[#allocation39_spill] sm:$0xff] %v4360_v52  ;;  %2651 = vperm.xlu0 %3327, %v4358_v59   ;;  %v1735_v55 = vpop.permute.xlu1 %1734 }
 0x962   : > { %v4365_v35 = vmul.f32 %v1735_v55, %v1731_v19  ;;  %3305 = vset.pattern.permute.xlu2 %v4958_v2  ;;  %v4368_v1 = vpop.permute.xlu0 %2492  ;;  %v2085_v19 = vsel %vm2084_vm11, 1.0, %v4961_v24 }
 0x963   : > { %3298 = vset.pattern.permute.xlu1 %v4953_v61  ;;  %2579 = vperm.xlu2 %3305, %v2552_v7   ;;  %vm2495_vm11 = vcmp.eq.f32.partialorder %v4100_v23, %v4368_v1  ;;  %v1847_v1 = vsub.f32 1.0, %v3949_v56  ;;  %v4974_v56 = vsub.f32 1.0, %v4004_v37 }
 0x964   : > { %2432 = vperm.xlu1 %3298, %v4013_v46  }
 0x966   : > { %v2179_v9 = vpop.permute.xlu2 %2178 }
 0x96a   : > { %v1858_v36 = vpop.permute.xlu1 %1857 }
 0x96b   : > { %vm1860_vm10 = vcmp.eq.f32.partialorder %v4296_v11, %v1858_v36  ;;  %2585 = vperm.xlu2 %3305, %v4293_v58   ;;  %v4374_v38 = vpop.permute.xlu0 %2516 }
 0x96c   : > { %v1861_v4 = vsel %vm1860_vm10, 1.0, %v4961_v24  ;;  %3302 = vset.pattern.permute.xlu1 %v4955_v22  ;;  %vm1939_vm10 = vcmp.eq.f32.partialorder %v4248_v63, %v4209_v3 }
 0x96d   : > { %v4378_v55 = vmul.f32 %v1865_v29, %v1861_v4  ;;  %2555 = vperm.xlu1 %3302, %v2552_v7  }
 0x96f   : > { %4970 = vst [vmem:[#allocation40_spill] sm:$0xff] %v4378_v55  ;;  %v2219_v54 = vpop.permute.xlu2 %2218  ;;  %v2239_v55 = vsel %vm2238_vm12, 1.0, %v4961_v24  ;;  %vm2543_vm12 = vcmp.eq.f32.partialorder %v4296_v11, %v4217_v39 }
 0x973   : > { %3307 = vset.pattern.permute.xlu2 %v4955_v22  ;;  %v2089_v49 = vpop.permute.xlu1 %2088 }
 0x974   : > { %v4384_v36 = vmul.f32 %v2089_v49, %v2085_v19  ;;  %2628 = vperm.xlu2 %3307, %v4358_v59   ;;  %v4387_v58 = vpop.permute.xlu0 %2621 }
 0x975   : > { %3303 = vset.pattern.permute.xlu1 %v4960_v28 }
 0x976   : > { %2455 = vperm.xlu1 %3303, %v4013_v46   ;;  %v1678_v46 = vsub.f32 %v3896_v26, %v4062_v60 }
 0x978   : > { %v1948_v29 = vpop.permute.xlu2 %1947 }
 0x979   : > { %vm1950_vm6 = vcmp.eq.f32.partialorder %v4248_v63, %v1948_v29 }
 0x97c   : > { %3310 = vset.pattern.permute.xlu2 %v4960_v28  ;;  %v2173_v7 = vpop.permute.xlu1 %2172 }
 0x97d   : > { %vm2175_vm13 = vcmp.eq.f32.partialorder %v4080_v14, %v2173_v7  ;;  %1498 = vperm.xlu2 %3310, %v4971_v8   ;;  %v4397_v4 = vpop.permute.xlu0 %2645  ;;  %v1468_v7 = vsel %vm1467_vm14, 1.0, %v4961_v24 }
 0x97e   : > { %v2176_v49 = vsel %vm2175_vm13, 1.0, %v4961_v24  ;;  %2522 = vperm.xlu1 %3303, %v3993_v31  }
 0x97f   : > { %v2181_v19 = vmul.f32 %v2179_v9, %v2176_v49 }
 0x980   : > { %v2242_v52 = vpop.permute.xlu2 %2241 }
 0x981   : > { %v2244_v20 = vmul.f32 %v2242_v52, %v2239_v55 }
 0x985   : > { %3311 = vset.pattern.permute.xlu2 %v4955_v22  ;;  %v2212_v16 = vpop.permute.xlu1 %2211 }
 0x986   : > { %3312 = vset.pattern.permute.xlu1 %v4958_v2  ;;  %vm2214_vm2 = vcmp.eq.f32.partialorder %v4296_v11, %v2212_v16  ;;  %1535 = vperm.xlu2 %3311, %v1532_v30   ;;  %v1473_v9 = vpop.permute.xlu0 %1472  ;;  %v1598_v16 = vsub.f32 1.0, %v3932_v42  ;;  %v1784_v42 = vsub.f32 1.0, %v3952_v57  ;;  %v2071_v57 = vsub.f32 1.0, %v3967_v12 }
 0x987   : > { %v2215_v52 = vsel %vm2214_vm2, 1.0, %v4961_v24  ;;  %1561 = vperm.xlu1 %3312, %v1532_v30   ;;  %v1475_v10 = vmul.f32 %v1473_v9, %v1468_v7  ;;  %v1940_v12 = vsel %vm1939_vm10, 1.0, %v4961_v24 }
 0x988   : > { %v4412_v55 = vmul.f32 %v2219_v54, %v2215_v52  ;;  %v1639_v5 = vpop.permute.xlu2 %1638  ;;  %v1744_v54 = vsel %vm1743_vm3, 1.0, %v4961_v24  ;;  %v1951_v52 = vsel %vm1950_vm6, 1.0, %v4961_v24  ;;  %vm2624_vm6 = vcmp.eq.f32.partialorder %v4296_v11, %v4387_v58 }
 0x989   : > { %v4415_v8 = vmul.f32 %v1639_v5, %v1636_v15  ;;  %v4418_v49 = vadd.f32 %v4274_v17, %v1475_v10 }
 0x98e   : > { %1601 = vperm.xlu2 %3311, %v1598_v16   ;;  %v1882_v30 = vpop.permute.xlu1 %1881 }
 0x98f   : > { %1627 = vperm.xlu1 %3312, %v1598_v16   ;;  %v1747_v9 = vpop.permute.xlu0 %1746  ;;  %v2165_v16 = vsel %vm2164_vm7, 1.0, %v4961_v24  ;;  %vm1884_vm13 = vcmp.eq.f32.partialorder %v4248_v63, %v1882_v30  ;;  %v4975_v30 = vsub.f32 1.0, %v4000_v33  ;;  %v2572_v33 = vsel %vm2571_vm15, 1.0, %v4961_v24 }
 0x990   : > { %v1749_v7 = vmul.f32 %v1747_v9, %v1744_v54  ;;  %v1954_v15 = vpop.permute.xlu2 %1953  ;;  %vm1558_vm15 = vcmp.eq.f32.partialorder %v4248_v63, %v4112_v44  ;;  %v4978_v44 = vld [vmem:[#allocation26_spill] sm:$0xff] }
 0x991   : > { %v1956_v5 = vmul.f32 %v1954_v15, %v1951_v52 }
 0x992   : > { %v4427_v17 = vadd.f32 %v4338_v34, %v1749_v7  ;;  %v2109_v7 = vsel %vm2108_vm8, 1.0, %v4961_v24  ;;  %vm1495_vm8 = vcmp.eq.f32.partialorder %v4080_v14, %v4128_v18 }
 0x996   : > { %3313 = vset.pattern.permute.xlu2 %v4953_v61 }
 0x997   : > { %3314 = vset.pattern.permute.xlu1 %v4953_v61  ;;  %1720 = vperm.xlu2 %3313, %v4972_v51   ;;  %v1924_v29 = vpop.permute.xlu1 %1923  ;;  %v2168_v10 = vpop.permute.xlu0 %2167 }
 0x998   : > { %1787 = vperm.xlu1 %3314, %v1784_v42   ;;  %v2170_v54 = vmul.f32 %v2168_v10, %v2165_v16  ;;  %vm1926_vm14 = vcmp.eq.f32.partialorder %v4296_v11, %v1924_v29 }
 0x999   : > { %v4437_v34 = vpop.permute.xlu2 %2425 }
 0x99a   : > { %v4439_v9 = vadd.f32 %v2181_v19, %v2170_v54  ;;  %v2228_v19 = vsel %vm2227_vm9, 1.0, %v4961_v24  ;;  %vm2428_vm7 = vcmp.eq.f32.partialorder %v4100_v23, %v4437_v34  ;;  %vm1530_vm9 = vcmp.eq.f32.partialorder %v4296_v11, %v4144_v27 }
 0x99b   : > { %v1531_v60 = vsel %vm1530_vm9, 1.0, %v4961_v24  ;;  %vm1371_vm9 = vcmask 31744  }
 0x99f   : > { %2074 = vperm.xlu2 %3313, %v2071_v57  }
 0x9a0   : > { %2141 = vperm.xlu1 %3314, %v4973_v48   ;;  %v2112_v50 = vpop.permute.xlu1 %2111 }
 0x9a1   : > { %v4449_v52 = vmul.f32 %v2112_v50, %v2109_v7  ;;  %v2231_v15 = vpop.permute.xlu0 %2230  ;;  %v1885_v50 = vsel %vm1884_vm13, 1.0, %v4961_v24  ;;  %vm2519_vm13 = vcmp.eq.f32.partialorder %v4080_v14, %v4374_v38 }
 0x9a2   : > { %v2233_v51 = vmul.f32 %v2231_v15, %v2228_v19  ;;  %v4452_v10 = vpop.permute.xlu2 %2449  ;;  %v1927_v15 = vsel %vm1926_vm14, 1.0, %v4961_v24  ;;  %vm1715_vm14 = vcmp.eq.f32.partialorder %v4100_v23, %v4121_v53  ;;  %v1559_v53 = vsel %vm1558_vm15, 1.0, %v4961_v24 }
 0x9a4   : > { %v4454_v62 = vadd.f32 %v2244_v20, %v2233_v51  ;;  %v2496_v20 = vsel %vm2495_vm11, 1.0, %v4961_v24  ;;  %vm1596_vm11 = vcmp.eq.f32.partialorder %v4296_v11, %v4154_v0 }
 0x9a7   : > { %3318 = vset.pattern.permute.xlu2 %v4960_v28 }
 0x9a8   : > { %3316 = vset.pattern.permute.xlu1 %v4960_v28  ;;  %2100 = vperm.xlu2 %3318, %v2071_v57   ;;  %v2544_v57 = vsel %vm2543_vm12, 1.0, %v4961_v24  ;;  %vm2452_vm12 = vcmp.eq.f32.partialorder %v4080_v14, %v4452_v10 }
 0x9a9   : > { %1813 = vperm.xlu1 %3316, %v1784_v42   ;;  %v1943_v32 = vpop.permute.xlu0 %1942  ;;  %v4463_v13 = vpop.permute.xlu1 %2277 }
 0x9aa   : > { %v1945_v16 = vmul.f32 %v1943_v32, %v1940_v12 }
 0x9ab   : > { %v2500_v54 = vpop.permute.xlu2 %2499 }
 0x9ac   : > { %v4466_v48 = vadd.f32 %v1956_v5, %v1945_v16  ;;  %v4468_v3 = vmul.f32 %v2500_v54, %v2496_v20  ;;  %v2267_v16 = vsub.f32 1.0, %v4176_v6  ;;  %v2482_v6 = vsub.f32 1.0, %v3993_v31 }
 0x9ad   : > { %v2625_v31 = vsel %vm2624_vm6, 1.0, %v4961_v24  ;;  %vm2097_vm6 = vcmp.eq.f32.partialorder %v4080_v14, %v4978_v44 }
 0x9b0   : > { %3319 = vset.pattern.permute.xlu2 %v4958_v2 }
 0x9b1   : > { %3317 = vset.pattern.permute.xlu1 %v4955_v22  ;;  %1876 = vperm.xlu2 %3319, %v1847_v1  }
 0x9b2   : > { %1850 = vperm.xlu1 %3317, %v1847_v1   ;;  %v2549_v42 = vpop.permute.xlu0 %2548 }
 0x9b3   : > { %v4477_v5 = vmul.f32 %v2549_v42, %v2544_v57  ;;  %v1888_v7 = vpop.permute.xlu1 %1887 }
 0x9b4   : > { %v4480_v19 = vmul.f32 %v1888_v7, %v1885_v50  ;;  %v4482_v39 = vpop.permute.xlu2 %2562 }
 0x9b9   : > { %3320 = vset.pattern.permute.xlu2 %v4955_v22 }
 0x9ba   : > { %2204 = vperm.xlu1 %3317, %v4974_v56   ;;  %1916 = vperm.xlu2 %3320, %v4975_v30  }
 0x9bb   : > { %v2575_v37 = vpop.permute.xlu0 %2574 }
 0x9bc   : > { %v1931_v51 = vpop.permute.xlu1 %1930  ;;  %v2577_v1 = vmul.f32 %v2575_v37, %v2572_v33  ;;  %v1679_v37 = vmul.f32 1.442695, %v1678_v46 }
 0x9bd   : > { %v4491_v12 = vmul.f32 %v1931_v51, %v1927_v15  ;;  %v2580_v32 = vpop.permute.xlu2 %2579  ;;  %v2611_v51 = vsub.f32 1.0, %v4358_v59  ;;  %v2429_v59 = vsel %vm2428_vm7, 1.0, %v4961_v24 }
 0x9be   : > { %vm2582_vm2 = vcmp.eq.f32.partialorder %v4248_v63, %v2580_v32 }
 0x9bf   : > { %v2583_v20 = vsel %vm2582_vm2, 1.0, %v4961_v24  ;;  %vm2069_vm2 = vcmp.eq.f32.partialorder %v4100_v23, %v4179_v47 }
 0x9c0   : > { %v2070_v38 = vsel %vm2069_vm2, 1.0, %v4961_v24 }
 0x9c2   : > { %2270 = vperm.xlu1 %3317, %v2267_v16   ;;  %3322 = vset.pattern.permute.xlu2 %v4958_v2 }
 0x9c3   : > { %2296 = vperm.xlu2 %3322, %v2267_v16   ;;  %v1369_v47 = vpop.permute.xlu0 %1368 }
 0x9c5   : > { %v2302_v29 = vpop.permute.xlu1 %2301  ;;  %v2586_v54 = vpop.permute.xlu2 %2585 }
 0x9c6   : > { %v2588_v42 = vmul.f32 %v2586_v54, %v2583_v20  ;;  %vm2304_vm3 = vcmp.eq.f32.partialorder %v4248_v63, %v2302_v29 }
 0x9c7   : > { %v2305_v50 = vsel %vm2304_vm3, 1.0, %v4961_v24 }
 0x9c8   : > { %v4500_v57 = vadd.f32 %v2588_v42, %v2577_v1  ;;  %v1597_v1 = vsel %vm1596_vm11, 1.0, %v4961_v24 }
 0x9ca   : > { %3324 = vset.pattern.permute.xlu1 %v4953_v61 }
 0x9cb   : > { %2485 = vperm.xlu1 %3324, %v2482_v6   ;;  %3323 = vset.pattern.permute.xlu2 %v4953_v61  ;;  %v2032_v61 = vsub.f32 %v3896_v26, %v4108_v43 }
 0x9cc   : > { %2418 = vperm.xlu2 %3323, %v2415_v40  }
 0x9cd   : > { %v2308_v7 = vpop.permute.xlu1 %2307  ;;  %v2033_v18 = vmul.f32 1.442695, %v2032_v61 }
 0x9ce   : > { %v4510_v56 = vmul.f32 %v2308_v7, %v2305_v50  ;;  %v2629_v30 = vpop.permute.xlu2 %2628  ;;  %v1716_v7 = vsel %vm1715_vm14, 1.0, %v4961_v24 }
 0x9cf   : > { %v4513_v15 = vmul.f32 %v2629_v30, %v2625_v31  ;;  %3388 = vpow2.f32 %v2033_v18 }
 0x9d0   : > { %3390 = vpow2.f32 %v1679_v37  ;;  %v2098_v37 = vsel %vm2097_vm6, 1.0, %v4961_v24  ;;  %vm2280_vm6 = vcmp.eq.f32.partialorder %v4296_v11, %v4463_v13 }
 0x9d3   : > { %3328 = vset.pattern.permute.xlu1 %v4955_v22  ;;  %v1496_v22 = vsel %vm1495_vm8, 1.0, %v4961_v24 }
 0x9d4   : > { %2614 = vperm.xlu1 %3328, %v2611_v51   ;;  %3325 = vset.pattern.permute.xlu2 %v4960_v28 }
 0x9d5   : > { %2444 = vperm.xlu2 %3325, %v2415_v40   ;;  %v4540_v20 = vpop.eup %3388  ;;  %v2520_v40 = vsel %vm2519_vm13, 1.0, %v4961_v24 }
 0x9d6   : > { %v2433_v58 = vpop.permute.xlu1 %2432  ;;  %v4545_v27 = vpop.eup %3390 }
 0x9d7   : > { %v4527_v32 = vmul.f32 %v2433_v58, %v2429_v59  ;;  %v1499_v34 = vpop.permute.xlu2 %1498 }
 0x9d8   : > { %v1501_v16 = vmul.f32 %v1499_v34, %v1496_v22  ;;  %v4977_v22 = vld [vmem:[#allocation18_spill] sm:$0xff] }
 0x9d9   : > { %vm1624_vm3 = vcmp.eq.f32.partialorder %v4248_v63, %v4977_v22  ;;  %v4984_v22 = vld [vmem:[#allocation34_spill] sm:$0xff] }
 0x9da   : > { %v4531_v28 = vadd.f32 %v4289_v21, %v1501_v16  ;;  %v1625_v16 = vsel %vm1624_vm3, 1.0, %v4961_v24 }
 0x9dc   : > { %3329 = vset.pattern.permute.xlu1 %v4958_v2 }
 0x9dd   : > { %2640 = vperm.xlu1 %3329, %v2611_v51   ;;  %2511 = vperm.xlu2 %3325, %v2482_v6  }
 0x9df   : > { %v2556_v26 = vpop.permute.xlu1 %2555 }
 0x9e0   : > { %vm2558_vm10 = vcmp.eq.f32.partialorder %v4296_v11, %v2556_v26  ;;  %v1536_v43 = vpop.permute.xlu2 %1535 }
 0x9e1   : > { %v2559_v33 = vsel %vm2558_vm10, 1.0, %v4961_v24  ;;  %v1538_v29 = vmul.f32 %v1536_v43, %v1531_v60  ;;  %v4979_v43 = vld [vmem:[#allocation21_spill] sm:$0xff] }
 0x9e2   : > { %v2565_v21 = vmul.f32 %v4482_v39, %v2559_v33  ;;  %vm1782_vm7 = vcmp.eq.f32.partialorder %v4100_v23, %v4979_v43  ;;  %v4980_v33 = vld [vmem:[#allocation22_spill] sm:$0xff]  ;;  %v4987_v43 = vld [vmem:[#allocation39_spill] sm:$0xff] }
 0x9e3   : > { %v4543_v2 = vadd.f32 %v4310_v45, %v1538_v29  ;;  %v2453_v45 = vsel %vm2452_vm12, 1.0, %v4961_v24  ;;  %vm1873_vm8 = vcmp.eq.f32.partialorder %v4248_v63, %v4980_v33  ;;  %v2381_v29 = vpop.permute.xlu0 %2380 }
 0x9e4   : > { %v4548_v54 = vadd.f32 %v2565_v21, %v4477_v5 }
 0x9e5   : > { %1682 = vrot.lane.b32.xlu1 %v4545_v27, %s3498_s21  ;;  %2036 = vrot.lane.b32.xlu2 %v4540_v20, %s4976_s0  ;;  %s674_s0 = sand.u32 1, %s3459_s22   ;;  %s3425_s21 = scalar_lea.hbm %s4872_s20, 16 }
 0x9e6   : > { %s2886_s2 = scalar_lea.sflag [#allocation3], %s674_s0 }
 0x9e8   : > { %v2456_v39 = vpop.permute.xlu1 %2455  ;;  %v1602_v42 = vpop.permute.xlu2 %1601 }
 0x9e9   : > { %v4559_v5 = vmul.f32 %v2456_v39, %v2453_v45  ;;  %v1604_v6 = vmul.f32 %v1602_v42, %v1597_v1  ;;  %v1783_v39 = vsel %vm1782_vm7, 1.0, %v4961_v24  ;;  %v1874_v1 = vsel %vm1873_vm8, 1.0, %v4961_v24 }
 0x9eb   : > { %v4562_v0 = vadd.f32 %v4323_v41, %v1604_v6  ;;  %v2383_v6 = vsel %vm1371_vm9, %v2381_v29, 0.0 }
 0x9f0   : > { %v2523_v10 = vpop.permute.xlu1 %2522 }
 0x9f1   : > { %v4569_v50 = vmul.f32 %v2523_v10, %v2520_v40  ;;  %v1721_v31 = vpop.permute.xlu2 %1720  ;;  %v1372_v40 = vsel %vm1371_vm9, %v1369_v47, 0.0  ;;  %v4985_v47 = vld [vmem:[#allocation23_spill] sm:$0xff] }
 0x9f2   : > { %v1723_v30 = vmul.f32 %v1721_v31, %v1716_v7  ;;  %v4982_v31 = vld [vmem:[#allocation20_spill] sm:$0xff]  ;;  %vm1810_vm12 = vcmp.eq.f32.partialorder %v4080_v14, %v4985_v47 }
 0x9f3   : > { %vm2136_vm10 = vcmp.eq.f32.partialorder %v4100_v23, %v4982_v31 }
 0x9f4   : > { %v4573_v51 = vadd.f32 %v4365_v35, %v1723_v30  ;;  %v4983_v30 = vld [vmem:[#allocation24_spill] sm:$0xff] }
 0x9f5   : > { %vm1911_vm11 = vcmp.eq.f32.partialorder %v4296_v11, %v4983_v30  ;;  %v4991_v30 = vld [vmem:[#allocation19_spill] sm:$0xff] }
 0x9f6   : > { %vm2199_vm2 = vcmp.eq.f32.partialorder %v4296_v11, %v4991_v30 }
 0x9f9   : > { %v1562_v41 = vpop.permute.xlu1 %1561  ;;  %v2075_v61 = vpop.permute.xlu2 %2074 }
 0x9fa   : > { %v1564_v46 = vmul.f32 %v1562_v41, %v1559_v53  ;;  %v2077_v58 = vmul.f32 %v2075_v61, %v2070_v38  ;;  %v2137_v41 = vsel %vm2136_vm10, 1.0, %v4961_v24  ;;  %v1912_v61 = vsel %vm1911_vm11, 1.0, %v4961_v24 }
 0x9fc   : > { %v4582_v59 = vadd.f32 %v4255_v25, %v1564_v46  ;;  %v4585_v35 = vadd.f32 %v4384_v36, %v2077_v58 }
 0xa01   : > { %v1628_v34 = vpop.permute.xlu1 %1627 }
 0xa02   : > { %v1630_v18 = vmul.f32 %v1628_v34, %v1625_v16  ;;  %v2101_v26 = vpop.permute.xlu2 %2100  ;;  %v4986_v34 = vld [vmem:[#allocation28_spill] sm:$0xff]  ;;  %v1811_v16 = vsel %vm1810_vm12, 1.0, %v4961_v24 }
 0xa03   : > { %v2103_v60 = vmul.f32 %v2101_v26, %v2098_v37  ;;  %vm2293_vm13 = vcmp.eq.f32.partialorder %v4248_v63, %v4986_v34  ;;  %v4993_v34 = vld [vmem:[#allocation25_spill] sm:$0xff] }
 0xa04   : > { %v4594_v25 = vadd.f32 %v4415_v8, %v1630_v18  ;;  %v2294_v26 = vsel %vm2293_vm13, 1.0, %v4961_v24  ;;  %vm2265_vm7 = vcmp.eq.f32.partialorder %v4296_v11, %v4993_v34  ;;  %vm2648_vm13 = vcmp.eq.f32.partialorder %v4248_v63, %v4397_v4 }
 0xa05   : > { %v4597_v36 = vadd.f32 %v4449_v52, %v2103_v60  ;;  %v4981_v52 = vld [vmem:[#allocation38_spill] sm:$0xff]  ;;  %v2266_v13 = vsel %vm2265_vm7, 1.0, %v4961_v24 }
 0xa0a   : > { %v1788_v21 = vpop.permute.xlu1 %1787 }
 0xa0b   : > { %v1790_v45 = vmul.f32 %v1788_v21, %v1783_v39  ;;  %v1877_v42 = vpop.permute.xlu2 %1876  ;;  %v4988_v21 = vld [vmem:[#allocation16_spill] sm:$0xff]  ;;  %v4989_v39 = vld [vmem:[#allocation27_spill] sm:$0xff] }
 0xa0c   : > { %v1879_v8 = vmul.f32 %v1877_v42, %v1874_v1  ;;  %vm1845_vm14 = vcmp.eq.f32.partialorder %v4296_v11, %v4988_v21  ;;  %vm2413_vm15 = vcmp.eq.f32.partialorder %v4100_v23, %v4989_v39 }
 0xa0d   : > { %v4607_v10 = vadd.f32 %v4981_v52, %v1790_v45  ;;  %v1846_v1 = vsel %vm1845_vm14, 1.0, %v4961_v24 }
 0xa0e   : > { %v4611_v7 = vadd.f32 %v4480_v19, %v1879_v8  ;;  %2384 = vadd.xlane.f32.xlu2 %v2383_v6  ;;  %v2414_v8 = vsel %vm2413_vm15, 1.0, %v4961_v24 }
 0xa0f   : > { %1373 = vadd.xlane.f32.xlu1 %v1372_v40  ;;  %v4990_v40 = vld [vmem:[#allocation40_spill] sm:$0xff] }
 0xa12   : > { %v2142_v53 = vpop.permute.xlu1 %2141 }
 0xa13   : > { %v2144_v38 = vmul.f32 %v2142_v53, %v2137_v41  ;;  %v4992_v41 = vld [vmem:[#allocation30_spill] sm:$0xff] }
 0xa14   : > { %v1917_v46 = vpop.permute.xlu2 %1916  ;;  %vm2441_vm3 = vcmp.eq.f32.partialorder %v4080_v14, %v4992_v41 }
 0xa15   : > { %v1919_v58 = vmul.f32 %v1917_v46, %v1912_v61  ;;  %v4620_v44 = vadd.f32 %v4984_v22, %v2144_v38  ;;  %v2200_v38 = vsel %vm2199_vm2, 1.0, %v4961_v24  ;;  %v2442_v46 = vsel %vm2441_vm3, 1.0, %v4961_v24 }
 0xa17   : > { %v4623_v19 = vadd.f32 %v4491_v12, %v1919_v58 }
 0xa1b   : > { %v1814_v18 = vpop.permute.xlu1 %1813 }
 0xa1c   : > { %v1816_v37 = vmul.f32 %v1814_v18, %v1811_v16  ;;  %v4994_v18 = vld [vmem:[#allocation31_spill] sm:$0xff] }
 0xa1d   : > { %v2297_v60 = vpop.permute.xlu2 %2296  ;;  %vm2508_vm8 = vcmp.eq.f32.partialorder %v4080_v14, %v4994_v18  ;;  %v3500_v18 = vmov 32  }
 0xa1e   : > { %v4632_v33 = vadd.f32 %v4987_v43, %v1816_v37  ;;  %v2299_v29 = vmul.f32 %v2297_v60, %v2294_v26  ;;  %v4995_v26 = vld [vmem:[#allocation37_spill] sm:$0xff]  ;;  %3330 = vset.pattern.permute.xlu2 %v3500_v18 }
 0xa20   : > { %v4635_v12 = vadd.f32 %v4510_v56, %v2299_v29 }
 0xa24   : > { %v1851_v45 = vpop.permute.xlu1 %1850 }
 0xa25   : > { %v1853_v42 = vmul.f32 %v1851_v45, %v1846_v1  ;;  %v4996_v45 = vld [vmem:[#allocation29_spill] sm:$0xff] }
 0xa26   : > { %v2419_v6 = vpop.permute.xlu2 %2418  ;;  %vm2480_vm10 = vcmp.eq.f32.partialorder %v4100_v23, %v4996_v45  ;;  %v4999_v45 = vld [vmem:[#allocation35_spill] sm:$0xff] }
 0xa27   : > { %v2421_v52 = vmul.f32 %v2419_v6, %v2414_v8  ;;  %v4644_v31 = vadd.f32 %v4990_v40, %v1853_v42  ;;  %v2481_v14 = vsel %vm2480_vm10, 1.0, %v4961_v24  ;;  %v4997_v40 = vld [vmem:[#allocation32_spill] sm:$0xff] }
 0xa28   : > { %vm2609_vm11 = vcmp.eq.f32.partialorder %v4296_v11, %v4997_v40 }
 0xa29   : > { %v4649_v56 = vadd.f32 %v4527_v32, %v2421_v52  ;;  %v2281_v32 = vsel %vm2280_vm6, 1.0, %v4961_v24  ;;  %v2610_v30 = vsel %vm2609_vm11, 1.0, %v4961_v24 }
 0xa2a   : > { %v2287_v60 = vmul.f32 %v4995_v26, %v2281_v32  ;;  %v3499_v32 = vmov 34  }
 0xa2b   : > { %3332 = vset.pattern.permute.xlu1 %v3499_v32 }
 0xa2c   : > { %v2205_v53 = vpop.permute.xlu1 %2204 }
 0xa2d   : > { %v2207_v61 = vmul.f32 %v2205_v53, %v2200_v38  ;;  %v4998_v53 = vld [vmem:[#allocation33_spill] sm:$0xff]  ;;  %v2652_v38 = vpop.permute.xlu0 %2651 }
 0xa2e   : > { %vm2637_vm12 = vcmp.eq.f32.partialorder %v4248_v63, %v4998_v53 }
 0xa2f   : > { %v2445_v58 = vpop.permute.xlu2 %2444  ;;  %v4658_v22 = vadd.f32 %v4412_v55, %v2207_v61  ;;  %v2509_v55 = vsel %vm2508_vm8, 1.0, %v4961_v24  ;;  %v2638_v61 = vsel %vm2637_vm12, 1.0, %v4961_v24 }
 0xa30   : > { %v2447_v47 = vmul.f32 %v2445_v58, %v2442_v46 }
 0xa32   : > { %v4664_v16 = vadd.f32 %v4559_v5, %v2447_v47 }
 0xa34   : > { %v2271_v37 = vpop.permute.xlu1 %2270 }
 0xa35   : > { %v2273_v43 = vmul.f32 %v2271_v37, %v2266_v13 }
 0xa37   : > { %v2512_v29 = vpop.permute.xlu2 %2511  ;;  %v4671_v21 = vadd.f32 %v2287_v60, %v2273_v43 }
 0xa38   : > { %v2514_v39 = vmul.f32 %v2512_v29, %v2509_v55 }
 0xa3a   : > { %v4676_v5 = vadd.f32 %v4569_v50, %v2514_v39 }
 0xa3d   : > { %v2486_v1 = vpop.permute.xlu1 %2485 }
 0xa3e   : > { %v2488_v42 = vmul.f32 %v2486_v1, %v2481_v14  ;;  %v3501_v1 = vmov 33  }
 0xa3f   : > { %v2037_v8 = vpop.permute.xlu2 %2036 }
 0xa40   : > { %v2039_v6 = vsel %vm1371_vm9, %v2037_v8, 0.0  ;;  %v4681_v52 = vadd.f32 %v4468_v3, %v2488_v42  ;;  %v2649_v3 = vsel %vm2648_vm13, 1.0, %v4961_v24  ;;  %v3502_v42 = vmov 40  }
 0xa41   : > { %2040 = vadd.xlane.f32.xlu1 %v2039_v6  ;;  %v2654_v11 = vmul.f32 %v2652_v38, %v2649_v3 }
 0xa46   : > { %v2615_v23 = vpop.permute.xlu1 %2614 }
 0xa47   : > { %v2617_v41 = vmul.f32 %v2615_v23, %v2610_v30  ;;  %v3503_v30 = vmov 37   ;;  %v3504_v23 = vmov 36  }
 0xa48   : > { %3334 = vset.pattern.permute.xlu0 %v3503_v30 }
 0xa49   : > { %v4687_v50 = vadd.f32 %v4513_v15, %v2617_v41 }
 0xa4f   : > { %v2641_v46 = vpop.permute.xlu1 %2640 }
 0xa50   : > { %v2643_v58 = vmul.f32 %v2641_v46, %v2638_v61 }
 0xa52   : > { %v4695_v47 = vadd.f32 %v2654_v11, %v2643_v58 }
 0xa57   : > { %v1683_v34 = vpop.permute.xlu1 %1682 }
 0xa58   : > { %v1685_v15 = vsel %vm1371_vm9, %v1683_v34, 0.0 }
 0xa59   : > { %1686 = vadd.xlane.f32.xlu0 %v1685_v15 }
 0xa81   : > { %v2385_v6 = vpop.xlane.xlu2 %2384 }
 0xa82   : > { %v1374_v37 = vpop.xlane.xlu1 %1373  ;;  %vm2391_vm11 = vweird.f32 %v2385_v6 }
 0xa83   : > { %3392 = vrcp.f32 %v1374_v37  ;;  %v1386_v26 = vand.u32 2147483648, %v1374_v37  ;;  %v1384_v60 = vand.u32 2147483647, %v1374_v37  ;;  %vm1380_vm15 = vweird.f32 %v1374_v37 }
 0xa85   : > { %v1387_v55 = vor.u32 1.1754944e-38, %v1386_v26  ;;  %vm1385_vm3 = vcmp.eq.f32.partialorder %v1384_v60, 8.507059e+37  ;;  %v2397_v26 = vand.u32 2147483648, %v2385_v6  ;;  %v3505_v60 = vmov 35  }
 0xa89   : > { %v3393_v63 = vpop.eup %3392 }
 0xa8a   : > { %v1376_v4 = vmul.f32 %v3393_v63, %v1374_v37  ;;  %vm1381_vm14 = vweird.f32 %v3393_v63 }
 0xa8b   : > { %vm1382_vm2 = vmor %vm1380_vm15, %vm1381_vm14 }
 0xa8c   : > { %v1377_v13 = vsub.f32 1.0, %v1376_v4 }
 0xa8e   : > { %v1378_v24 = vmul.f32 %v3393_v63, %v1377_v13 }
 0xa90   : > { %v1379_v43 = vadd.f32 %v3393_v63, %v1378_v24  ;;  %v2395_v24 = vand.u32 2147483647, %v2385_v6 }
 0xa92   : > { %v1383_v29 = vsel %vm1382_vm2, %v3393_v63, %v1379_v43  ;;  %vm2396_vm13 = vcmp.eq.f32.partialorder %v2395_v24, 8.507059e+37  ;;  %v3512_v24 = vmov 42  }
 0xa93   : > { %v1388_v39 = vsel %vm1385_vm3, %v1387_v55, %v1383_v29  ;;  %v2398_v29 = vor.u32 1.1754944e-38, %v2397_v26 }
 0xa94   : > { %v1389_v14 = vmul.f32 %v4999_v45, %v1388_v39 }
 0xa96   : > { %1448 = vperm.xlu2 %3330, %v1389_v14   ;;  %1578 = vperm.xlu1 %3332, %v1389_v14  }
 0xa9e   : > { %3331 = vset.pattern.permute.xlu2 %v3501_v1  ;;  %3333 = vset.pattern.permute.xlu1 %v3504_v23  ;;  %v3506_v23 = vmov 44  }
 0xa9f   : > { %1515 = vperm.xlu2 %3331, %v1389_v14  }
 0xaa7   : > { %3335 = vset.pattern.permute.xlu2 %v3502_v42 }
 0xab4   : > { %v2041_v8 = vpop.xlane.xlu1 %2040 }
 0xab5   : > { %3394 = vrcp.f32 %v2041_v8  ;;  %v2053_v3 = vand.u32 2147483648, %v2041_v8  ;;  %v2051_v46 = vand.u32 2147483647, %v2041_v8  ;;  %vm2047_vm6 = vweird.f32 %v2041_v8 }
 0xab6   : > { %3396 = vrcp.f32 %v2385_v6 }
 0xab7   : > { %v2054_v34 = vor.u32 1.1754944e-38, %v2053_v3  ;;  %vm2052_vm8 = vcmp.eq.f32.partialorder %v2051_v46, 8.507059e+37  ;;  %v3507_v3 = vmov 46   ;;  %v3509_v46 = vmov 41  }
 0xabb   : > { %v3395_v40 = vpop.eup %3394 }
 0xabc   : > { %v2043_v41 = vmul.f32 %v3395_v40, %v2041_v8  ;;  %v3397_v38 = vpop.eup %3396  ;;  %vm2048_vm9 = vweird.f32 %v3395_v40 }
 0xabd   : > { %v2387_v11 = vmul.f32 %v3397_v38, %v2385_v6  ;;  %vm2049_vm7 = vmor %vm2047_vm6, %vm2048_vm9  ;;  %vm2392_vm10 = vweird.f32 %v3397_v38  ;;  %vm1650_vm9 = vcmask 654336   ;;  %vm2833_vm6 = vcmask 523264  }
 0xabe   : > { %v2044_v53 = vsub.f32 1.0, %v2043_v41  ;;  %vm2393_vm12 = vmor %vm2391_vm11, %vm2392_vm10 }
 0xabf   : > { %v2388_v18 = vsub.f32 1.0, %v2387_v11  ;;  %v5001_v11 = vld [vmem:[#allocation11_spill] sm:$0xff] }
 0xac0   : > { %v2045_v61 = vmul.f32 %v3395_v40, %v2044_v53 }
 0xac1   : > { %v2389_v63 = vmul.f32 %v3397_v38, %v2388_v18  ;;  %v3511_v18 = vmov 47  }
 0xac2   : > { %v2046_v58 = vadd.f32 %v3395_v40, %v2045_v61  ;;  %v3508_v61 = vmov 43  }
 0xac3   : > { %v2390_v13 = vadd.f32 %v3397_v38, %v2389_v63  ;;  %v5004_v63 = vld [vmem:[#allocation17_spill] sm:$0xff] }
 0xac4   : > { %v2050_v15 = vsel %vm2049_vm7, %v3395_v40, %v2046_v58  ;;  %v5000_v40 = vld [vmem:[#allocation36_spill] sm:$0xff] }
 0xac5   : > { %v2055_v32 = vsel %vm2052_vm8, %v2054_v34, %v2050_v15  ;;  %v2394_v43 = vsel %vm2393_vm12, %v3397_v38, %v2390_v13  ;;  %v5002_v34 = vld [vmem:[#allocation15_spill] sm:$0xff] }
 0xac6   : > { %v2056_v37 = vmul.f32 %v4540_v20, %v2055_v32  ;;  %v2399_v45 = vsel %vm2396_vm13, %v2398_v29, %v2394_v43  ;;  %v5003_v32 = vld [vmem:[#allocation12_spill] sm:$0xff] }
 0xac7   : > { %v2400_v30 = vmul.f32 %v5000_v40, %v2399_v45 }
 0xac8   : > { %2118 = vperm.xlu2 %3335, %v2056_v37  }
 0xacc   : > { %v1687_v4 = vpop.xlane.xlu0 %1686 }
 0xacd   : > { %3398 = vrcp.f32 %v1687_v4  ;;  %v1699_v1 = vand.u32 2147483648, %v1687_v4  ;;  %v1697_v8 = vand.u32 2147483647, %v1687_v4  ;;  %vm1693_vm15 = vweird.f32 %v1687_v4 }
 0xacf   : > { %vm1698_vm3 = vcmp.eq.f32.partialorder %v1697_v8, 8.507059e+37 }
 0xad0   : > { %3339 = vset.pattern.permute.xlu2 %v3505_v60 }
 0xad1   : > { %1644 = vperm.xlu2 %3339, %v1389_v14   ;;  %v1700_v14 = vor.u32 1.1754944e-38, %v1699_v1 }
 0xad3   : > { %v3399_v55 = vpop.eup %3398 }
 0xad4   : > { %v1689_v39 = vmul.f32 %v3399_v55, %v1687_v4  ;;  %vm1694_vm14 = vweird.f32 %v3399_v55 }
 0xad5   : > { %vm1695_vm2 = vmor %vm1693_vm15, %vm1694_vm14 }
 0xad6   : > { %v1690_v20 = vsub.f32 1.0, %v1689_v39 }
 0xad8   : > { %v1691_v42 = vmul.f32 %v3399_v55, %v1690_v20  ;;  %v3514_v20 = vmov 45  }
 0xad9   : > { %3342 = vset.pattern.permute.xlu2 %v3506_v23 }
 0xada   : > { %v1692_v6 = vadd.f32 %v3399_v55, %v1691_v42  ;;  %2462 = vperm.xlu2 %3342, %v2400_v30  }
 0xadc   : > { %v1696_v41 = vsel %vm1695_vm2, %v3399_v55, %v1692_v6  ;;  %v3513_v55 = vmov 39  }
 0xadd   : > { %v1701_v53 = vsel %vm1698_vm3, %v1700_v14, %v1696_v41 }
 0xade   : > { %v1702_v38 = vmul.f32 %v4545_v27, %v1701_v53  ;;  %v3510_v27 = vmov 38  }
 0xae0   : > { %1830 = vperm.xlu0 %3334, %v1702_v38   ;;  %1764 = vperm.xlu1 %3333, %v1702_v38  }
 0xae2   : > { %3344 = vset.pattern.permute.xlu2 %v3507_v3 }
 0xae3   : > { %2591 = vperm.xlu2 %3344, %v2400_v30  }
 0xae8   : > { %3341 = vset.pattern.permute.xlu0 %v3508_v61  ;;  %3336 = vset.pattern.permute.xlu1 %v3509_v46 }
 0xae9   : > { %2313 = vperm.xlu0 %3341, %v2056_v37   ;;  %2184 = vperm.xlu1 %3336, %v2056_v37  }
 0xaeb   : > { %3346 = vrot.lane.b32.xlu2 %v5001_v11, %s4934_s29 }
 0xaf0   : > { %v1449_v58 = vpop.permute.xlu2 %1448 }
 0xaf1   : > { %v1451_v15 = vmul.f32 %v1449_v58, %v5002_v34  ;;  %3352 = vrot.lane.b32.xlu0 %v5003_v32, %s4934_s29  ;;  %3337 = vset.pattern.permute.xlu1 %v3510_v27  ;;  %s5005_s29 = smov 8  }
 0xaf2   : > { %1893 = vperm.xlu1 %3337, %v1702_v38   ;;  %3356 = vset.pattern.permute.xlu0 %v3511_v18 }
 0xaf3   : > { %v1452_v4 = vmul.f32 %v1451_v15, %v5004_v63 }
 0xaf9   : > { %v1516_v13 = vpop.permute.xlu2 %1515 }
 0xafa   : > { %v1518_v26 = vmul.f32 %v1516_v13, %v4418_v49  ;;  %3338 = vset.pattern.permute.xlu1 %v3512_v24 }
 0xafb   : > { %2247 = vperm.xlu1 %3338, %v2056_v37  }
 0xafc   : > { %v1519_v60 = vmul.f32 %v1518_v26, %v4531_v28 }
 0xafe   : > { %v1520_v43 = vadd.f32 %v1519_v60, %v1452_v4 }
 0xb03   : > { %3340 = vset.pattern.permute.xlu1 %v3513_v55 }
 0xb04   : > { %1959 = vperm.xlu1 %3340, %v1702_v38  }
 0xb08   : > { %v1579_v29 = vpop.permute.xlu1 %1578 }
 0xb09   : > { %v1581_v39 = vmul.f32 %v1579_v29, %v4543_v2 }
 0xb0b   : > { %v1582_v45 = vmul.f32 %v1581_v39, %v4582_v59 }
 0xb0c   : > { %3343 = vset.pattern.permute.xlu1 %v3514_v20  ;;  %v2731_v20 = vld [vmem:[%s4865_s13] sm:$0xff] }
 0xb0d   : > { %v1583_v1 = vadd.f32 %v1582_v45, %v1520_v43  ;;  %2528 = vperm.xlu1 %3343, %v2400_v30  }
 0xb15   : > { %3350 = vset.pattern.permute.xlu1 %v3511_v18 }
 0xb16   : > { %2657 = vperm.xlu1 %3350, %v2400_v30  }
 0xb22   : > { %v2119_v49 = vpop.permute.xlu2 %2118 }
 0xb23   : > { %v2121_v37 = vmul.f32 %v2119_v49, %v4585_v35 }
 0xb25   : > { %v2122_v28 = vmul.f32 %v2121_v37, %v4597_v36 }
 0xb2b   : > { %v1645_v42 = vpop.permute.xlu2 %1644 }
 0xb2c   : > { %v1647_v8 = vmul.f32 %v1645_v42, %v4562_v0 }
 0xb2e   : > { %v1648_v40 = vmul.f32 %v1647_v8, %v4594_v25 }
 0xb30   : > { %v1649_v2 = vadd.f32 %v1648_v40, %v1583_v1  ;;  %v3361_v40 = vld [vmem:[%s4866_s14] ss:$0 sm:$0xff] }
 0xb32   : > { %3049 = vmatmul.msk.f32.vlgmr.msra.gmra.mxu1 %vm1650_vm9, %v1649_v2 }
 0xb34   : > { %v2463_v59 = vpop.permute.xlu2 %2462 }
 0xb35   : > { %v2465_v23 = vmul.f32 %v2463_v59, %v4649_v56 }
 0xb37   : > { %v2466_v6 = vmul.f32 %v2465_v23, %v4664_v16  ;;  %v5006_v23 = vld [vmem:[#allocation14_spill] sm:$0xff] }
 0xb3d   : > { %v2592_v30 = vpop.permute.xlu2 %2591 }
 0xb3e   : > { %v2594_v14 = vmul.f32 %v2592_v30, %v4548_v54 }
 0xb40   : > { %v2595_v35 = vmul.f32 %v2594_v14, %v4500_v57 }
 0xb45   : > { %v3347_v36 = vpop.permute.xlu2 %3346 }
 0xb46   : > { %v3348_v41 = vunpack.i.l.bf16 %v3347_v36  ;;  %v3349_v53 = vunpack.i.h.bf16 %v3347_v36 }
 0xb48   : > { %2708 = vmatpush.msrb.mxu1 %v3348_v41 }
 0xb4a   : > { %2709 = vmatpush.msrb.mxu1 %v3349_v53 }
 0xb52   : > { %v1831_v0 = vpop.permute.xlu0 %1830  ;;  %v1765_v25 = vpop.permute.xlu1 %1764 }
 0xb53   : > { %v1833_v38 = vmul.f32 %v1831_v0, %v4607_v10  ;;  %v1767_v3 = vmul.f32 %v1765_v25, %v4573_v51  ;;  %v2792_v25 = vld [vmem:[%s4867_s15 + $0x18] sm:$0xff] }
 0xb54   : > { %2812 = vmatpush.msra.mxu2 %v2792_v25 }
 0xb55   : > { %v1834_v56 = vmul.f32 %v1833_v38, %v4632_v33  ;;  %v1768_v16 = vmul.f32 %v1767_v3, %v4427_v17  ;;  %v2791_v38 = vld [vmem:[%s4867_s15 + $0x10] sm:$0xff]  ;;  %v2790_v3 = vld [vmem:[%s4867_s15 + $0x8] sm:$0xff] }
 0xb56   : > { %2813 = vmatpush.msra.mxu2 %v2791_v38 }
 0xb57   : > { %v1835_v61 = vadd.f32 %v1834_v56, %v1768_v16  ;;  %v2789_v56 = vld [vmem:[%s4867_s15] sm:$0xff]  ;;  %v2828_v16 = vld [vmem:[%s4869_s17 + $0x38] sm:$0xff] }
 0xb58   : > { %2814 = vmatpush.msra.mxu2 %v2790_v3 }
 0xb5a   : > { %2815 = vmatpush.msra.mxu2 %v2789_v56 }
 0xb5b   : > { %v2314_v46 = vpop.permute.xlu0 %2313  ;;  %v2185_v54 = vpop.permute.xlu1 %2184 }
 0xb5c   : > { %v2316_v57 = vmul.f32 %v2314_v46, %v4671_v21  ;;  %v2187_v11 = vmul.f32 %v2185_v54, %v4620_v44  ;;  %v2826_v46 = vld [vmem:[%s4869_s17 + $0x28] sm:$0xff] }
 0xb5e   : > { %v2317_v58 = vmul.f32 %v2316_v57, %v4635_v12  ;;  %v2188_v34 = vmul.f32 %v2187_v11, %v4439_v9  ;;  %v2825_v11 = vld [vmem:[%s4869_s17 + $0x20] sm:$0xff] }
 0xb60   : > { %v2189_v15 = vadd.f32 %v2188_v34, %v2122_v28  ;;  %v2824_v34 = vld [vmem:[%s4869_s17 + $0x18] sm:$0xff] }
 0xb63   : > { %v3353_v32 = vpop.permute.xlu0 %3352 }
 0xb64   : > { %v3354_v10 = vunpack.i.l.bf16 %v3353_v32  ;;  %v1894_v27 = vpop.permute.xlu1 %1893  ;;  %v3355_v33 = vunpack.i.h.bf16 %v3353_v32 }
 0xb65   : > { %v1896_v51 = vmul.f32 %v1894_v27, %v4644_v31 }
 0xb66   : > { %2710 = vmatpush.msrb.mxu1 %v3354_v10 }
 0xb67   : > { %v1897_v17 = vmul.f32 %v1896_v51, %v4611_v7 }
 0xb68   : > { %2711 = vmatpush.msrb.mxu1 %v3355_v33 }
 0xb69   : > { %v1898_v18 = vadd.f32 %v1897_v17, %v1835_v61  ;;  %v2827_v61 = vld [vmem:[%s4869_s17 + $0x30] sm:$0xff]  ;;  %v3404_v17 = vld [vmem:[%s4871_s19] sm:$0x3f] }
 0xb6d   : > { %v2248_v63 = vpop.permute.xlu1 %2247 }
 0xb6e   : > { %v2250_v21 = vmul.f32 %v2248_v63, %v4658_v22 }
 0xb70   : > { %v2251_v44 = vmul.f32 %v2250_v21, %v4454_v62 }
 0xb72   : > { %v2252_v12 = vadd.f32 %v2251_v44, %v2189_v15  ;;  %v2787_v44 = vperm.slane %v3404_v17, 3 }
 0xb74   : > { %v2318_v4 = vadd.f32 %v2317_v58, %v2252_v12 }
 0xb76   : > { %v1960_v9 = vpop.permute.xlu1 %1959  ;;  %3059 = vmatmul.msk.f32.vlgmr.msrb.gmra.mxu2 %vm1650_vm9, %v2318_v4 }
 0xb77   : > { %v1962_v13 = vmul.f32 %v1960_v9, %v4623_v19  ;;  %v2823_v9 = vld [vmem:[%s4869_s17 + $0x10] sm:$0xff] }
 0xb79   : > { %v1963_v31 = vmul.f32 %v1962_v13, %v4466_v48  ;;  %v2822_v13 = vld [vmem:[%s4869_s17 + $0x8] sm:$0xff] }
 0xb7b   : > { %v1964_v26 = vadd.f32 %v1963_v31, %v1898_v18  ;;  %v2785_v18 = vperm.slane %v3404_v17, 2  ;;  %v2821_v31 = vld [vmem:[%s4869_s17] sm:$0xff] }
 0xb7d   : > { %3054 = vmatmul.msk.f32.vlgmr.msrb.gmra.mxu3 %vm1650_vm9, %v1964_v26  ;;  %v3362_v26 = vld [vmem:[%s4868_s16] ss:$0 sm:$0xff] }
 0xb7f   : > { %v2529_v7 = vpop.permute.xlu1 %2528 }
 0xb80   : > { %v2531_v24 = vmul.f32 %v2529_v7, %v4681_v52 }
 0xb82   : > { %v2532_v60 = vmul.f32 %v2531_v24, %v4676_v5  ;;  %v2734_v5 = vld [vmem:[%s4865_s13 + $0x18] sm:$0xff] }
 0xb83   : > { %2754 = vmatpush.msra.mxu3 %v2734_v5 }
 0xb84   : > { %v2533_v22 = vadd.f32 %v2532_v60, %v2466_v6 }
 0xb86   : > { %v2596_v43 = vadd.f32 %v2595_v35, %v2533_v22  ;;  %v5007_v35 = vld [vmem:[#allocation13_spill] sm:$0xff] }
 0xb87   : > { %v3363_v22 = vld [vmem:[%s4870_s18] ss:$0 sm:$0xff] }
 0xb88   : > { %v2658_v62 = vpop.permute.xlu1 %2657 }
 0xb89   : > { %v2660_v55 = vmul.f32 %v2658_v62, %v4687_v50  ;;  %v2733_v50 = vld [vmem:[%s4865_s13 + $0x10] sm:$0xff] }
 0xb8a   : > { %2755 = vmatpush.msra.mxu3 %v2733_v50 }
 0xb8b   : > { %v2661_v29 = vmul.f32 %v2660_v55, %v4695_v47  ;;  %v2732_v47 = vld [vmem:[%s4865_s13 + $0x8] sm:$0xff] }
 0xb8c   : > { %2756 = vmatpush.msra.mxu3 %v2732_v47 }
 0xb8d   : > { %v2662_v39 = vadd.f32 %v2661_v29, %v2596_v43 }
 0xb8e   : > { %2757 = vmatpush.msra.mxu3 %v2731_v20 }
 0xb8f   : > { %3064 = vmatmul.msk.f32.vlgmr.msrb.gmra.mxu1 %vm1650_vm9, %v2662_v39 }
 0xb90   : > { %2845 = vmatpush.msrb.mxu3 %v2828_v16 }
 0xb92   : > { %2846 = vmatpush.msrb.mxu3 %v2827_v61 }
 0xb94   : > { %2847 = vmatpush.msrb.mxu3 %v2826_v46 }
 0xb96   : > { %2848 = vmatpush.msrb.mxu3 %v2825_v11 }
 0xb98   : > { %2849 = vmatpush.msrb.mxu3 %v2824_v34 }
 0xb9a   : > { %2850 = vmatpush.msrb.mxu3 %v2823_v9 }
 0xb9c   : > { %2851 = vmatpush.msrb.mxu3 %v2822_v13 }
 0xb9e   : > { %2852 = vmatpush.msrb.mxu3 %v2821_v31 }
 0xbaf   : > { %v1671_v45 = vpop.f32.mrf.mxu1 }
 0xbf9   : > { %v2369_v19 = vpop.f32.mrf.mxu2 }
 0xbfa   : > { %2721 = vrot.lane.b32.xlu1 %v2369_v19, %s3482_s6  ;;  %s2900_s6 = sshll.u32 %s2896_s23, 4  ;;  %s2901_s6 = int_to_ptr.hbm [resolvable:$true] %s2900_s6 }
 0xbfb   : > { %s3419_s28 = sshra.s32 %s2901_s6, 4  ;;  %s3420_s28 = int_to_ptr.hbm [resolvable:$true] %s3419_s28 }
 0xbfc   : > { %p3426_p0 = scmp.lt.s32.totalorder %s3420_s28, %s4872_s20 }
 0xc00   : > { %v2025_v48 = vpop.f32.mrf.mxu3 }
 0xc01   : > { %2717 = vrot.lane.b32.xlu2 %v2025_v48, %s5005_s29  ;;  %s3012_s29 = sshll.u32 %s674_s0, 3 }
 0xc02   : > { %s676_s5 = scalar_lea.vmem [#allocation2], %s3012_s29 }
 0xc03   : > { %s2898_s27 = sshll.u32 %s676_s5, 4  ;;  %s2899_s27 = int_to_ptr.vmem [resolvable:$true] %s2898_s27 }
 0xc0c   : > { %v2713_v52 = vpop.f32.mrf.mxu1 }
 0xc0d   : > { %2725 = vrot.lane.b32.xlu0 %v2713_v52, %s3483_s3  ;;  %s3421_s3 = scalar_lea.hbm %s3420_s28, 8 }
 0xc0e   : > { %p3422_p11 = scmp.ne.s32.totalorder %s3420_s28, %s3421_s3  ;;  %p3427_p1 = scmp.lt.s32.totalorder %s3425_s21, %s3421_s3 }
 0xc10   : > { %p3423_p12 = pnand %p3422_p11, %p3658_p5  ;;  %p3428_p2 = por %p3427_p1, %p3426_p0 }
 0xc12   : > { %p3424_p13 = pneg %p3423_p12 }
 0xc14   : > { %p3429_p3 = pnand %p3428_p2, %p3424_p13 }
 0xc5b   : > { %v2718_v1 = vpop.permute.xlu2 %2717 }
 0xc5c   : > { %v2728_v37 = vsel %vm745_vm1, %v1671_v45, %v2718_v1 }
 0xc6c   : > { %v2722_v49 = vpop.permute.xlu1 %2721 }
 0xc6d   : > { %v2729_v28 = vsel %vm1072_vm4, %v2728_v37, %v2722_v49 }
 0xc7f   : > { %v2726_v42 = vpop.permute.xlu0 %2725 }
 0xc80   : > { %v2730_v8 = vsel %vm1074_vm5, %v2729_v28, %v2726_v42 }
 0xc81   : > { %3065 = vmatmul.msk.f32.vlgmr.msra.gmra.mxu3 %vm712_vm0, %v2730_v8  ;;  %v2880_v8 = vperm.slane %v3404_v17, 4 }
 0xd04   : > { %v2759_v2 = vpop.f32.mrf.mxu3 }
 0xd05   : > { %v2760_v59 = vadd.f32 %v3361_v40, %v2759_v2 }
 0xd07   : > { %v2762_v6 = vadd.f32 %v2760_v59, %v5006_v23  ;;  %v2882_v59 = vperm.slane %v3404_v17, 5 }
 0xd09   : > { %v2763_v30 = vsel %vm712_vm0, %v2762_v6, 0.0 }
 0xd0a   : > { %2764 = vadd.xlane.f32.xlu2 %v2763_v30 }
 0xd7d   : > { %v2765_v14 = vpop.xlane.xlu2 %2764 }
 0xd7e   : > { %v2766_v36 = vmul.f32 %v2765_v14, %v5007_v35 }
 0xd80   : > { %v2767_v41 = vsub.f32 %v2762_v6, %v2766_v36 }
 0xd82   : > { %v2768_v53 = vmul.f32 %v2767_v41, %v2767_v41 }
 0xd84   : > { %v2769_v0 = vsel %vm712_vm0, %v2768_v53, 0.0 }
 0xd85   : > { %2770 = vadd.xlane.f32.xlu1 %v2769_v0 }
 0xdf8   : > { %v2771_v54 = vpop.xlane.xlu1 %2770 }
 0xdf9   : > { %v2772_v57 = vmul.f32 %v2771_v54, %v5007_v35 }
 0xdfb   : > { %v2773_v58 = vadd.f32 1e-05, %v2772_v57 }
 0xdfd   : > { %3400 = vrsqrt.f32 %v2773_v58  ;;  %vm2780_vm4 = vweird.f32 %v2773_v58 }
 0xe03   : > { %v3401_v15 = vpop.eup %3400 }
 0xe04   : > { %v2775_v32 = vmul.f32 %v3401_v15, %v2773_v58  ;;  %vm2781_vm1 = vweird.f32 %v3401_v15 }
 0xe05   : > { %vm2782_vm5 = vmor %vm2780_vm4, %vm2781_vm1 }
 0xe06   : > { %v2776_v10 = vmul.f32 %v3401_v15, %v2775_v32 }
 0xe08   : > { %v2777_v27 = vmul.f32 0.5, %v2776_v10 }
 0xe0a   : > { %v2778_v51 = vsub.f32 1.5, %v2777_v27 }
 0xe0c   : > { %v2779_v33 = vmul.f32 %v3401_v15, %v2778_v51 }
 0xe0e   : > { %v2783_v63 = vsel %vm2782_vm5, %v3401_v15, %v2779_v33 }
 0xe0f   : > { %v2784_v21 = vmul.f32 %v2783_v63, %v2767_v41 }
 0xe11   : > { %v2786_v12 = vmul.f32 %v2785_v18, %v2784_v21 }
 0xe13   : > { %v2788_v4 = vadd.f32 %v2787_v44, %v2786_v12 }
 0xe15   : > { %3066 = vmatmul.msk.f32.vlgmr.msra.gmra.mxu2 %vm712_vm0, %v2788_v4 }
 0xe98   : > { %v2817_v7 = vpop.f32.mrf.mxu2 }
 0xe99   : > { %v2818_v24 = vadd.f32 %v3362_v26, %v2817_v7 }
 0xe9b   : > { %v2820_v60 = vmax.f32 %v2818_v24, 0.0 }
 0xe9d   : > { %3067 = vmatmul.msk.f32.vlgmr.msrb.gmra.mxu3 %vm2833_vm6, %v2820_v60 }
 0xf20   : > { %v2854_v43 = vpop.f32.mrf.mxu3 }
 0xf21   : > { %v2855_v62 = vadd.f32 %v3363_v22, %v2854_v43 }
 0xf23   : > { %v2857_v55 = vadd.f32 %v2855_v62, %v2788_v4 }
 0xf25   : > { %v2858_v29 = vsel %vm712_vm0, %v2857_v55, 0.0 }
 0xf26   : > { %2859 = vadd.xlane.f32.xlu0 %v2858_v29 }
 0xf99   : > { %v2860_v39 = vpop.xlane.xlu0 %2859 }
 0xf9a   : > { %v2861_v19 = vmul.f32 %v2860_v39, %v5007_v35 }
 0xf9c   : > { %v2862_v48 = vsub.f32 %v2857_v55, %v2861_v19 }
 0xf9e   : > { %v2863_v45 = vmul.f32 %v2862_v48, %v2862_v48 }
 0xfa0   : > { %v2864_v52 = vsel %vm712_vm0, %v2863_v45, 0.0 }
 0xfa1   : > { %2865 = vadd.xlane.f32.xlu2 %v2864_v52 }
0x1014   : > { %v2866_v5 = vpop.xlane.xlu2 %2865 }
0x1015   : > { %v2867_v50 = vmul.f32 %v2866_v5, %v5007_v35 }
0x1017   : > { %v2868_v47 = vadd.f32 1e-05, %v2867_v50 }
0x1019   : > { %3402 = vrsqrt.f32 %v2868_v47  ;;  %vm2875_vm8 = vweird.f32 %v2868_v47 }
0x101f   : > { %v3403_v20 = vpop.eup %3402 }
0x1020   : > { %v2870_v1 = vmul.f32 %v3403_v20, %v2868_v47  ;;  %vm2876_vm7 = vweird.f32 %v3403_v20 }
0x1021   : > { %vm2877_vm10 = vmor %vm2875_vm8, %vm2876_vm7 }
0x1022   : > { %v2871_v49 = vmul.f32 %v3403_v20, %v2870_v1 }
0x1024   : > { %v2872_v37 = vmul.f32 0.5, %v2871_v49 }
0x1026   : > { %v2873_v28 = vsub.f32 1.5, %v2872_v37 }
0x1028   : > { %v2874_v42 = vmul.f32 %v3403_v20, %v2873_v28 }
0x102a   : > { %v2878_v40 = vsel %vm2877_vm10, %v3403_v20, %v2874_v42 }
0x102b   : > { %v2879_v2 = vmul.f32 %v2878_v40, %v2862_v48 }
0x102d   : > { %v2881_v23 = vmul.f32 %v2880_v8, %v2879_v2 }
0x102f   : > { %v2883_v6 = vadd.f32 %v2882_v59, %v2881_v23 }
0x1031   : > { %2884 = vst.msk [vmem:[%s676_s5] sm:$0xff] %vm712_vm0, %v2883_v6 }
0x1032   : > { %3432 = shalt.err (!%p3429_p3)
}
0x1033   : > { %3081 = dma.vmem_to_hbm [thread:$0]  (%p3658_p5), %s2899_s27, 128, %s2901_s6, %s2886_s2  }
0x1034 PF: > { %s5008_s0 = sld [smem:[#allocation7_spill]] }
0x1035   : > { %s5009_s1 = sld [smem:[#allocation5_spill]] }
0x103a   : > { %p3087_p4 = scmp.ge.s32.totalorder %s5008_s0, 2 }
0x103b   : > { %s2912_s23 = sand.u32 1, %s5009_s1  }
0x103c   : > { %p3084_p7 = pnand %p3087_p4, %p3662_p6  ;;  %s2913_s5 = scalar_lea.sflag [#allocation3], %s2912_s23 }
0x103e   : > { %p3085_p8 = pneg %p3084_p7 }
0x1040   : > { %3450 = dma.done.wait (%p3085_p8), %s2913_s5, 128  }
0x1041   : > { %3452 = vsyncadd (%p3085_p8), %s2913_s5, 4294967168  ;;  %s5011_s24 = sld [smem:[#allocation8_spill]]  ;;  %s5014_s1 = smov %s3459_s22 }
0x1042   : > { %s5012_s28 = sld [smem:[#allocation6_spill]] }
0x1043   : > { %s5013_s23 = sld [smem:[#allocation9_spill]] }
0x1047   : > { %p30_p9 = scmp.ge.s32.totalorder %s5011_s24, 4  }
0x1048   : > { %s5015_s22 = smov %s5012_s28 }
0x1049   :  { %32 = sbr.rel (!%p30_p9) target bundleno = 11 (0xb), region = 147 }
0x104e   :  { %2919 = vsyncpa [#allocation3], 1 }
0x104f   :  { %2921 = vsyncpa [#allocation3 + $0x1], 1 }

</bundles_post_ra>
